<compile_context>
chip_gen: v7x
topology: tpu7x:2x2x1
jax: 0.10.0
libtpu: 0.0.40
codegen_flags: <defaults>
</compile_context>

<pallas_src>
import functools

import jax
import jax.numpy as jnp
from jax.experimental import pallas as pl
from jax.experimental.pallas import tpu as pltpu


def attention_kernel(xf_ref, wq_ref, bq_ref, wk_ref, bk_ref, wv_ref, bv_ref,
                     wp_ref, bp_ref, o_ref, kh_ref, vh_ref,
                     *, n_heads, head_dim, cache_kv):
    # xf_ref: (1, N, D) full token rows of this batch element
    # wq/wk/wv/wp_ref: (D, D) pre-transposed (wq already scale-folded)
    # b*_ref: (1, D)  (bq already scale-folded)
    # o_ref:  (1, tq, D)
    # kh_ref/vh_ref: (H, N, hd) VMEM scratch -- K/V cache across query tiles
    H, hd = n_heads, head_dim
    n_kv = xf_ref.shape[1]
    tq = o_ref.shape[1]
    cdt = xf_ref.dtype                 # native MXU operand dtype (bf16 stays bf16)
    qi = pl.program_id(1)

    def fill_kv():
        # Full-row K/V projection: big 2-D MXU matmuls, f32 accumulation,
        # then one head relayout per tensor into the VMEM cache.
        xf = xf_ref[0]                                               # (N, D)
        k = jnp.dot(xf, wk_ref[...], preferred_element_type=jnp.float32) + bk_ref[...]
        v = jnp.dot(xf, wv_ref[...], preferred_element_type=jnp.float32) + bv_ref[...]
        kh_ref[...] = pltpu.einshape("mhd->hmd", k.astype(cdt).reshape(n_kv, H, hd))
        vh_ref[...] = pltpu.einshape("mhd->hmd", v.astype(cdt).reshape(n_kv, H, hd))

    if cache_kv:
        # qi axis is "arbitrary": compute K/V once per batch element, reuse
        # for every query tile.
        @pl.when(qi == 0)
        def _():
            fill_kv()
    else:
        # qi axis kept "parallel" (e.g. B == 1 on a 2-TC chip): recompute.
        fill_kv()

    # Query rows sliced out of the already-resident full-row block (no second
    # DMA of x).  Softmax scale is pre-folded into wq/bq on the host.
    q_start = pl.multiple_of(qi * tq, tq)
    xq = xf_ref[0, pl.ds(q_start, tq), :]                            # (tq, D)
    q = jnp.dot(xq, wq_ref[...], preferred_element_type=jnp.float32) + bq_ref[...]
    qh = pltpu.einshape("mhd->hmd", q.astype(cdt).reshape(tq, H, hd))  # (H, tq, hd)

    kh = kh_ref[...]                                                 # (H, N, hd)
    vh = vh_ref[...]                                                 # (H, N, hd)

    # Batched-head scores: contraction over the last dim of both operands,
    # so no explicit k.T / XLU transpose is materialized.
    s = jnp.einsum("hqd,hkd->hqk", qh, kh,
                   preferred_element_type=jnp.float32)               # (H, tq, N)

    # Numerically stable softmax, kept in f32 (no bf16 VPU/EUP on v5e).
    # TODO(synk): on v6e/v7x a bf16 exp would roughly double EUP throughput;
    # kept f32 here to preserve the 1e-4 match against the reference.
    s = s - jnp.max(s, axis=-1, keepdims=True)
    p = jnp.exp(s)
    l = jnp.sum(p, axis=-1, keepdims=True)                           # (H, tq, 1)
    # attn_drop is identity (attn_p = 0.0).

    ctx = jnp.einsum("hqk,hkd->hqd", p.astype(cdt), vh,
                     preferred_element_type=jnp.float32)             # (H, tq, hd)
    # Normalize the context (tq*D elements) instead of the (tq*N) score rows.
    ctx = ctx * pl.reciprocal(l, approx=False)

    # Back to the lane-dense (tq, D) slab expected by the output projection
    # (== torch's transpose(1, 2).flatten(2)).
    ctx2 = pltpu.einshape("hmd->mhd", ctx).reshape(tq, H * hd).astype(cdt)

    y = jnp.dot(ctx2, wp_ref[...], preferred_element_type=jnp.float32) + bp_ref[...]
    # proj_drop is identity (proj_p = 0.0).
    o_ref[0] = y.astype(o_ref.dtype)


def attention_forward(x, params, *, n_heads, q_tile=None, cache_kv=None):
    """x: (B, N, D). params: PyTorch-convention weights (W is (out, in))."""
    B, N, D = x.shape
    assert D % n_heads == 0
    head_dim = D // n_heads
    scale = head_dim ** (-0.5)
    isz = x.dtype.itemsize

    # Split fused qkv weight/bias, pre-transpose, and fold the softmax scale
    # into the Q projection -- all once, on the host.
    w_qkv, b_qkv = params["w_qkv"], params["b_qkv"]
    wq_t = (w_qkv[0 * D:1 * D] * scale).T            # (D, D), scale folded
    wk_t = w_qkv[1 * D:2 * D].T
    wv_t = w_qkv[2 * D:3 * D].T
    bq = (b_qkv[0 * D:1 * D] * scale)[None, :]       # (1, D), scale folded
    bk = b_qkv[1 * D:2 * D][None, :]
    bv = b_qkv[2 * D:3 * D][None, :]
    wp_t = params["w_proj"].T                        # (D, D)
    bp = params["b_proj"][None, :]                   # (1, D)

    # Per-generation VMEM budget (v5e/v6e: 128 MiB, v7x: 64 MiB physical).
    try:
        info = pltpu.get_tpu_info()
        vmem_cap = getattr(info, "vmem_capacity_bytes", 64 * 1024 * 1024)
    except Exception:  # e.g. interpret mode / no device query available
        vmem_cap = 64 * 1024 * 1024
    vmem_limit = min(int(vmem_cap * 0.75), 96 * 1024 * 1024)

    def est_bytes(tq):
        # Double-buffered x rows + output, single-buffered weights/biases,
        # K/V scratch cache, plus f32 intermediates (scores dominate).
        fixed = 2 * N * D * isz + 2 * tq * D * isz
        fixed += 4 * D * D * isz + 4 * D * isz
        fixed += 2 * n_heads * N * head_dim * isz            # K/V cache
        inter = 2 * n_heads * tq * N * 4                      # s and p (f32)
        inter += 3 * tq * D * 4 + 2 * N * D * 4               # q/ctx + k/v proj
        return fixed + inter

    # Query tiling: biggest tile whose working set fits comfortably in VMEM.
    # tq must be a multiple of 8 (sublane) or equal to the full N.
    if q_tile is None:
        budget = max(vmem_limit // 2, 8 * 1024 * 1024)
        divs = [t for t in range(N - (N % 8), 7, -8) if t > 0 and N % t == 0]
        cands = [N] + divs                         # prefer fewest grid steps
        fitting = [t for t in cands if est_bytes(t) <= budget]
        if fitting:
            q_tile = fitting[0]
        elif divs:
            q_tile = divs[-1]                      # smallest tile, best effort
        else:
            q_tile = N
    n_q = N // q_tile

    # K/V caching requires the qi axis to be "arbitrary".  On v7x (2 TCs) with
    # B == 1 and n_q > 1 that idles a core; callers can pass cache_kv=False to
    # keep both axes "parallel" and accept the K/V recompute instead.
    # TODO(synk): auto-detect TensorCore count to pick this per generation.
    if cache_kv is None:
        cache_kv = True
    sem = ("parallel", "arbitrary") if cache_kv else ("parallel", "parallel")

    kernel = functools.partial(attention_kernel, n_heads=n_heads,
                               head_dim=head_dim, cache_kv=cache_kv)
    args = (x, wq_t, bq, wk_t, bk, wv_t, bv, wp_t, bp)

    def build_call(single_buffer_weights):
        def const_spec(shape):
            idx = lambda b, qi, _n=len(shape): (0,) * _n
            if single_buffer_weights:
                # Grid-invariant blocks: no steady-state re-DMA to overlap, so
                # a single buffer halves their VMEM footprint.
                return pl.BlockSpec(shape, idx, pipeline_mode=pl.Buffered(1))
            return pl.BlockSpec(shape, idx)

        grid_spec = pltpu.PrefetchScalarGridSpec(
            num_scalar_prefetch=0,
            grid=(B, n_q),
            in_specs=[
                pl.BlockSpec((1, N, D), lambda b, qi: (b, 0, 0)),   # x full rows
                const_spec((D, D)), const_spec((1, D)),             # wq_t, bq
                const_spec((D, D)), const_spec((1, D)),             # wk_t, bk
                const_spec((D, D)), const_spec((1, D)),             # wv_t, bv
                const_spec((D, D)), const_spec((1, D)),             # wp_t, bp
            ],
            out_specs=pl.BlockSpec((1, q_tile, D), lambda b, qi: (b, qi, 0)),
            scratch_shapes=[
                pltpu.VMEM((n_heads, N, head_dim), x.dtype),        # K cache
                pltpu.VMEM((n_heads, N, head_dim), x.dtype),        # V cache
            ],
        )
        return pl.pallas_call(
            kernel,
            out_shape=jax.ShapeDtypeStruct((B, N, D), x.dtype),
            grid_spec=grid_spec,
            compiler_params=pltpu.CompilerParams(
                dimension_semantics=sem,
                vmem_limit_bytes=vmem_limit,
            ),
        )

    try:
        return build_call(True)(*args)
    except Exception:
        # Fallback if pl.Buffered(1) is rejected by this jax/Mosaic version.
        return build_call(False)(*args)


def attention_reference(x, params, *, n_heads):
    """Pure-JAX reference mirroring the PyTorch forward exactly."""
    B, N, D = x.shape
    hd = D // n_heads
    scale = hd ** (-0.5)
    qkv = x @ params["w_qkv"].T + params["b_qkv"]               # (B, N, 3D)
    qkv = qkv.reshape(B, N, 3, n_heads, hd)
    q, k, v = jnp.transpose(qkv, (2, 0, 3, 1, 4))               # (B, H, N, hd) each
    dp = jnp.einsum("bhqd,bhkd->bhqk", q, k) * scale
    attn = jax.nn.softmax(dp, axis=-1)
    wa = jnp.einsum("bhqk,bhkd->bhqd", attn, v)                 # (B, H, N, hd)
    wa = jnp.transpose(wa, (0, 2, 1, 3)).reshape(B, N, D)
    return wa @ params["w_proj"].T + params["b_proj"]


if __name__ == "__main__":
    B, N, D, H = 2, 8, 32, 8   # batch, tokens, dim, heads  (head_dim = 4)

    key = jax.random.PRNGKey(0)
    kx, k1, k2, k3, k4 = jax.random.split(key, 5)
    x = jax.random.normal(kx, (B, N, D), dtype=jnp.float32)
    params = {
        "w_qkv": jax.random.normal(k1, (3 * D, D), dtype=jnp.float32) * 0.05,
        "b_qkv": jax.random.normal(k2, (3 * D,), dtype=jnp.float32) * 0.01,
        "w_proj": jax.random.normal(k3, (D, D), dtype=jnp.float32) * 0.05,
        "b_proj": jax.random.normal(k4, (D,), dtype=jnp.float32) * 0.01,
    }

    out = attention_forward(x, params, n_heads=H)
    out = jax.block_until_ready(out)

    ref = attention_reference(x, params, n_heads=H)
    assert out.shape == (B, N, D)
    assert jnp.allclose(out, ref, atol=1e-4, rtol=1e-4), "mismatch vs reference"

    print("KERNEL_OK")
</pallas_src>

<mosaic_0001>
module attributes {stable_mosaic.version = 11 : i64} {
  func.func @attention_kernel(%arg0: i32, %arg1: i32, %arg2: memref<1x8x32xf32, #tpu.memory_space<vmem>>, %arg3: memref<32x32xf32, #tpu.memory_space<vmem>>, %arg4: memref<1x32xf32, #tpu.memory_space<vmem>>, %arg5: memref<32x32xf32, #tpu.memory_space<vmem>>, %arg6: memref<1x32xf32, #tpu.memory_space<vmem>>, %arg7: memref<32x32xf32, #tpu.memory_space<vmem>>, %arg8: memref<1x32xf32, #tpu.memory_space<vmem>>, %arg9: memref<32x32xf32, #tpu.memory_space<vmem>>, %arg10: memref<1x32xf32, #tpu.memory_space<vmem>>, %arg11: memref<1x8x32xf32, #tpu.memory_space<vmem>>, %arg12: memref<8x8x4xf32, #tpu.memory_space<vmem>>, %arg13: memref<8x8x4xf32, #tpu.memory_space<vmem>>) attributes {dimension_semantics = [#tpu.dimension_semantics<parallel>, #tpu.dimension_semantics<arbitrary>], iteration_bounds = array<i64: 2, 1>, scalar_prefetch = 0 : i64, scratch_operands = 2 : i64, tpu.core_type = #tpu.core_type<tc>, window_params = [{transform_indices = @transform_0, window_bounds = array<i64: 1, 8, 32>}, {pipeline_mode = #tpu.pipeline_mode<synchronous>, transform_indices = @transform_1, window_bounds = array<i64: 32, 32>}, {pipeline_mode = #tpu.pipeline_mode<synchronous>, transform_indices = @transform_2, window_bounds = array<i64: 1, 32>}, {pipeline_mode = #tpu.pipeline_mode<synchronous>, transform_indices = @transform_3, window_bounds = array<i64: 32, 32>}, {pipeline_mode = #tpu.pipeline_mode<synchronous>, transform_indices = @transform_4, window_bounds = array<i64: 1, 32>}, {pipeline_mode = #tpu.pipeline_mode<synchronous>, transform_indices = @transform_5, window_bounds = array<i64: 32, 32>}, {pipeline_mode = #tpu.pipeline_mode<synchronous>, transform_indices = @transform_6, window_bounds = array<i64: 1, 32>}, {pipeline_mode = #tpu.pipeline_mode<synchronous>, transform_indices = @transform_7, window_bounds = array<i64: 32, 32>}, {pipeline_mode = #tpu.pipeline_mode<synchronous>, transform_indices = @transform_8, window_bounds = array<i64: 1, 32>}, {transform_indices = @transform_9, window_bounds = array<i64: 1, 8, 32>}]} {
    %c0_i32 = arith.constant 0 : i32
    %0 = arith.cmpi eq, %arg1, %c0_i32 : i32
    %1 = arith.extui %0 : i1 to i32
    %c0_i32_0 = arith.constant 0 : i32
    %2 = arith.cmpi ne, %1, %c0_i32_0 : i32
    scf.if %2 {
      %c0_24 = arith.constant 0 : index
      %c0_25 = arith.constant 0 : index
      %c0_26 = arith.constant 0 : index
      %39 = vector.load %arg2[%c0_24, %c0_25, %c0_26] : memref<1x8x32xf32, #tpu.memory_space<vmem>>, vector<1x8x32xf32>
      %40 = vector.shape_cast %39 : vector<1x8x32xf32> to vector<8x32xf32>
      %c0_27 = arith.constant 0 : index
      %c0_28 = arith.constant 0 : index
      %41 = vector.load %arg5[%c0_27, %c0_28] : memref<32x32xf32, #tpu.memory_space<vmem>>, vector<32x32xf32>
      %cst_29 = arith.constant dense<0.000000e+00> : vector<8x32xf32>
      %42 = tpu.matmul %40, %41, %cst_29 {dimension_numbers = #tpu.dot_dimension_numbers<[1], [0], [0], [1], [0, 0, 1, 1], [], []>} : vector<8x32xf32>, vector<32x32xf32>, vector<8x32xf32> -> vector<8x32xf32>
      %c0_30 = arith.constant 0 : index
      %c0_31 = arith.constant 0 : index
      %43 = vector.load %arg6[%c0_30, %c0_31] : memref<1x32xf32, #tpu.memory_space<vmem>>, vector<1x32xf32>
      %44 = vector.broadcast %43 : vector<1x32xf32> to vector<8x32xf32>
      %45 = arith.addf %42, %44 : vector<8x32xf32>
      %c0_32 = arith.constant 0 : index
      %c0_33 = arith.constant 0 : index
      %46 = vector.load %arg7[%c0_32, %c0_33] : memref<32x32xf32, #tpu.memory_space<vmem>>, vector<32x32xf32>
      %cst_34 = arith.constant dense<0.000000e+00> : vector<8x32xf32>
      %47 = tpu.matmul %40, %46, %cst_34 {dimension_numbers = #tpu.dot_dimension_numbers<[1], [0], [0], [1], [0, 0, 1, 1], [], []>} : vector<8x32xf32>, vector<32x32xf32>, vector<8x32xf32> -> vector<8x32xf32>
      %c0_35 = arith.constant 0 : index
      %c0_36 = arith.constant 0 : index
      %48 = vector.load %arg8[%c0_35, %c0_36] : memref<1x32xf32, #tpu.memory_space<vmem>>, vector<1x32xf32>
      %49 = vector.broadcast %48 : vector<1x32xf32> to vector<8x32xf32>
      %50 = arith.addf %47, %49 : vector<8x32xf32>
      %51 = vector.shape_cast %45 : vector<8x32xf32> to vector<8x8x4xf32>
      %52 = tpu.transpose %51, [1, 0, 2] : vector<8x8x4xf32> -> vector<8x8x4xf32>
      %c0_37 = arith.constant 0 : index
      %c0_38 = arith.constant 0 : index
      %c0_39 = arith.constant 0 : index
      %53 = vector.load %arg12[%c0_37, %c0_38, %c0_39] : memref<8x8x4xf32, #tpu.memory_space<vmem>>, vector<8x8x4xf32>
      tpu.vector_store %arg12[%c0_37, %c0_38, %c0_39], %52 {strides = array<i32>} : memref<8x8x4xf32, #tpu.memory_space<vmem>>, vector<8x8x4xf32>,
      %54 = vector.shape_cast %50 : vector<8x32xf32> to vector<8x8x4xf32>
      %55 = tpu.transpose %54, [1, 0, 2] : vector<8x8x4xf32> -> vector<8x8x4xf32>
      %c0_40 = arith.constant 0 : index
      %c0_41 = arith.constant 0 : index
      %c0_42 = arith.constant 0 : index
      %56 = vector.load %arg13[%c0_40, %c0_41, %c0_42] : memref<8x8x4xf32, #tpu.memory_space<vmem>>, vector<8x8x4xf32>
      tpu.vector_store %arg13[%c0_40, %c0_41, %c0_42], %55 {strides = array<i32>} : memref<8x8x4xf32, #tpu.memory_space<vmem>>, vector<8x8x4xf32>,
    } else {
    }
    %c8_i32 = arith.constant 8 : i32
    %3 = arith.muli %arg1, %c8_i32 : i32
    %4 = tpu.assume_multiple %3, 8 : i32
    %c0 = arith.constant 0 : index
    %5 = arith.index_cast %4 : i32 to index
    %c0_1 = arith.constant 0 : index
    %6 = vector.load %arg2[%c0, %5, %c0_1] : memref<1x8x32xf32, #tpu.memory_space<vmem>>, vector<1x8x32xf32>
    %7 = vector.shape_cast %6 : vector<1x8x32xf32> to vector<8x32xf32>
    %c0_2 = arith.constant 0 : index
    %c0_3 = arith.constant 0 : index
    %8 = vector.load %arg3[%c0_2, %c0_3] : memref<32x32xf32, #tpu.memory_space<vmem>>, vector<32x32xf32>
    %cst = arith.constant dense<0.000000e+00> : vector<8x32xf32>
    %9 = tpu.matmul %7, %8, %cst {dimension_numbers = #tpu.dot_dimension_numbers<[1], [0], [0], [1], [0, 0, 1, 1], [], []>} : vector<8x32xf32>, vector<32x32xf32>, vector<8x32xf32> -> vector<8x32xf32>
    %c0_4 = arith.constant 0 : index
    %c0_5 = arith.constant 0 : index
    %10 = vector.load %arg4[%c0_4, %c0_5] : memref<1x32xf32, #tpu.memory_space<vmem>>, vector<1x32xf32>
    %11 = vector.broadcast %10 : vector<1x32xf32> to vector<8x32xf32>
    %12 = arith.addf %9, %11 : vector<8x32xf32>
    %13 = vector.shape_cast %12 : vector<8x32xf32> to vector<8x8x4xf32>
    %14 = tpu.transpose %13, [1, 0, 2] : vector<8x8x4xf32> -> vector<8x8x4xf32>
    %c0_6 = arith.constant 0 : index
    %c0_7 = arith.constant 0 : index
    %c0_8 = arith.constant 0 : index
    %15 = vector.load %arg12[%c0_6, %c0_7, %c0_8] : memref<8x8x4xf32, #tpu.memory_space<vmem>>, vector<8x8x4xf32>
    %c0_9 = arith.constant 0 : index
    %c0_10 = arith.constant 0 : index
    %c0_11 = arith.constant 0 : index
    %16 = vector.load %arg13[%c0_9, %c0_10, %c0_11] : memref<8x8x4xf32, #tpu.memory_space<vmem>>, vector<8x8x4xf32>
    "tpu.trace_start"() <{level = 10 : i32, message = "hqd,hkd->hqk"}> : () -> ()
    %cst_12 = arith.constant dense<0.000000e+00> : vector<8x8x8xf32>
    %17 = tpu.matmul %14, %15, %cst_12 {dimension_numbers = #tpu.dot_dimension_numbers<[2], [2], [1], [1], [0, 0, 0, 1, 1, 1], [0], [0]>} : vector<8x8x4xf32>, vector<8x8x4xf32>, vector<8x8x8xf32> -> vector<8x8x8xf32>
    "tpu.trace_stop"() : () -> ()
    %cst_13 = arith.constant dense<0xFF800000> : vector<8x8xf32>
    %18 = vector.multi_reduction <maximumf>, %17, %cst_13 [2] : vector<8x8x8xf32> to vector<8x8xf32>
    %19 = vector.shape_cast %18 : vector<8x8xf32> to vector<8x8x1xf32>
    %20 = vector.broadcast %19 : vector<8x8x1xf32> to vector<8x8x8xf32>
    %21 = arith.subf %17, %20 : vector<8x8x8xf32>
    %22 = math.exp %21 : vector<8x8x8xf32>
    %cst_14 = arith.constant dense<0.000000e+00> : vector<8x8xf32>
    %23 = vector.multi_reduction <add>, %22, %cst_14 [2] : vector<8x8x8xf32> to vector<8x8xf32>
    %24 = vector.shape_cast %23 : vector<8x8xf32> to vector<8x8x1xf32>
    "tpu.trace_start"() <{level = 10 : i32, message = "hqk,hkd->hqd"}> : () -> ()
    %cst_15 = arith.constant dense<0.000000e+00> : vector<8x8x4xf32>
    %25 = tpu.matmul %22, %16, %cst_15 {dimension_numbers = #tpu.dot_dimension_numbers<[2], [1], [1], [2], [0, 0, 0, 1, 1, 2], [0], [0]>} : vector<8x8x8xf32>, vector<8x8x4xf32>, vector<8x8x4xf32> -> vector<8x8x4xf32>
    "tpu.trace_stop"() : () -> ()
    %26 = tpu.reciprocal %24 : vector<8x8x1xf32> -> vector<8x8x1xf32>
    %27 = vector.broadcast %26 : vector<8x8x1xf32> to vector<8x8x4xf32>
    %28 = arith.mulf %25, %27 : vector<8x8x4xf32>
    %29 = tpu.transpose %28, [1, 0, 2] : vector<8x8x4xf32> -> vector<8x8x4xf32>
    %30 = vector.shape_cast %29 : vector<8x8x4xf32> to vector<8x32xf32>
    %c0_16 = arith.constant 0 : index
    %c0_17 = arith.constant 0 : index
    %31 = vector.load %arg9[%c0_16, %c0_17] : memref<32x32xf32, #tpu.memory_space<vmem>>, vector<32x32xf32>
    %cst_18 = arith.constant dense<0.000000e+00> : vector<8x32xf32>
    %32 = tpu.matmul %30, %31, %cst_18 {dimension_numbers = #tpu.dot_dimension_numbers<[1], [0], [0], [1], [0, 0, 1, 1], [], []>} : vector<8x32xf32>, vector<32x32xf32>, vector<8x32xf32> -> vector<8x32xf32>
    %c0_19 = arith.constant 0 : index
    %c0_20 = arith.constant 0 : index
    %33 = vector.load %arg10[%c0_19, %c0_20] : memref<1x32xf32, #tpu.memory_space<vmem>>, vector<1x32xf32>
    %34 = vector.broadcast %33 : vector<1x32xf32> to vector<8x32xf32>
    %35 = arith.addf %32, %34 : vector<8x32xf32>
    %c0_21 = arith.constant 0 : index
    %c0_22 = arith.constant 0 : index
    %c0_23 = arith.constant 0 : index
    %36 = vector.load %arg11[%c0_21, %c0_22, %c0_23] : memref<1x8x32xf32, #tpu.memory_space<vmem>>, vector<1x8x32xf32>
    %37 = vector.shape_cast %36 : vector<1x8x32xf32> to vector<8x32xf32>
    %38 = vector.shape_cast %35 : vector<8x32xf32> to vector<1x8x32xf32>
    tpu.vector_store %arg11[%c0_21, %c0_22, %c0_23], %38 {strides = array<i32>} : memref<1x8x32xf32, #tpu.memory_space<vmem>>, vector<1x8x32xf32>,
    return
  }
  func.func @transform_0(%arg0: i32, %arg1: i32) -> (i32, i32, i32) {
    %c0_i32 = arith.constant 0 : i32
    %c0_i32_0 = arith.constant 0 : i32
    %c0_i32_1 = arith.constant 0 : i32
    return %arg0, %c0_i32, %c0_i32_0 : i32, i32, i32
  }
  func.func @transform_1(%arg0: i32, %arg1: i32) -> (i32, i32) {
    %c0_i32 = arith.constant 0 : i32
    %c0_i32_0 = arith.constant 0 : i32
    %c0_i32_1 = arith.constant 0 : i32
    return %c0_i32, %c0_i32_0 : i32, i32
  }
  func.func @transform_2(%arg0: i32, %arg1: i32) -> (i32, i32) {
    %c0_i32 = arith.constant 0 : i32
    %c0_i32_0 = arith.constant 0 : i32
    %c0_i32_1 = arith.constant 0 : i32
    return %c0_i32, %c0_i32_0 : i32, i32
  }
  func.func @transform_3(%arg0: i32, %arg1: i32) -> (i32, i32) {
    %c0_i32 = arith.constant 0 : i32
    %c0_i32_0 = arith.constant 0 : i32
    %c0_i32_1 = arith.constant 0 : i32
    return %c0_i32, %c0_i32_0 : i32, i32
  }
  func.func @transform_4(%arg0: i32, %arg1: i32) -> (i32, i32) {
    %c0_i32 = arith.constant 0 : i32
    %c0_i32_0 = arith.constant 0 : i32
    %c0_i32_1 = arith.constant 0 : i32
    return %c0_i32, %c0_i32_0 : i32, i32
  }
  func.func @transform_5(%arg0: i32, %arg1: i32) -> (i32, i32) {
    %c0_i32 = arith.constant 0 : i32
    %c0_i32_0 = arith.constant 0 : i32
    %c0_i32_1 = arith.constant 0 : i32
    return %c0_i32, %c0_i32_0 : i32, i32
  }
  func.func @transform_6(%arg0: i32, %arg1: i32) -> (i32, i32) {
    %c0_i32 = arith.constant 0 : i32
    %c0_i32_0 = arith.constant 0 : i32
    %c0_i32_1 = arith.constant 0 : i32
    return %c0_i32, %c0_i32_0 : i32, i32
  }
  func.func @transform_7(%arg0: i32, %arg1: i32) -> (i32, i32) {
    %c0_i32 = arith.constant 0 : i32
    %c0_i32_0 = arith.constant 0 : i32
    %c0_i32_1 = arith.constant 0 : i32
    return %c0_i32, %c0_i32_0 : i32, i32
  }
  func.func @transform_8(%arg0: i32, %arg1: i32) -> (i32, i32) {
    %c0_i32 = arith.constant 0 : i32
    %c0_i32_0 = arith.constant 0 : i32
    %c0_i32_1 = arith.constant 0 : i32
    return %c0_i32, %c0_i32_0 : i32, i32
  }
  func.func @transform_9(%arg0: i32, %arg1: i32) -> (i32, i32, i32) {
    %c0_i32 = arith.constant 0 : i32
    %c0_i32_0 = arith.constant 0 : i32
    return %arg0, %arg1, %c0_i32 : i32, i32, i32
  }
}

module attributes {stable_mosaic.version = 11 : i64} {
  func.func @attention_kernel(%arg0: i32, %arg1: i32, %arg2: memref<1x8x32xf32, #tpu.memory_space<vmem>>, %arg3: memref<32x32xf32, #tpu.memory_space<vmem>>, %arg4: memref<1x32xf32, #tpu.memory_space<vmem>>, %arg5: memref<32x32xf32, #tpu.memory_space<vmem>>, %arg6: memref<1x32xf32, #tpu.memory_space<vmem>>, %arg7: memref<32x32xf32, #tpu.memory_space<vmem>>, %arg8: memref<1x32xf32, #tpu.memory_space<vmem>>, %arg9: memref<32x32xf32, #tpu.memory_space<vmem>>, %arg10: memref<1x32xf32, #tpu.memory_space<vmem>>, %arg11: memref<1x8x32xf32, #tpu.memory_space<vmem>>, %arg12: memref<8x8x4xf32, #tpu.memory_space<vmem>>, %arg13: memref<8x8x4xf32, #tpu.memory_space<vmem>>) attributes {dimension_semantics = [#tpu.dimension_semantics<parallel>, #tpu.dimension_semantics<arbitrary>], iteration_bounds = array<i64: 2, 1>, scalar_prefetch = 0 : i64, scratch_operands = 2 : i64, tpu.core_type = #tpu.core_type<tc>, window_params = [{transform_indices = @transform_0, window_bounds = array<i64: 1, 8, 32>}, {pipeline_mode = #tpu.pipeline_mode<synchronous>, transform_indices = @transform_1, window_bounds = array<i64: 32, 32>}, {pipeline_mode = #tpu.pipeline_mode<synchronous>, transform_indices = @transform_2, window_bounds = array<i64: 1, 32>}, {pipeline_mode = #tpu.pipeline_mode<synchronous>, transform_indices = @transform_3, window_bounds = array<i64: 32, 32>}, {pipeline_mode = #tpu.pipeline_mode<synchronous>, transform_indices = @transform_4, window_bounds = array<i64: 1, 32>}, {pipeline_mode = #tpu.pipeline_mode<synchronous>, transform_indices = @transform_5, window_bounds = array<i64: 32, 32>}, {pipeline_mode = #tpu.pipeline_mode<synchronous>, transform_indices = @transform_6, window_bounds = array<i64: 1, 32>}, {pipeline_mode = #tpu.pipeline_mode<synchronous>, transform_indices = @transform_7, window_bounds = array<i64: 32, 32>}, {pipeline_mode = #tpu.pipeline_mode<synchronous>, transform_indices = @transform_8, window_bounds = array<i64: 1, 32>}, {transform_indices = @transform_9, window_bounds = array<i64: 1, 8, 32>}]} {
    %c0_i32 = arith.constant 0 : i32
    %0 = arith.cmpi eq, %arg1, %c0_i32 : i32
    %1 = arith.extui %0 : i1 to i32
    %c0_i32_0 = arith.constant 0 : i32
    %2 = arith.cmpi ne, %1, %c0_i32_0 : i32
    scf.if %2 {
      %c0_24 = arith.constant 0 : index
      %c0_25 = arith.constant 0 : index
      %c0_26 = arith.constant 0 : index
      %39 = vector.load %arg2[%c0_24, %c0_25, %c0_26] : memref<1x8x32xf32, #tpu.memory_space<vmem>>, vector<1x8x32xf32>
      %40 = vector.shape_cast %39 : vector<1x8x32xf32> to vector<8x32xf32>
      %c0_27 = arith.constant 0 : index
      %c0_28 = arith.constant 0 : index
      %41 = vector.load %arg5[%c0_27, %c0_28] : memref<32x32xf32, #tpu.memory_space<vmem>>, vector<32x32xf32>
      %cst_29 = arith.constant dense<0.000000e+00> : vector<8x32xf32>
      %42 = tpu.matmul %40, %41, %cst_29 {dimension_numbers = #tpu.dot_dimension_numbers<[1], [0], [0], [1], [0, 0, 1, 1], [], []>} : vector<8x32xf32>, vector<32x32xf32>, vector<8x32xf32> -> vector<8x32xf32>
      %c0_30 = arith.constant 0 : index
      %c0_31 = arith.constant 0 : index
      %43 = vector.load %arg6[%c0_30, %c0_31] : memref<1x32xf32, #tpu.memory_space<vmem>>, vector<1x32xf32>
      %44 = vector.broadcast %43 : vector<1x32xf32> to vector<8x32xf32>
      %45 = arith.addf %42, %44 : vector<8x32xf32>
      %c0_32 = arith.constant 0 : index
      %c0_33 = arith.constant 0 : index
      %46 = vector.load %arg7[%c0_32, %c0_33] : memref<32x32xf32, #tpu.memory_space<vmem>>, vector<32x32xf32>
      %cst_34 = arith.constant dense<0.000000e+00> : vector<8x32xf32>
      %47 = tpu.matmul %40, %46, %cst_34 {dimension_numbers = #tpu.dot_dimension_numbers<[1], [0], [0], [1], [0, 0, 1, 1], [], []>} : vector<8x32xf32>, vector<32x32xf32>, vector<8x32xf32> -> vector<8x32xf32>
      %c0_35 = arith.constant 0 : index
      %c0_36 = arith.constant 0 : index
      %48 = vector.load %arg8[%c0_35, %c0_36] : memref<1x32xf32, #tpu.memory_space<vmem>>, vector<1x32xf32>
      %49 = vector.broadcast %48 : vector<1x32xf32> to vector<8x32xf32>
      %50 = arith.addf %47, %49 : vector<8x32xf32>
      %51 = vector.shape_cast %45 : vector<8x32xf32> to vector<8x8x4xf32>
      %52 = tpu.transpose %51, [1, 0, 2] : vector<8x8x4xf32> -> vector<8x8x4xf32>
      %c0_37 = arith.constant 0 : index
      %c0_38 = arith.constant 0 : index
      %c0_39 = arith.constant 0 : index
      %53 = vector.load %arg12[%c0_37, %c0_38, %c0_39] : memref<8x8x4xf32, #tpu.memory_space<vmem>>, vector<8x8x4xf32>
      tpu.vector_store %arg12[%c0_37, %c0_38, %c0_39], %52 {strides = array<i32>} : memref<8x8x4xf32, #tpu.memory_space<vmem>>, vector<8x8x4xf32>,
      %54 = vector.shape_cast %50 : vector<8x32xf32> to vector<8x8x4xf32>
      %55 = tpu.transpose %54, [1, 0, 2] : vector<8x8x4xf32> -> vector<8x8x4xf32>
      %c0_40 = arith.constant 0 : index
      %c0_41 = arith.constant 0 : index
      %c0_42 = arith.constant 0 : index
      %56 = vector.load %arg13[%c0_40, %c0_41, %c0_42] : memref<8x8x4xf32, #tpu.memory_space<vmem>>, vector<8x8x4xf32>
      tpu.vector_store %arg13[%c0_40, %c0_41, %c0_42], %55 {strides = array<i32>} : memref<8x8x4xf32, #tpu.memory_space<vmem>>, vector<8x8x4xf32>,
    } else {
    }
    %c8_i32 = arith.constant 8 : i32
    %3 = arith.muli %arg1, %c8_i32 : i32
    %4 = tpu.assume_multiple %3, 8 : i32
    %c0 = arith.constant 0 : index
    %5 = arith.index_cast %4 : i32 to index
    %c0_1 = arith.constant 0 : index
    %6 = vector.load %arg2[%c0, %5, %c0_1] : memref<1x8x32xf32, #tpu.memory_space<vmem>>, vector<1x8x32xf32>
    %7 = vector.shape_cast %6 : vector<1x8x32xf32> to vector<8x32xf32>
    %c0_2 = arith.constant 0 : index
    %c0_3 = arith.constant 0 : index
    %8 = vector.load %arg3[%c0_2, %c0_3] : memref<32x32xf32, #tpu.memory_space<vmem>>, vector<32x32xf32>
    %cst = arith.constant dense<0.000000e+00> : vector<8x32xf32>
    %9 = tpu.matmul %7, %8, %cst {dimension_numbers = #tpu.dot_dimension_numbers<[1], [0], [0], [1], [0, 0, 1, 1], [], []>} : vector<8x32xf32>, vector<32x32xf32>, vector<8x32xf32> -> vector<8x32xf32>
    %c0_4 = arith.constant 0 : index
    %c0_5 = arith.constant 0 : index
    %10 = vector.load %arg4[%c0_4, %c0_5] : memref<1x32xf32, #tpu.memory_space<vmem>>, vector<1x32xf32>
    %11 = vector.broadcast %10 : vector<1x32xf32> to vector<8x32xf32>
    %12 = arith.addf %9, %11 : vector<8x32xf32>
    %13 = vector.shape_cast %12 : vector<8x32xf32> to vector<8x8x4xf32>
    %14 = tpu.transpose %13, [1, 0, 2] : vector<8x8x4xf32> -> vector<8x8x4xf32>
    %c0_6 = arith.constant 0 : index
    %c0_7 = arith.constant 0 : index
    %c0_8 = arith.constant 0 : index
    %15 = vector.load %arg12[%c0_6, %c0_7, %c0_8] : memref<8x8x4xf32, #tpu.memory_space<vmem>>, vector<8x8x4xf32>
    %c0_9 = arith.constant 0 : index
    %c0_10 = arith.constant 0 : index
    %c0_11 = arith.constant 0 : index
    %16 = vector.load %arg13[%c0_9, %c0_10, %c0_11] : memref<8x8x4xf32, #tpu.memory_space<vmem>>, vector<8x8x4xf32>
    "tpu.trace_start"() <{level = 10 : i32, message = "hqd,hkd->hqk"}> : () -> ()
    %cst_12 = arith.constant dense<0.000000e+00> : vector<8x8x8xf32>
    %17 = tpu.matmul %14, %15, %cst_12 {dimension_numbers = #tpu.dot_dimension_numbers<[2], [2], [1], [1], [0, 0, 0, 1, 1, 1], [0], [0]>} : vector<8x8x4xf32>, vector<8x8x4xf32>, vector<8x8x8xf32> -> vector<8x8x8xf32>
    "tpu.trace_stop"() : () -> ()
    %cst_13 = arith.constant dense<0xFF800000> : vector<8x8xf32>
    %18 = vector.multi_reduction <maximumf>, %17, %cst_13 [2] : vector<8x8x8xf32> to vector<8x8xf32>
    %19 = vector.shape_cast %18 : vector<8x8xf32> to vector<8x8x1xf32>
    %20 = vector.broadcast %19 : vector<8x8x1xf32> to vector<8x8x8xf32>
    %21 = arith.subf %17, %20 : vector<8x8x8xf32>
    %22 = math.exp %21 : vector<8x8x8xf32>
    %cst_14 = arith.constant dense<0.000000e+00> : vector<8x8xf32>
    %23 = vector.multi_reduction <add>, %22, %cst_14 [2] : vector<8x8x8xf32> to vector<8x8xf32>
    %24 = vector.shape_cast %23 : vector<8x8xf32> to vector<8x8x1xf32>
    "tpu.trace_start"() <{level = 10 : i32, message = "hqk,hkd->hqd"}> : () -> ()
    %cst_15 = arith.constant dense<0.000000e+00> : vector<8x8x4xf32>
    %25 = tpu.matmul %22, %16, %cst_15 {dimension_numbers = #tpu.dot_dimension_numbers<[2], [1], [1], [2], [0, 0, 0, 1, 1, 2], [0], [0]>} : vector<8x8x8xf32>, vector<8x8x4xf32>, vector<8x8x4xf32> -> vector<8x8x4xf32>
    "tpu.trace_stop"() : () -> ()
    %26 = tpu.reciprocal %24 : vector<8x8x1xf32> -> vector<8x8x1xf32>
    %27 = vector.broadcast %26 : vector<8x8x1xf32> to vector<8x8x4xf32>
    %28 = arith.mulf %25, %27 : vector<8x8x4xf32>
    %29 = tpu.transpose %28, [1, 0, 2] : vector<8x8x4xf32> -> vector<8x8x4xf32>
    %30 = vector.shape_cast %29 : vector<8x8x4xf32> to vector<8x32xf32>
    %c0_16 = arith.constant 0 : index
    %c0_17 = arith.constant 0 : index
    %31 = vector.load %arg9[%c0_16, %c0_17] : memref<32x32xf32, #tpu.memory_space<vmem>>, vector<32x32xf32>
    %cst_18 = arith.constant dense<0.000000e+00> : vector<8x32xf32>
    %32 = tpu.matmul %30, %31, %cst_18 {dimension_numbers = #tpu.dot_dimension_numbers<[1], [0], [0], [1], [0, 0, 1, 1], [], []>} : vector<8x32xf32>, vector<32x32xf32>, vector<8x32xf32> -> vector<8x32xf32>
    %c0_19 = arith.constant 0 : index
    %c0_20 = arith.constant 0 : index
    %33 = vector.load %arg10[%c0_19, %c0_20] : memref<1x32xf32, #tpu.memory_space<vmem>>, vector<1x32xf32>
    %34 = vector.broadcast %33 : vector<1x32xf32> to vector<8x32xf32>
    %35 = arith.addf %32, %34 : vector<8x32xf32>
    %c0_21 = arith.constant 0 : index
    %c0_22 = arith.constant 0 : index
    %c0_23 = arith.constant 0 : index
    %36 = vector.load %arg11[%c0_21, %c0_22, %c0_23] : memref<1x8x32xf32, #tpu.memory_space<vmem>>, vector<1x8x32xf32>
    %37 = vector.shape_cast %36 : vector<1x8x32xf32> to vector<8x32xf32>
    %38 = vector.shape_cast %35 : vector<8x32xf32> to vector<1x8x32xf32>
    tpu.vector_store %arg11[%c0_21, %c0_22, %c0_23], %38 {strides = array<i32>} : memref<1x8x32xf32, #tpu.memory_space<vmem>>, vector<1x8x32xf32>,
    return
  }
  func.func @transform_0(%arg0: i32, %arg1: i32) -> (i32, i32, i32) {
    %c0_i32 = arith.constant 0 : i32
    %c0_i32_0 = arith.constant 0 : i32
    %c0_i32_1 = arith.constant 0 : i32
    return %arg0, %c0_i32, %c0_i32_0 : i32, i32, i32
  }
  func.func @transform_1(%arg0: i32, %arg1: i32) -> (i32, i32) {
    %c0_i32 = arith.constant 0 : i32
    %c0_i32_0 = arith.constant 0 : i32
    %c0_i32_1 = arith.constant 0 : i32
    return %c0_i32, %c0_i32_0 : i32, i32
  }
  func.func @transform_2(%arg0: i32, %arg1: i32) -> (i32, i32) {
    %c0_i32 = arith.constant 0 : i32
    %c0_i32_0 = arith.constant 0 : i32
    %c0_i32_1 = arith.constant 0 : i32
    return %c0_i32, %c0_i32_0 : i32, i32
  }
  func.func @transform_3(%arg0: i32, %arg1: i32) -> (i32, i32) {
    %c0_i32 = arith.constant 0 : i32
    %c0_i32_0 = arith.constant 0 : i32
    %c0_i32_1 = arith.constant 0 : i32
    return %c0_i32, %c0_i32_0 : i32, i32
  }
  func.func @transform_4(%arg0: i32, %arg1: i32) -> (i32, i32) {
    %c0_i32 = arith.constant 0 : i32
    %c0_i32_0 = arith.constant 0 : i32
    %c0_i32_1 = arith.constant 0 : i32
    return %c0_i32, %c0_i32_0 : i32, i32
  }
  func.func @transform_5(%arg0: i32, %arg1: i32) -> (i32, i32) {
    %c0_i32 = arith.constant 0 : i32
    %c0_i32_0 = arith.constant 0 : i32
    %c0_i32_1 = arith.constant 0 : i32
    return %c0_i32, %c0_i32_0 : i32, i32
  }
  func.func @transform_6(%arg0: i32, %arg1: i32) -> (i32, i32) {
    %c0_i32 = arith.constant 0 : i32
    %c0_i32_0 = arith.constant 0 : i32
    %c0_i32_1 = arith.constant 0 : i32
    return %c0_i32, %c0_i32_0 : i32, i32
  }
  func.func @transform_7(%arg0: i32, %arg1: i32) -> (i32, i32) {
    %c0_i32 = arith.constant 0 : i32
    %c0_i32_0 = arith.constant 0 : i32
    %c0_i32_1 = arith.constant 0 : i32
    return %c0_i32, %c0_i32_0 : i32, i32
  }
  func.func @transform_8(%arg0: i32, %arg1: i32) -> (i32, i32) {
    %c0_i32 = arith.constant 0 : i32
    %c0_i32_0 = arith.constant 0 : i32
    %c0_i32_1 = arith.constant 0 : i32
    return %c0_i32, %c0_i32_0 : i32, i32
  }
  func.func @transform_9(%arg0: i32, %arg1: i32) -> (i32, i32, i32) {
    %c0_i32 = arith.constant 0 : i32
    %c0_i32_0 = arith.constant 0 : i32
    return %arg0, %arg1, %c0_i32 : i32, i32, i32
  }
}

</mosaic_0001>

<bundles_post_ra>
// kernel: tpu_custom_call.1
= control target key start
LH: loop header
LB: loop body
LE: loop exit
PB: predicated region body
PF: predicated region fallthrough
CT: control target
= control target key end

     0   :  { %s4807_s0 = inlined_call_operand.hbm [shape: f32[2,8,32], index: 0, kind: input, shape index: {}]   ;;  %s4808_s1 = inlined_call_operand.hbm [shape: f32[32,32], index: 1, kind: input, shape index: {}]   ;;  %s4809_s2 = inlined_call_operand.vmem [shape: f32[1,32], index: 2, kind: input, shape index: {}]   ;;  %s4810_s3 = inlined_call_operand.hbm [shape: f32[32,32], index: 3, kind: input, shape index: {}]   ;;  %s4811_s4 = inlined_call_operand.vmem [shape: f32[1,32], index: 4, kind: input, shape index: {}]   ;;  %s4812_s5 = inlined_call_operand.hbm [shape: f32[32,32], index: 5, kind: input, shape index: {}]   ;;  %s4813_s6 = inlined_call_operand.vmem [shape: f32[1,32], index: 6, kind: input, shape index: {}]   ;;  %s4814_s7 = inlined_call_operand.hbm [shape: f32[32,32], index: 7, kind: input, shape index: {}]   ;;  %s4815_s8 = inlined_call_operand.vmem [shape: f32[1,32], index: 8, kind: input, shape index: {}]   ;;  %s4816_s9 = inlined_call_operand.hbm [shape: f32[2,8,32], index: 9, kind: output, shape index: {}]  }
   0x1   :  { %4823 = sst [smem:[#allocation19_spill]] %s4808_s1 }
   0x2   :  { %4824 = sst [smem:[#allocation20_spill]] %s4815_s8 }
   0x3   :  { %4825 = sst [smem:[#allocation21_spill]] %s4816_s9 }
   0x4   :  { %14 = vsyncpa [#allocation5], 0 }
   0x5   :  { %16 = vsyncpa [#allocation5 + $0x1], 0 }
   0x6   :  { %17 = vsyncpa [#allocation8], 0 }
   0x7   :  { %18 = vsyncpa [#allocation11], 0 }
   0x8   :  { %19 = vsyncpa [#allocation6], 0 }
   0x9   :  { %21 = vsyncpa [#allocation6 + $0x1], 0  ;;  %s4159_s30 = smov 0   ;;  %s4161_s10 = smov 0  }
   0xa   :  { %s4163_s11 = smov 0   ;;  %s4165_s12 = smov 0  }
   0xb   :  { %s4167_s13 = smov 0   ;;  %s4169_s14 = smov 0  }
   0xc LB: > { %4826 = sst [smem:[#allocation18_spill]] %s4072_s12  ;;  %s4817_s15 = sadd.s32 4294967295, %s4080_s14   ;;  %s4080_s14 = sphi %s4169_s14, %s27_s14   ;;  %s4076_s13 = sphi %s4167_s13, %s4851_s13   ;;  %s4072_s12 = sphi %s4165_s12, %s4850_s12   ;;  %s4068_s11 = sphi %s4163_s11, %s4849_s11   ;;  %s4064_s10 = sphi %s4161_s10, %s4848_s10   ;;  %s4060_s30 = sphi %s4159_s30, %s4847_s30  }
   0xd   : > { %p3409_p0 = scmp.ge.s32.totalorder %s4080_s14, 1  ;;  %p4193_p1 = scmp.eq.s32.totalorder %s4817_s15, 0 }
   0xe   : > { %p266_p2 = scmp.lt.s32.totalorder %s4080_s14, 3  ;;  %s4082_s18 = smov [#allocation7]  }
   0xf   : > { %s4827_s16 = scalar_select %p4193_p1, 1, 0 }
  0x10   : > { %p4198_p3 = pnand %p3409_p0, %p266_p2  ;;  %s278_s19 = sshll.u32 %s4082_s18, 4  ;;  %s4202_s19 = int_to_ptr.vmem [resolvable:$true] %s278_s19 }
  0x11   : > { %s4083_s21 = smov [#allocation10]   ;;  %s4084_s23 = smov [#allocation9]  }
  0x12   : > { %s4828_s17 = scalar_select %p4198_p3, 1, 0 }
  0x13   : > { %p3712_p4 = pneg %p4198_p3  ;;  %s310_s22 = sshll.u32 %s4083_s21, 4  ;;  %s4213_s22 = int_to_ptr.vmem [resolvable:$true] %s310_s22 }
  0x14   : > { %s4215_s24 = sshll.u32 %s4084_s23, 4  ;;  %s4830_s1 = sld [smem:[#allocation19_spill]]  ;;  %s295_s24 = int_to_ptr.vmem [resolvable:$true] %s4215_s24 }
  0x15   : > { %p4209_p6 = pnand %p3712_p4, %p4193_p1 }
  0x17   : > { %p4225_p8 = pneg %p4209_p6 }
  0x1a   : > { %s3848_s27 = scalar_lea.hbm %s4830_s1, 512 }
  0x1b   : > { %p3849_p7 = scmp.ne.s32.totalorder %s4830_s1, %s3848_s27  ;;  %p3855_p11 = scmp.lt.u32.totalorder %s3848_s27, %s4830_s1 }
  0x1d   : > { %p3851_p9 = pnand %p4225_p8, %p3849_p7 }
  0x1f   : > { %p3852_p10 = pneg %p3851_p9 }
  0x21   : > { %p3857_p12 = pnand %p3855_p11, %p3852_p10 }
  0x23   : > { %3860 = shalt.err (!%p3857_p12)
}
  0x24   : > { %s3861_s25 = scalar_lea.vmem %s4202_s19, 512  ;;  %p3869_p4 = scmp.lt.s32.totalorder %s4202_s19, %s4202_s19 }
  0x25   : > { %p3862_p13 = scmp.ne.s32.totalorder %s4202_s19, %s3861_s25  ;;  %p3870_p5 = scmp.lt.s32.totalorder %s3861_s25, %s3861_s25 }
  0x27   : > { %p3864_p0 = pnand %p3862_p13, %p4225_p8  ;;  %p3871_p7 = por %p3870_p5, %p3869_p4 }
  0x29   : > { %p3865_p2 = pneg %p3864_p0 }
  0x2b   : > { %p3872_p9 = pnand %p3871_p7, %p3865_p2 }
  0x2d   : > { %3875 = shalt.err (!%p3872_p9)
}
  0x2e   : > { %s4085_s26 = smov 128   ;;  %s4086_s27 = smov 8  }
  0x2f   : > { %3715 = dma.hbm_to_vmem [thread:$0]  (!%p4209_p6), %s4830_s1, 512, %s4202_s19, [#allocation8], %s4085_s26, %s4085_s26, %s4086_s27  }
  0x30   : > { %s3876_s25 = scalar_lea.hbm %s4812_s5, 512 }
  0x31   : > { %p3877_p5 = scmp.ne.s32.totalorder %s4812_s5, %s3876_s25  ;;  %p3883_p12 = scmp.lt.u32.totalorder %s3876_s25, %s4812_s5 }
  0x33   : > { %p3879_p10 = pnand %p3877_p5, %p4225_p8 }
  0x35   : > { %p3880_p11 = pneg %p3879_p10 }
  0x37   : > { %p3885_p13 = pnand %p3883_p12, %p3880_p11 }
  0x39   : > { %3888 = shalt.err (!%p3885_p13)
}
  0x3a   : > { %s3889_s19 = scalar_lea.vmem %s4213_s22, 512  ;;  %p3897_p7 = scmp.lt.s32.totalorder %s4213_s22, %s4213_s22 }
  0x3b   : > { %p3890_p0 = scmp.ne.s32.totalorder %s4213_s22, %s3889_s19  ;;  %p3898_p9 = scmp.lt.s32.totalorder %s3889_s19, %s3889_s19 }
  0x3d   : > { %p3892_p2 = pnand %p3890_p0, %p4225_p8  ;;  %p3899_p5 = por %p3898_p9, %p3897_p7 }
  0x3f   : > { %p3893_p4 = pneg %p3892_p2 }
  0x41   : > { %p3900_p10 = pnand %p3899_p5, %p3893_p4 }
  0x43   : > { %3903 = shalt.err (!%p3900_p10)
}
  0x44   : > { %3721 = dma.hbm_to_vmem [thread:$0]  (!%p4209_p6), %s4812_s5, 512, %s4213_s22, [#allocation11], %s4085_s26, %s4085_s26, %s4086_s27  }
  0x45   : > { %s3904_s28 = scalar_lea.hbm %s4810_s3, 512 }
  0x46   : > { %p3905_p11 = scmp.ne.s32.totalorder %s4810_s3, %s3904_s28  ;;  %p3911_p0 = scmp.lt.u32.totalorder %s3904_s28, %s4810_s3 }
  0x48   : > { %p3907_p12 = pnand %p3905_p11, %p4225_p8 }
  0x4a   : > { %p3908_p13 = pneg %p3907_p12 }
  0x4c   : > { %p3913_p2 = pnand %p3911_p0, %p3908_p13 }
  0x4e   : > { %3916 = shalt.err (!%p3913_p2)
}
  0x4f   : > { %s3917_s19 = scalar_lea.vmem %s295_s24, 512  ;;  %p3925_p5 = scmp.lt.s32.totalorder %s295_s24, %s295_s24 }
  0x50   : > { %p3918_p4 = scmp.ne.s32.totalorder %s295_s24, %s3917_s19  ;;  %p3926_p10 = scmp.lt.s32.totalorder %s3917_s19, %s3917_s19 }
  0x52   : > { %p3920_p7 = pnand %p3918_p4, %p4225_p8  ;;  %p3927_p3 = por %p3926_p10, %p3925_p5 }
  0x54   : > { %p3921_p9 = pneg %p3920_p7 }
  0x56   : > { %p3928_p1 = pnand %p3927_p3, %p3921_p9 }
  0x58   : > { %3931 = shalt.err (!%p3928_p1)
}
  0x59   : > { %3718 = dma.hbm_to_vmem [thread:$0]  (!%p4209_p6), %s4810_s3, 512, %s295_s24, [#allocation8], %s4085_s26, %s4085_s26, %s4086_s27  }
  0x5a   : > { %s4087_s9 = smov [#allocation12]   ;;  %s3932_s29 = scalar_lea.hbm %s4814_s7, 512 }
  0x5b   : > { %s326_s12 = sshll.u32 %s4087_s9, 4  ;;  %p3933_p1 = scmp.ne.s32.totalorder %s4814_s7, %s3932_s29  ;;  %s327_s12 = int_to_ptr.vmem [resolvable:$true] %s326_s12 }
  0x5c   : > { %p3939_p12 = scmp.lt.u32.totalorder %s3932_s29, %s4814_s7 }
  0x5d   : > { %p3935_p3 = pnand %p3933_p1, %p4225_p8 }
  0x5f   : > { %p3936_p11 = pneg %p3935_p3 }
  0x61   : > { %p3941_p13 = pnand %p3939_p12, %p3936_p11 }
  0x63   : > { %3944 = shalt.err (!%p3941_p13)
}
  0x64   : > { %s3945_s24 = scalar_lea.vmem %s327_s12, 512  ;;  %p3953_p7 = scmp.lt.s32.totalorder %s327_s12, %s327_s12 }
  0x65   : > { %p3946_p0 = scmp.ne.s32.totalorder %s327_s12, %s3945_s24  ;;  %p3954_p9 = scmp.lt.s32.totalorder %s3945_s24, %s3945_s24 }
  0x67   : > { %p3948_p2 = pnand %p3946_p0, %p4225_p8  ;;  %p3955_p5 = por %p3954_p9, %p3953_p7 }
  0x69   : > { %p3949_p4 = pneg %p3948_p2 }
  0x6b   : > { %p3956_p10 = pnand %p3955_p5, %p3949_p4 }
  0x6d   : > { %3959 = shalt.err (!%p3956_p10)
}
  0x6e   : > { %3724 = dma.hbm_to_vmem [thread:$0]  (!%p4209_p6), %s4814_s7, 512, %s327_s12, [#allocation11], %s4085_s26, %s4085_s26, %s4086_s27  }
  0x6f   : > { %s3408_s20 = sadd.s32 4294967294, %s4080_s14   ;;  %s39_s18 = sadd.s32 1, %s4076_s13 }
  0x70   : > { %p41_p8 = scmp.ge.s32.totalorder %s39_s18, 2  ;;  %s46_s9 = sadd.s32 1, %s4068_s11 }
  0x71   : > { %p53_p1 = scmp.ne.s32.totalorder %s4068_s11, %s4064_s10  ;;  %p54_p3 = scmp.eq.s32.totalorder %s4080_s14, 0 }
  0x72   : > { %s4853_s18 = smov (%p41_p8, %s39_s18), 0  ;;  %p59_p12 = scmp.ne.s32.totalorder %s4064_s10, %s4060_s30 }
  0x73   : > { %p4326_p11 = por %p54_p3, %p53_p1  ;;  %s43_s26 = ssub.s32 %s4076_s13, %s4853_s18 }
  0x74   : > { %s4833_s27 = sadd.s32 4294967295, %s4080_s14   ;;  %p44_p13 = scmp.eq.s32.totalorder %s43_s26, 0 }
  0x75   : > { %p253_p6 = scmp.eq.s32.totalorder %s4833_s27, 1  ;;  %p4834_p0 = scmp.ne.s32.totalorder %s4827_s16, 0 }
  0x76   : > { %p259_p7 = scmp.eq.s32.totalorder %s3408_s20, 1  ;;  %p3737_p5 = scmp.lt.s32.totalorder %s4080_s14, 2 }
  0x77   : > { %p4338_p2 = por %p4834_p0, %p59_p12  ;;  %p4342_p4 = por %p253_p6, %p53_p1 }
  0x78   : > { %s4347_s29 = scalar_select %p44_p13, %s4068_s11, %s46_s9  }
  0x79   : > { %s4836_s28 = scalar_select %p4342_p4, 1, 0 }
  0x7a   : > { %p4349_p9 = por %p259_p7, %p59_p12  ;;  %s343_s23 = sand.u32 1, %s4068_s11  }
  0x7b   : > { %s3416_s25 = sshll.u32 %s4076_s13, 7  ;;  %s3415_s19 = sshll.u32 %s343_s23, 3 }
  0x7c   : > { %s4837_s21 = scalar_select %p4349_p9, 1, 0 }
  0x7d   : > { %s4359_s8 = scalar_lea.hbm %s4807_s0, %s3416_s25  ;;  %s347_s20 = scalar_lea.vmem [#allocation4], %s3415_s19 }
  0x7e   : > { %s354_s9 = sshll.u32 %s347_s20, 4  ;;  %p4363_p10 = pnand %p3737_p5, %p4326_p11  ;;  %s4367_s9 = int_to_ptr.vmem [resolvable:$true] %s354_s9 }
  0x7f   : > { %s344_s27 = scalar_lea.sflag [#allocation5], %s343_s23  ;;  %s3960_s1 = scalar_lea.hbm %s4359_s8, 128 }
  0x80   : > { %p3961_p8 = scmp.ne.s32.totalorder %s4359_s8, %s3960_s1  ;;  %p3962_p1 = pneg %p4363_p10 }
  0x81   : > { %s3965_s15 = scalar_lea.hbm %s4807_s0, 256  ;;  %p3966_p11 = scmp.lt.u32.totalorder %s4359_s8, %s4807_s0 }
  0x82   : > { %p3963_p3 = pnand %p3962_p1, %p3961_p8  ;;  %p3967_p6 = scmp.lt.u32.totalorder %s3965_s15, %s3960_s1 }
  0x83   : > { %p3969_p0 = scmp.lt.u32.totalorder %s3960_s1, %s4359_s8 }
  0x84   : > { %p3964_p12 = pneg %p3963_p3  ;;  %p3968_p13 = por %p3967_p6, %p3966_p11 }
  0x86   : > { %p3970_p7 = por %p3969_p0, %p3968_p13 }
  0x88   : > { %p3971_p5 = pnand %p3970_p7, %p3964_p12 }
  0x8a   : > { %3974 = shalt.err (!%p3971_p5)
}
  0x8b   : > { %s3975_s23 = scalar_lea.vmem %s4367_s9, 128  ;;  %s4088_s20 = smov [#allocation4]  }
  0x8c   : > { %p3976_p8 = scmp.ne.s32.totalorder %s4367_s9, %s3975_s23  ;;  %s3980_s25 = sshll.u32 %s4088_s20, 4  ;;  %s3981_s25 = int_to_ptr.vmem [resolvable:$false] %s3980_s25 }
  0x8d   : > { %s3982_s19 = scalar_lea.vmem %s3981_s25, 256  ;;  %p3983_p4 = scmp.lt.s32.totalorder %s4367_s9, %s3981_s25 }
  0x8e   : > { %p3978_p3 = pnand %p3976_p8, %p3962_p1  ;;  %p3984_p11 = scmp.lt.s32.totalorder %s3982_s19, %s3975_s23 }
  0x90   : > { %p3979_p9 = pneg %p3978_p3  ;;  %p3985_p6 = por %p3984_p11, %p3983_p4 }
  0x92   : > { %p3986_p13 = pnand %p3985_p6, %p3979_p9 }
  0x94   : > { %3989 = shalt.err (!%p3986_p13)
}
  0x95   : > { %3728 = dma.hbm_to_vmem [thread:$0]  (!%p4363_p10), %s4359_s8, 128, %s4367_s9, %s344_s27  }
  0x96   : > { %p4839_p12 = scmp.ne.s32.totalorder %s4828_s17, 0 }
  0x97   : > { %s4397_s1 = sand.u32 (!%p4839_p12), 1, %s4064_s10  }
  0x98   : > { %363 = sbr.rel (%p4839_p12) target bundleno = 1565 (0x61d), region = 56  ;;  %s3418_s15 = sshll.u32 (!%p4839_p12), %s4397_s1, 3 }
  0x99   : > { %s366_s24 = scalar_lea.sflag (!%p4839_p12), [#allocation5], %s4397_s1  ;;  %s369_s22 = scalar_lea.vmem (!%p4839_p12), [#allocation4], %s3418_s15 }
  0x9f   : > { %4043 = dma.done.wait (%p4338_p2), %s366_s24, 128  }
  0xa0   : > { %4045 = vsyncadd (%p4338_p2), %s366_s24, 4294967168  ;;  %p4840_p4 = scmp.ne.s32.totalorder %s4827_s16, 0 }
  0xa2   : > { %4047 = dma.done.wait (%p4840_p4), [#allocation8], 1024  }
  0xa3   : > { %4049 = vsyncadd (%p4840_p4), [#allocation8], 4294966272 }
  0xa4   : > { %4051 = dma.done.wait (%p4840_p4), [#allocation11], 1024  }
  0xa5   : > { %4053 = vsyncadd (%p4840_p4), [#allocation11], 4294966272  ;;  %v4089_v0 = vmov 0.0|0.0   ;;  %vm4090_vm0 = vmmov 0   ;;  %v4091_v1 = vmov 0.0   ;;  %v425_v2 = vld [vmem:[#allocation9] sm:$0xff]  ;;  %v618_v35 = vlaneseq }
  0xa6   : > { %3668 = vmatprep.subr.bf16.mxu0 %v4089_v0  ;;  %3552 = vmatprep.mubr.msk.f32.mxu0 %vm4090_vm0, %v4091_v1  ;;  %v426_v3 = vld [vmem:[#allocation9 + $0x8] sm:$0xff]  ;;  %v427_v4 = vld [vmem:[#allocation9 + $0x10] sm:$0xff]  ;;  %v428_v6 = vld [vmem:[#allocation9 + $0x18] sm:$0xff]  ;;  %vm436_vm1 = vcmask 261120   ;;  %s4092_s12 = smov 124   ;;  %s4093_s8 = smov 116  }
  0xa7   : > { %3674 = vmatprep.subr.bf16.mxu1 %v4089_v0  ;;  %3563 = vmatprep.mubr.msk.f32.mxu1 %vm4090_vm0, %v4091_v1  ;;  %v3669_v5 = vpack.c.bf16 %v426_v3, %v425_v2  ;;  %v3672_v7 = vpack.c.bf16 %v428_v6, %v427_v4  ;;  %v510_v8 = vld [vmem:[#allocation10] sm:$0xff]  ;;  %v511_v9 = vld [vmem:[#allocation10 + $0x8] sm:$0xff]  ;;  %v424_v13 = vld [vmem:[%s369_s22] sm:$0xff]  ;;  %s4094_s27 = smov 120   ;;  %s4095_s23 = smov 112   ;;  %v619_v39 = vshrl.u32 %v618_v35, 7 }
  0xa8   : > { %v1199_v10 = vld [vmem:[#allocation7] sm:$0xff]  ;;  %v1200_v11 = vld [vmem:[#allocation7 + $0x8] sm:$0xff]  ;;  %v3675_v12 = vpack.c.bf16 %v511_v9, %v510_v8  ;;  %v1201_v15 = vld [vmem:[#allocation7 + $0x10] sm:$0xff]  ;;  %s4096_s20 = smov 104   ;;  %s4097_s25 = smov 108   ;;  %vm885_vm2 = vcmask 31744  }
  0xa9   : > { %3670 = vmatpush3.bf16.msra.mxu0 %v3669_v5  ;;  %v3681_v14 = vpack.c.bf16 %v1200_v11, %v1199_v10  ;;  %v1202_v16 = vld [vmem:[#allocation7 + $0x18] sm:$0xff]  ;;  %v512_v18 = vld [vmem:[#allocation10 + $0x10] sm:$0xff]  ;;  %s4098_s19 = smov 100   ;;  %v4099_v33 = vmov 1983009808   ;;  %vm2203_vm3 = vcmask 64512  }
  0xaa   : > { %3671 = vmatprep.subr.bf16.mxu0 %v4089_v0  ;;  %3676 = vmatpush3.bf16.msra.mxu1 %v3675_v12  ;;  %v3684_v17 = vpack.c.bf16 %v1202_v16, %v1201_v15  ;;  %v513_v19 = vld [vmem:[#allocation10 + $0x18] sm:$0xff]  ;;  %v3424_v21 = vld [vmem:[%s4811_s4] ss:$0 sm:$0xff]  ;;  %v616_v34 = vunpack.c.l.s4 %v4099_v33  ;;  %v4100_v36 = vmov 1934713408   ;;  %s4101_s16 = smov 8  }
  0xab   : > { %3677 = vmatprep.subr.bf16.mxu1 %v4089_v0  ;;  %v3678_v20 = vpack.c.bf16 %v513_v19, %v512_v18  ;;  %v3444_v25 = vld [vmem:[%s4809_s2] ss:$0 sm:$0xff]  ;;  %v680_v37 = vunpack.c.l.s4 %v4100_v36  ;;  %s4102_s17 = smov 4   ;;  %s4105_s9 = smov 16   ;;  %vm3178_vm4 = vcmask 97280   ;;  %vm3180_vm5 = vcmask 130048  }
  0xac   : > { %v3426_v29 = vld [vmem:[%s4813_s6] ss:$0 sm:$0xff]  ;;  %v617_v38 = vunpack.c.0.s8 %v616_v34  ;;  %s4106_s26 = smov 28   ;;  %vm3182_vm6 = vcmask 162816   ;;  %vm3184_vm7 = vcmask 195584   ;;  %vm3186_vm8 = vcmask 228352  }
  0xad   : > { %3673 = vmatpush3.bf16.msra.mxu0 %v3672_v7  ;;  %v681_v42 = vunpack.c.0.s8 %v680_v37  ;;  %s419_s22 = scalar_lea.vmem [#allocation13], %s3418_s15  ;;  %p4844_p9 = scmp.ne.s32.totalorder %s4836_s28, 0 }
  0xae   : > { %3680 = vmatprep.subr.bf16.mxu0 %v4089_v0  ;;  %3679 = vmatpush3.bf16.msra.mxu1 %v3678_v20  ;;  %v4464_v43 = vsub.s32 %v617_v38, %v619_v39  ;;  %s4108_s15 = smov [#allocation13]  }
  0xaf   : > { %3577 = vmatprep.subr.mxu1 %v4091_v1  ;;  %v4466_v49 = vsub.s32 %v681_v42, %v619_v39 }
  0xb0   : > { %3553 = vmatmul.mubr.msk.f32.vlgmr.msra.gmra.mrb[0].mxu0 %vm436_vm1, %v424_v13 }
  0xb1   : > { %3682 = vmatpush3.bf16.msra.mxu0 %v3681_v14  ;;  %3574 = vmatprep.mubr.msk.f32.mxu0 %vm4090_vm0, %v4091_v1 }
  0xb2   : > { %3683 = vmatprep.subr.bf16.mxu0 %v4089_v0  ;;  %3564 = vmatmul.mubr.msk.f32.vlgmr.msra.gmra.mrb[0].mxu1 %vm436_vm1, %v424_v13 }
  0xb3   : > { %3579 = vmatprep.mubr.msk.f32.mxu1 %vm4090_vm0, %v4091_v1 }
  0xb5   : > { %3685 = vmatpush3.bf16.msra.mxu0 %v3684_v17 }
  0xb6   : > { %3597 = vmatprep.subr.mxu0 %v4091_v1 }
  0xb8   : > { %3575 = vmatmul.mubr.msk.f32.vlgmr.msra.gmra.mrb[2].mxu0 %vm436_vm1, %v424_v13 }
  0xb9   : > { %3599 = vmatprep.mubr.msk.f32.mxu0 %vm4090_vm0, %v4091_v1 }
 0x183   : > { %v506_v22 = vpop.f32.mrb[0].mxu0 }
 0x184   : > { %v507_v23 = vadd.f32 %v3424_v21, %v506_v22  ;;  %v3554_v24 = vpop.f32.mrb[1].mxu0 }
 0x185   : > { %v587_v30 = vpop.f32.mrb[0].mxu1 }
 0x186   : > { %592 = vrot.lane.b32.xlu0 %v507_v23, %s4092_s12  ;;  %598 = vrot.lane.b32.xlu1 %v507_v23, %s4093_s8  ;;  %v4456_v31 = vadd.f32 %v3426_v29, %v587_v30  ;;  %v3565_v32 = vpop.f32.mrb[1].mxu1 }
 0x18a   : > { %595 = vrot.lane.b32.xlu0 %v507_v23, %s4094_s27 }
 0x18b   : > { %v1280_v26 = vpop.f32.mrb[2].mxu0 }
 0x18c   : > { %v4442_v27 = vadd.f32 %v3444_v25, %v1280_v26  ;;  %v3576_v28 = vpop.f32.mrb[3].mxu0 }
 0x18e   : > { %1288 = vrot.lane.b32.xlu0 %v4442_v27, %s4094_s27  ;;  %1285 = vrot.lane.b32.xlu1 %v4442_v27, %s4092_s12 }
 0x192   : > { %601 = vrot.lane.b32.xlu0 %v507_v23, %s4095_s23  ;;  %1291 = vrot.lane.b32.xlu1 %v4442_v27, %s4093_s8 }
 0x196   : > { %607 = vrot.lane.b32.xlu0 %v507_v23, %s4096_s20  ;;  %604 = vrot.lane.b32.xlu1 %v507_v23, %s4097_s25 }
 0x19a   : > { %1294 = vrot.lane.b32.xlu0 %v4442_v27, %s4095_s23  ;;  %610 = vrot.lane.b32.xlu1 %v507_v23, %s4098_s19 }
 0x19e   : > { %1300 = vrot.lane.b32.xlu0 %v4442_v27, %s4096_s20  ;;  %1297 = vrot.lane.b32.xlu1 %v4442_v27, %s4097_s25 }
 0x1a2   : > { %1303 = vrot.lane.b32.xlu1 %v4442_v27, %s4098_s19  ;;  %895 = vrot.lane.b32.xlu0 %v4456_v31, %s4092_s12  ;;  %s4103_s12 = smov 12  }
 0x1a6   : > { %898 = vrot.lane.b32.xlu1 %v4456_v31, %s4094_s27  ;;  %901 = vrot.lane.b32.xlu0 %v4456_v31, %s4093_s8  ;;  %s4104_s8 = smov 20   ;;  %s4107_s27 = smov 24  }
 0x1aa   : > { %907 = vrot.lane.b32.xlu1 %v4456_v31, %s4097_s25  ;;  %904 = vrot.lane.b32.xlu0 %v4456_v31, %s4095_s23  ;;  %s4841_s23 = sld [smem:[#allocation18_spill]] }
 0x1ae   : > { %910 = vrot.lane.b32.xlu1 %v4456_v31, %s4096_s20 }
 0x1b0   : > { %s3489_s24 = sshll.u32 %s4841_s23, 7  ;;  %s3994_s23 = sshll.u32 %s4108_s15, 4  ;;  %s3995_s23 = int_to_ptr.vmem [resolvable:$false] %s3994_s23 }
 0x1b1   : > { %s3996_s20 = scalar_lea.vmem %s3995_s23, 256 }
 0x1f8   : > { %v593_v40 = vpop.permute.xlu0 %592  ;;  %v599_v41 = vpop.permute.xlu1 %598 }
 0x1f9   : > { %v629_v44 = vcombine.low %v593_v40, %v599_v41  ;;  %v630_v45 = vcombine.high %v593_v40, %v599_v41 }
 0x1fb   : > { %v637_v50 = vrot.slane %v629_v44, %v4464_v43  ;;  %v644_v51 = vrot.slane %v630_v45, %v4464_v43 }
 0x1fc   : > { %v596_v46 = vpop.permute.xlu0 %595 }
 0x1fd   : > { %v613_v47 = vcombine.low %v507_v23, %v596_v46  ;;  %v614_v48 = vcombine.high %v507_v23, %v596_v46 }
 0x1ff   : > { %v621_v52 = vrot.slane %v613_v47, %v4464_v43  ;;  %v628_v53 = vrot.slane %v614_v48, %v4464_v43 }
 0x200   : > { %v1289_v54 = vpop.permute.xlu0 %1288  ;;  %v1286_v55 = vpop.permute.xlu1 %1285 }
 0x201   : > { %v677_v56 = vcombine.low %v621_v52, %v637_v50  ;;  %v678_v57 = vcombine.high %v621_v52, %v637_v50  ;;  %v693_v58 = vcombine.low %v628_v53, %v644_v51  ;;  %v694_v59 = vcombine.high %v628_v53, %v644_v51 }
 0x202   : > { %v1306_v2 = vcombine.low %v4442_v27, %v1289_v54  ;;  %v1307_v3 = vcombine.high %v4442_v27, %v1289_v54 }
 0x203   : > { %v685_v60 = vrot.slane %v677_v56, %v4466_v49  ;;  %v692_v61 = vrot.slane %v678_v57, %v4466_v49  ;;  %v701_v62 = vrot.slane %v693_v58, %v4466_v49  ;;  %v708_v63 = vrot.slane %v694_v59, %v4466_v49 }
 0x204   : > { %v602_v4 = vpop.permute.xlu0 %601  ;;  %v1292_v5 = vpop.permute.xlu1 %1291  ;;  %v1314_v16 = vrot.slane %v1306_v2, %v4464_v43  ;;  %v1321_v17 = vrot.slane %v1307_v3, %v4464_v43 }
 0x205   : > { %v3428_v6 = vcombine.low %v685_v60, %v692_v61  ;;  %v3430_v7 = vcombine.high %v685_v60, %v692_v61  ;;  %v3432_v8 = vcombine.low %v701_v62, %v708_v63  ;;  %v3434_v9 = vcombine.high %v701_v62, %v708_v63 }
 0x206   : > { %v1322_v10 = vcombine.low %v1286_v55, %v1292_v5  ;;  %v1323_v11 = vcombine.high %v1286_v55, %v1292_v5 }
 0x207   : > { %v757_v12 = vrot.slane %v3428_v6, %v4464_v43  ;;  %v773_v13 = vrot.slane %v3430_v7, %v4464_v43  ;;  %v789_v14 = vrot.slane %v3432_v8, %v4464_v43  ;;  %v805_v15 = vrot.slane %v3434_v9, %v4464_v43 }
 0x208   : > { %v1330_v18 = vrot.slane %v1322_v10, %v4464_v43  ;;  %v1337_v19 = vrot.slane %v1323_v11, %v4464_v43  ;;  %v608_v20 = vpop.permute.xlu0 %607  ;;  %v605_v21 = vpop.permute.xlu1 %604 }
 0x209   : > { %v813_v22 = vcombine.low %v757_v12, %v773_v13  ;;  %v814_v23 = vcombine.high %v757_v12, %v773_v13  ;;  %v845_v24 = vcombine.low %v789_v14, %v805_v15  ;;  %v846_v25 = vcombine.high %v789_v14, %v805_v15 }
 0x20a   : > { %v1370_v26 = vcombine.low %v1314_v16, %v1330_v18  ;;  %v1371_v27 = vcombine.high %v1314_v16, %v1330_v18  ;;  %v1386_v28 = vcombine.low %v1321_v17, %v1337_v19  ;;  %v1387_v29 = vcombine.high %v1321_v17, %v1337_v19 }
 0x20b   : > { %v821_v30 = vrot.slane %v813_v22, %v4466_v49  ;;  %v828_v32 = vrot.slane %v814_v23, %v4466_v49  ;;  %v853_v33 = vrot.slane %v845_v24, %v4466_v49  ;;  %v860_v34 = vrot.slane %v846_v25, %v4466_v49 }
 0x20c   : > { %v1378_v35 = vrot.slane %v1370_v26, %v4466_v49  ;;  %v1385_v36 = vrot.slane %v1371_v27, %v4466_v49  ;;  %v1394_v37 = vrot.slane %v1386_v28, %v4466_v49  ;;  %v1401_v38 = vrot.slane %v1387_v29, %v4466_v49  ;;  %v1295_v39 = vpop.permute.xlu0 %1294  ;;  %v611_v40 = vpop.permute.xlu1 %610 }
 0x20d   : > { %v877_v41 = vcombine.low %v821_v30, %v853_v33  ;;  %v878_v42 = vcombine.high %v821_v30, %v853_v33  ;;  %v879_v44 = vcombine.low %v828_v32, %v860_v34  ;;  %v880_v45 = vcombine.high %v828_v32, %v860_v34 }
 0x20e   : > { %v3446_v46 = vcombine.low %v1378_v35, %v1385_v36  ;;  %v3448_v47 = vcombine.high %v1378_v35, %v1385_v36  ;;  %v3450_v48 = vcombine.low %v1394_v37, %v1401_v38  ;;  %v3452_v50 = vcombine.high %v1394_v37, %v1401_v38 }
 0x20f   : > { %886 = vst.msk [vmem:[#allocation2] sm:$0xff] %vm885_vm2, %v877_v41  ;;  %887 = vst.msk [vmem:[#allocation2 + $0x8] sm:$0xff] %vm885_vm2, %v878_v42  ;;  %v645_v51 = vcombine.low %v602_v4, %v608_v20  ;;  %v646_v52 = vcombine.high %v602_v4, %v608_v20  ;;  %v661_v53 = vcombine.low %v605_v21, %v611_v40 }
 0x210   : > { %888 = vst.msk [vmem:[#allocation2 + $0x10] sm:$0xff] %vm885_vm2, %v879_v44  ;;  %889 = vst.msk [vmem:[#allocation2 + $0x18] sm:$0xff] %vm885_vm2, %v880_v45  ;;  %v662_v54 = vcombine.high %v605_v21, %v611_v40  ;;  %v4499_v55 = vrot.slane %v3446_v46, %v4464_v43  ;;  %v4502_v56 = vrot.slane %v3448_v47, %v4464_v43  ;;  %v1298_v59 = vpop.permute.xlu1 %1297  ;;  %v1301_v2 = vpop.permute.xlu0 %1300 }
 0x211   : > { %v4505_v57 = vrot.slane %v3450_v48, %v4464_v43  ;;  %v4508_v58 = vrot.slane %v3452_v50, %v4464_v43  ;;  %v653_v60 = vrot.slane %v645_v51, %v4464_v43  ;;  %v660_v61 = vrot.slane %v646_v52, %v4464_v43 }
 0x212   : > { %v669_v62 = vrot.slane %v661_v53, %v4464_v43  ;;  %v676_v63 = vrot.slane %v662_v54, %v4464_v43  ;;  %v1506_v3 = vcombine.low %v4499_v55, %v4502_v56  ;;  %v1507_v4 = vcombine.high %v4499_v55, %v4502_v56 }
 0x213   : > { %v1538_v5 = vcombine.low %v4505_v57, %v4508_v58  ;;  %v1539_v6 = vcombine.high %v4505_v57, %v4508_v58  ;;  %v1338_v11 = vcombine.low %v1295_v39, %v1301_v2  ;;  %v1339_v12 = vcombine.high %v1295_v39, %v1301_v2 }
 0x214   : > { %v709_v7 = vcombine.low %v653_v60, %v669_v62  ;;  %v710_v8 = vcombine.high %v653_v60, %v669_v62  ;;  %v725_v9 = vcombine.low %v660_v61, %v676_v63  ;;  %v726_v10 = vcombine.high %v660_v61, %v676_v63  ;;  %v1304_v13 = vpop.permute.xlu1 %1303 }
 0x215   : > { %v1514_v14 = vrot.slane %v1506_v3, %v4466_v49  ;;  %v1546_v15 = vrot.slane %v1538_v5, %v4466_v49  ;;  %v1346_v20 = vrot.slane %v1338_v11, %v4464_v43  ;;  %v1353_v21 = vrot.slane %v1339_v12, %v4464_v43 }
 0x216   : > { %v717_v16 = vrot.slane %v709_v7, %v4466_v49  ;;  %v724_v17 = vrot.slane %v710_v8, %v4466_v49  ;;  %v733_v18 = vrot.slane %v725_v9, %v4466_v49  ;;  %v740_v19 = vrot.slane %v726_v10, %v4466_v49  ;;  %v1578_v24 = vld [vmem:[#allocation2] sm:$0xff]  ;;  %v1579_v42 = vld [vmem:[#allocation2 + $0x8] sm:$0xff] }
 0x217   : > { %v1354_v22 = vcombine.low %v1298_v59, %v1304_v13  ;;  %v1355_v23 = vcombine.high %v1298_v59, %v1304_v13  ;;  %3578 = vmatpush3.xpose.msk.msra.mxu1 %vm885_vm2, %v1578_v24  ;;  %v1570_v32 = vcombine.low %v1514_v14, %v1546_v15  ;;  %v1571_v33 = vcombine.high %v1514_v14, %v1546_v15  ;;  %v1580_v3 = vld [vmem:[#allocation2 + $0x10] sm:$0xff] }
 0x218   : > { %v3429_v25 = vcombine.low %v717_v16, %v724_v17  ;;  %v3431_v26 = vcombine.high %v717_v16, %v724_v17  ;;  %v3433_v27 = vcombine.low %v733_v18, %v740_v19  ;;  %v3435_v28 = vcombine.high %v733_v18, %v740_v19  ;;  %3582 = vmatprep.subr.mxu1 %v4091_v1 }
 0x219   : > { %v1362_v29 = vrot.slane %v1354_v22, %v4464_v43  ;;  %v1369_v30 = vrot.slane %v1355_v23, %v4464_v43  ;;  %v1521_v14 = vrot.slane %v1507_v4, %v4466_v49  ;;  %v1553_v15 = vrot.slane %v1539_v6, %v4466_v49 }
 0x21a   : > { %v764_v34 = vrot.slane %v3429_v25, %v4464_v43  ;;  %v780_v35 = vrot.slane %v3431_v26, %v4464_v43  ;;  %v796_v36 = vrot.slane %v3433_v27, %v4464_v43  ;;  %v812_v37 = vrot.slane %v3435_v28, %v4464_v43  ;;  %3580 = vmatmul.mubr.msk.f32.vlgmr.msra.gmra.mrb[2].mxu1 %vm885_vm2, %v1570_v32 }
 0x21b   : > { %v1402_v38 = vcombine.low %v1346_v20, %v1362_v29  ;;  %v1403_v39 = vcombine.high %v1346_v20, %v1362_v29  ;;  %v1418_v40 = vcombine.low %v1353_v21, %v1369_v30  ;;  %v1419_v41 = vcombine.high %v1353_v21, %v1369_v30  ;;  %3583 = vmatpush3.xpose.msk.msra.mxu1 %vm885_vm2, %v1579_v42  ;;  %v1581_v20 = vld [vmem:[#allocation2 + $0x18] sm:$0xff]  ;;  %v896_v29 = vpop.permute.xlu0 %895  ;;  %v899_v30 = vpop.permute.xlu1 %898 }
 0x21c   : > { %v829_v44 = vcombine.low %v764_v34, %v780_v35  ;;  %v830_v45 = vcombine.high %v764_v34, %v780_v35  ;;  %v861_v46 = vcombine.low %v796_v36, %v812_v37  ;;  %v862_v47 = vcombine.high %v796_v36, %v812_v37  ;;  %3584 = vmatprep.mubr.msk.f32.mxu1 %vm4090_vm0, %v4091_v1 }
 0x21d   : > { %v1410_v48 = vrot.slane %v1402_v38, %v4466_v49  ;;  %v1417_v50 = vrot.slane %v1403_v39, %v4466_v49  ;;  %v1426_v51 = vrot.slane %v1418_v40, %v4466_v49  ;;  %v1433_v52 = vrot.slane %v1419_v41, %v4466_v49  ;;  %3587 = vmatprep.subr.mxu1 %v4091_v1 }
 0x21e   : > { %v837_v53 = vrot.slane %v829_v44, %v4466_v49  ;;  %v844_v54 = vrot.slane %v830_v45, %v4466_v49  ;;  %v869_v59 = vrot.slane %v861_v46, %v4466_v49  ;;  %v876_v60 = vrot.slane %v862_v47, %v4466_v49  ;;  %3585 = vmatmul.mubr.msk.f32.vlgmr.msra.gmra.mrb[4].mxu1 %vm885_vm2, %v1571_v33 }
 0x21f   : > { %v3447_v61 = vcombine.low %v1410_v48, %v1417_v50  ;;  %v3449_v62 = vcombine.high %v1410_v48, %v1417_v50  ;;  %v3451_v63 = vcombine.low %v1426_v51, %v1433_v52  ;;  %v3453_v2 = vcombine.high %v1426_v51, %v1433_v52  ;;  %3588 = vmatpush3.xpose.msk.msra.mxu1 %vm885_vm2, %v1580_v3  ;;  %v902_v34 = vpop.permute.xlu0 %901 }
 0x220   : > { %v881_v5 = vcombine.low %v837_v53, %v869_v59  ;;  %v882_v7 = vcombine.high %v837_v53, %v869_v59  ;;  %v883_v8 = vcombine.low %v844_v54, %v876_v60  ;;  %v884_v9 = vcombine.high %v844_v54, %v876_v60  ;;  %3589 = vmatprep.mubr.msk.f32.mxu1 %vm4090_vm0, %v4091_v1 }
 0x221   : > { %v1457_v10 = vrot.slane %v3447_v61, %v4464_v43  ;;  %v1473_v11 = vrot.slane %v3449_v62, %v4464_v43  ;;  %v1489_v12 = vrot.slane %v3451_v63, %v4464_v43  ;;  %v1505_v13 = vrot.slane %v3453_v2, %v4464_v43  ;;  %3592 = vmatprep.subr.mxu1 %v4091_v1 }
 0x222   : > { %890 = vst.msk [vmem:[#allocation2 + $0x20] sm:$0xff] %vm885_vm2, %v881_v5  ;;  %891 = vst.msk [vmem:[#allocation2 + $0x28] sm:$0xff] %vm885_vm2, %v882_v7  ;;  %v1572_v18 = vcombine.low %v1521_v14, %v1553_v15  ;;  %v1573_v57 = vcombine.high %v1521_v14, %v1553_v15  ;;  %v916_v32 = vcombine.low %v4456_v31, %v899_v30 }
 0x223   : > { %892 = vst.msk [vmem:[#allocation2 + $0x30] sm:$0xff] %vm885_vm2, %v883_v8  ;;  %893 = vst.msk [vmem:[#allocation2 + $0x38] sm:$0xff] %vm885_vm2, %v884_v9  ;;  %v1522_v16 = vcombine.low %v1457_v10, %v1473_v11  ;;  %v1554_v17 = vcombine.low %v1489_v12, %v1505_v13  ;;  %v1523_v19 = vcombine.high %v1457_v10, %v1473_v11 }
 0x224   : > { %3590 = vmatmul.mubr.msk.f32.vlgmr.msra.gmra.mrb[6].mxu1 %vm885_vm2, %v1572_v18  ;;  %v1555_v21 = vcombine.high %v1489_v12, %v1505_v13  ;;  %v917_v33 = vcombine.high %v4456_v31, %v899_v30  ;;  %v932_v35 = vcombine.low %v896_v29, %v902_v34  ;;  %v933_v36 = vcombine.high %v896_v29, %v902_v34 }
 0x225   : > { %3593 = vmatpush3.xpose.msk.msra.mxu1 %vm885_vm2, %v1581_v20  ;;  %3594 = vmatprep.mubr.msk.f32.mxu1 %vm4090_vm0, %v4091_v1  ;;  %v1530_v55 = vrot.slane %v1522_v16, %v4466_v49  ;;  %v1562_v56 = vrot.slane %v1554_v17, %v4466_v49  ;;  %v1537_v22 = vrot.slane %v1523_v19, %v4466_v49 }
 0x226   : > { %3602 = vmatprep.subr.mxu1 %v4091_v1  ;;  %v1569_v23 = vrot.slane %v1555_v21, %v4466_v49  ;;  %v924_v37 = vrot.slane %v916_v32, %v4464_v43  ;;  %v931_v38 = vrot.slane %v917_v33, %v4464_v43  ;;  %v940_v39 = vrot.slane %v932_v35, %v4464_v43 }
 0x227   : > { %v1574_v6 = vcombine.low %v1530_v55, %v1562_v56  ;;  %v1575_v24 = vcombine.high %v1530_v55, %v1562_v56  ;;  %v947_v40 = vrot.slane %v933_v36, %v4464_v43  ;;  %v908_v36 = vpop.permute.xlu1 %907 }
 0x228   : > { %3595 = vmatmul.mubr.msk.f32.vlgmr.msra.gmra.mrb[8].mxu1 %vm885_vm2, %v1573_v57  ;;  %v1576_v27 = vcombine.low %v1537_v22, %v1569_v23  ;;  %v1577_v28 = vcombine.high %v1537_v22, %v1569_v23  ;;  %v980_v41 = vcombine.low %v924_v37, %v940_v39  ;;  %v981_v42 = vcombine.high %v924_v37, %v940_v39  ;;  %v905_v37 = vpop.permute.xlu0 %904 }
 0x229   : > { %v1582_v58 = vld [vmem:[#allocation2 + $0x20] sm:$0xff]  ;;  %v1583_v4 = vld [vmem:[#allocation2 + $0x28] sm:$0xff]  ;;  %3604 = vmatprep.mubr.msk.f32.mxu1 %vm4090_vm0, %v4091_v1  ;;  %v996_v44 = vcombine.low %v931_v38, %v947_v40  ;;  %v997_v45 = vcombine.high %v931_v38, %v947_v40 }
 0x22a   : > { %3598 = vmatpush3.xpose.msk.msra.mxu0 %vm885_vm2, %v1582_v58  ;;  %3603 = vmatpush3.xpose.msk.msra.mxu1 %vm885_vm2, %v1583_v4  ;;  %v1584_v25 = vld [vmem:[#allocation2 + $0x30] sm:$0xff]  ;;  %v1585_v26 = vld [vmem:[#allocation2 + $0x38] sm:$0xff]  ;;  %v988_v46 = vrot.slane %v980_v41, %v4466_v49  ;;  %v995_v47 = vrot.slane %v981_v42, %v4466_v49 }
 0x22b   : > { %3607 = vmatprep.subr.mxu0 %v4091_v1  ;;  %3612 = vmatprep.subr.mxu1 %v4091_v1  ;;  %v1004_v48 = vrot.slane %v996_v44, %v4466_v49  ;;  %v1011_v50 = vrot.slane %v997_v45, %v4466_v49  ;;  %v911_v38 = vpop.permute.xlu1 %910 }
 0x22c   : > { %v3436_v51 = vcombine.low %v988_v46, %v995_v47  ;;  %v3438_v52 = vcombine.high %v988_v46, %v995_v47 }
 0x22d   : > { %3600 = vmatmul.mubr.msk.f32.vlgmr.msra.gmra.mrb[4].mxu0 %vm885_vm2, %v1574_v6  ;;  %3605 = vmatmul.mubr.msk.f32.vlgmr.msra.gmra.mrb[10].mxu1 %vm885_vm2, %v1575_v24  ;;  %v3440_v53 = vcombine.low %v1004_v48, %v1011_v50  ;;  %v3442_v54 = vcombine.high %v1004_v48, %v1011_v50 }
 0x22e   : > { %3608 = vmatpush3.xpose.msk.msra.mxu0 %vm885_vm2, %v1584_v25  ;;  %3613 = vmatpush3.xpose.msk.msra.mxu1 %vm885_vm2, %v1585_v26  ;;  %v1060_v59 = vrot.slane %v3436_v51, %v4464_v43  ;;  %v1076_v60 = vrot.slane %v3438_v52, %v4464_v43 }
 0x22f   : > { %3609 = vmatprep.mubr.msk.f32.mxu0 %vm4090_vm0, %v4091_v1  ;;  %3614 = vmatprep.mubr.msk.f32.mxu1 %vm4090_vm0, %v4091_v1  ;;  %v1092_v61 = vrot.slane %v3440_v53, %v4464_v43  ;;  %v1108_v62 = vrot.slane %v3442_v54, %v4464_v43 }
 0x230   : > { %3617 = vmatprep.subr.mxu0 %v4091_v1  ;;  %3622 = vmatprep.subr.mxu1 %v4091_v1  ;;  %v1116_v63 = vcombine.low %v1060_v59, %v1076_v60  ;;  %v1117_v2 = vcombine.high %v1060_v59, %v1076_v60 }
 0x231   : > { %3610 = vmatmul.mubr.msk.f32.vlgmr.msra.gmra.mrb[6].mxu0 %vm885_vm2, %v1576_v27  ;;  %3615 = vmatmul.mubr.msk.f32.vlgmr.msra.gmra.mrb[12].mxu1 %vm885_vm2, %v1577_v28  ;;  %v1148_v3 = vcombine.low %v1092_v61, %v1108_v62  ;;  %v1149_v5 = vcombine.high %v1092_v61, %v1108_v62 }
 0x232   : > { %3619 = vmatprep.mubr.msk.f32.mxu0 %vm4090_vm0, %v4091_v1  ;;  %3624 = vmatprep.mubr.msk.f32.mxu1 %vm4090_vm0, %v4091_v1  ;;  %v1124_v7 = vrot.slane %v1116_v63, %v4466_v49  ;;  %v1131_v8 = vrot.slane %v1117_v2, %v4466_v49 }
 0x233   : > { %v1156_v9 = vrot.slane %v1148_v3, %v4466_v49  ;;  %v1163_v10 = vrot.slane %v1149_v5, %v4466_v49 }
 0x235   : > { %v1180_v11 = vcombine.low %v1124_v7, %v1156_v9  ;;  %v1181_v12 = vcombine.high %v1124_v7, %v1156_v9  ;;  %v1182_v13 = vcombine.low %v1131_v8, %v1163_v10  ;;  %v1183_v14 = vcombine.high %v1131_v8, %v1163_v10 }
 0x236   : > { %v948_v7 = vcombine.low %v905_v37, %v911_v38  ;;  %v949_v10 = vcombine.high %v905_v37, %v911_v38 }
 0x237   : > { %1188 = vst.msk [vmem:[#allocation3] sm:$0xff] %vm885_vm2, %v1180_v11  ;;  %1189 = vst.msk [vmem:[#allocation3 + $0x8] sm:$0xff] %vm885_vm2, %v1181_v12 }
 0x238   : > { %1190 = vst.msk [vmem:[#allocation3 + $0x10] sm:$0xff] %vm885_vm2, %v1182_v13  ;;  %1191 = vst.msk [vmem:[#allocation3 + $0x18] sm:$0xff] %vm885_vm2, %v1183_v14 }
 0x23e   : > { %v1586_v15 = vld [vmem:[#allocation3] sm:$0xff]  ;;  %v1587_v16 = vld [vmem:[#allocation3 + $0x8] sm:$0xff] }
 0x23f   : > { %3618 = vmatpush3.msra.mxu0 %v1586_v15  ;;  %3623 = vmatpush3.msra.mxu1 %v1587_v16  ;;  %v1589_v61 = vld [vmem:[#allocation3 + $0x18] sm:$0xff] }
 0x240   : > { %3627 = vmatprep.subr.mxu0 %v4091_v1  ;;  %3632 = vmatprep.subr.mxu1 %v4091_v1 }
 0x2ed   : > { %v1667_v17 = vpop.f32.mrb[2].mxu1 }
 0x2ee   : > { %v3581_v18 = vpop.f32.mrb[3].mxu1  ;;  %v2204_v19 = vsel %vm2203_vm3, %v1667_v17, -inf }
 0x2ef   : > { %2205 = vmax.xlane.f32.xlu0 %v2204_v19  ;;  %v963_v18 = vrot.slane %v949_v10, %v4464_v43 }
 0x2f1   : > { %v1743_v20 = vpop.f32.mrb[4].mxu1 }
 0x2f2   : > { %v3586_v21 = vpop.f32.mrb[5].mxu1  ;;  %v2207_v55 = vsel %vm2203_vm3, %v1743_v20, -inf }
 0x2f3   : > { %2208 = vmax.xlane.f32.xlu1 %v2207_v55 }
 0x2f7   : > { %v1819_v56 = vpop.f32.mrb[6].mxu1 }
 0x2f8   : > { %v3591_v57 = vpop.f32.mrb[7].mxu1  ;;  %v2210_v58 = vsel %vm2203_vm3, %v1819_v56, -inf }
 0x2f9   : > { %2211 = vmax.xlane.f32.xlu1 %v2210_v58 }
 0x2fb   : > { %v4631_v4 = vpop.f32.mrb[8].mxu1 }
 0x2fc   : > { %v3596_v6 = vpop.f32.mrb[9].mxu1  ;;  %v2213_v32 = vsel %vm2203_vm3, %v4631_v4, -inf }
 0x300   : > { %v1971_v22 = vpop.f32.mrb[4].mxu0  ;;  %v2047_v23 = vpop.f32.mrb[10].mxu1 }
 0x301   : > { %v3601_v24 = vpop.f32.mrb[5].mxu0  ;;  %v2216_v25 = vsel %vm2203_vm3, %v1971_v22, -inf  ;;  %v3606_v26 = vpop.f32.mrb[11].mxu1  ;;  %v2219_v27 = vsel %vm2203_vm3, %v2047_v23, -inf }
 0x302   : > { %2217 = vmax.xlane.f32.xlu0 %v2216_v25  ;;  %2220 = vmax.xlane.f32.xlu1 %v2219_v27 }
 0x304   : > { %v2123_v28 = vpop.f32.mrb[6].mxu0  ;;  %v4635_v29 = vpop.f32.mrb[12].mxu1 }
 0x305   : > { %v3611_v30 = vpop.f32.mrb[7].mxu0  ;;  %v2222_v33 = vsel %vm2203_vm3, %v2123_v28, -inf  ;;  %v3616_v34 = vpop.f32.mrb[13].mxu1  ;;  %v2225_v35 = vsel %vm2203_vm3, %v4635_v29, -inf }
 0x306   : > { %2214 = vmax.xlane.f32.xlu0 %v2213_v32  ;;  %2223 = vmax.xlane.f32.xlu1 %v2222_v33 }
 0x31c   : > { %913 = vrot.lane.b32.xlu0 %v4456_v31, %s4098_s19  ;;  %v1588_v31 = vld [vmem:[#allocation3 + $0x10] sm:$0xff]  ;;  %s4842_s19 = sld [smem:[#allocation20_spill]] }
 0x33b   : > { %2226 = vmax.xlane.f32.xlu0 %v2225_v35 }
 0x37c   : > { %v2206_v39 = vpop.xlane.xlu0 %2205 }
 0x37d   : > { %v2228_v40 = vsub.f32 %v1667_v17, %v2206_v39  ;;  %v956_v17 = vrot.slane %v948_v7, %v4464_v43 }
 0x37f   : > { %v2236_v41 = vmul.f32 1.442695, %v2228_v40 }
 0x380   : > { %v2209_v42 = vpop.xlane.xlu1 %2208 }
 0x381   : > { %3816 = vpow2.f32 %v2236_v41  ;;  %v2229_v44 = vsub.f32 %v1743_v20, %v2209_v42 }
 0x383   : > { %v2238_v45 = vmul.f32 1.442695, %v2229_v44 }
 0x385   : > { %3818 = vpow2.f32 %v2238_v45 }
 0x386   : > { %v2212_v46 = vpop.xlane.xlu1 %2211 }
 0x387   : > { %v2230_v47 = vsub.f32 %v1819_v56, %v2212_v46 }
 0x389   : > { %v2240_v48 = vmul.f32 1.442695, %v2230_v47 }
 0x38b   : > { %v3817_v50 = vpop.eup %3816  ;;  %3820 = vpow2.f32 %v2240_v48 }
 0x38c   : > { %3620 = vmatmul.mubr.msk.f32.vlgmr.msra.gmra.mrb[8].mxu0 %vm2203_vm3, %v3817_v50  ;;  %v2252_v51 = vsel %vm2203_vm3, %v3817_v50, 0.0 }
 0x38d   : > { %3628 = vmatpush3.msra.mxu0 %v1588_v31  ;;  %2253 = vadd.xlane.f32.xlu0 %v2252_v51 }
 0x38e   : > { %3629 = vmatprep.mubr.msk.f32.mxu0 %vm4090_vm0, %v4091_v1  ;;  %3637 = vmatprep.subr.mxu0 %v4091_v1 }
 0x38f   : > { %v2218_v52 = vpop.xlane.xlu0 %2217  ;;  %v3819_v53 = vpop.eup %3818 }
 0x390   : > { %v2221_v54 = vpop.xlane.xlu1 %2220  ;;  %v2232_v59 = vsub.f32 %v1971_v22, %v2218_v52  ;;  %3625 = vmatmul.mubr.msk.f32.vlgmr.msra.gmra.mrb[14].mxu1 %vm2203_vm3, %v3819_v53  ;;  %v2255_v62 = vsel %vm2203_vm3, %v3819_v53, 0.0 }
 0x391   : > { %v2233_v60 = vsub.f32 %v2047_v23, %v2221_v54  ;;  %3633 = vmatpush3.msra.mxu1 %v1589_v61  ;;  %2256 = vadd.xlane.f32.xlu1 %v2255_v62 }
 0x392   : > { %v2244_v63 = vmul.f32 1.442695, %v2232_v59  ;;  %3634 = vmatprep.mubr.msk.f32.mxu1 %vm4090_vm0, %v4091_v1  ;;  %3642 = vmatprep.subr.mxu1 %v4091_v1 }
 0x393   : > { %v2215_v2 = vpop.xlane.xlu0 %2214  ;;  %v2246_v8 = vmul.f32 1.442695, %v2233_v60 }
 0x394   : > { %3822 = vpow2.f32 %v2244_v63  ;;  %v2231_v3 = vsub.f32 %v4631_v4, %v2215_v2  ;;  %v2224_v5 = vpop.xlane.xlu1 %2223 }
 0x395   : > { %v2234_v9 = vsub.f32 %v2123_v28, %v2224_v5  ;;  %v3821_v12 = vpop.eup %3820 }
 0x396   : > { %v2242_v11 = vmul.f32 1.442695, %v2231_v3  ;;  %3630 = vmatmul.mubr.msk.f32.vlgmr.msra.gmra.mrb[10].mxu0 %vm2203_vm3, %v3821_v12  ;;  %v2258_v37 = vsel %vm2203_vm3, %v3821_v12, 0.0 }
 0x397   : > { %v2248_v13 = vmul.f32 1.442695, %v2234_v9  ;;  %v914_v14 = vpop.permute.xlu0 %913  ;;  %3639 = vmatprep.mubr.msk.f32.mxu0 %vm4090_vm0, %v4091_v1 }
 0x398   : > { %3824 = vpow2.f32 %v2242_v11  ;;  %v964_v15 = vcombine.low %v908_v36, %v914_v14  ;;  %v965_v16 = vcombine.high %v908_v36, %v914_v14 }
 0x399   : > { %3826 = vpow2.f32 %v2246_v8 }
 0x39a   : > { %3828 = vpow2.f32 %v2248_v13  ;;  %v972_v19 = vrot.slane %v964_v15, %v4464_v43  ;;  %v979_v20 = vrot.slane %v965_v16, %v4464_v43 }
 0x39c   : > { %v1012_v21 = vcombine.low %v956_v17, %v972_v19  ;;  %v1013_v55 = vcombine.high %v956_v17, %v972_v19  ;;  %v1028_v56 = vcombine.low %v963_v18, %v979_v20  ;;  %v1029_v57 = vcombine.high %v963_v18, %v979_v20 }
 0x39e   : > { %v3823_v58 = vpop.eup %3822  ;;  %v1020_v4 = vrot.slane %v1012_v21, %v4466_v49  ;;  %v1027_v6 = vrot.slane %v1013_v55, %v4466_v49  ;;  %v1036_v22 = vrot.slane %v1028_v56, %v4466_v49  ;;  %v1043_v23 = vrot.slane %v1029_v57, %v4466_v49 }
 0x39f   : > { %v2264_v24 = vsel %vm2203_vm3, %v3823_v58, 0.0 }
 0x3a0   : > { %v3437_v25 = vcombine.low %v1020_v4, %v1027_v6  ;;  %v3439_v26 = vcombine.high %v1020_v4, %v1027_v6  ;;  %v3441_v27 = vcombine.low %v1036_v22, %v1043_v23  ;;  %v3443_v28 = vcombine.high %v1036_v22, %v1043_v23  ;;  %2265 = vadd.xlane.f32.xlu0 %v2264_v24 }
 0x3a2   : > { %v3825_v30 = vpop.eup %3824  ;;  %v1067_v32 = vrot.slane %v3437_v25, %v4464_v43  ;;  %v1083_v33 = vrot.slane %v3439_v26, %v4464_v43  ;;  %v1099_v34 = vrot.slane %v3441_v27, %v4464_v43  ;;  %v1115_v35 = vrot.slane %v3443_v28, %v4464_v43 }
 0x3a3   : > { %v3827_v36 = vpop.eup %3826  ;;  %3635 = vmatmul.mubr.msk.f32.vlgmr.msra.gmra.mrb[16].mxu1 %vm2203_vm3, %v3825_v30  ;;  %v2261_v38 = vsel %vm2203_vm3, %v3825_v30, 0.0 }
 0x3a4   : > { %v3829_v39 = vpop.eup %3828  ;;  %v1132_v40 = vcombine.low %v1067_v32, %v1083_v33  ;;  %v1133_v41 = vcombine.high %v1067_v32, %v1083_v33  ;;  %v1164_v42 = vcombine.low %v1099_v34, %v1115_v35  ;;  %v1165_v44 = vcombine.high %v1099_v34, %v1115_v35  ;;  %2259 = vadd.xlane.f32.xlu0 %v2258_v37 }
 0x3a5   : > { %2262 = vadd.xlane.f32.xlu1 %v2261_v38  ;;  %3644 = vmatprep.mubr.msk.f32.mxu1 %vm4090_vm0, %v4091_v1  ;;  %v2267_v50 = vsel %vm2203_vm3, %v3827_v36, 0.0  ;;  %v2270_v31 = vsel %vm2203_vm3, %v3829_v39, 0.0 }
 0x3a6   : > { %v1140_v45 = vrot.slane %v1132_v40, %v4466_v49  ;;  %v1147_v46 = vrot.slane %v1133_v41, %v4466_v49  ;;  %v1172_v47 = vrot.slane %v1164_v42, %v4466_v49  ;;  %v1179_v48 = vrot.slane %v1165_v44, %v4466_v49 }
 0x3a8   : > { %v1184_v51 = vcombine.low %v1140_v45, %v1172_v47  ;;  %v1185_v52 = vcombine.high %v1140_v45, %v1172_v47  ;;  %v1186_v53 = vcombine.low %v1147_v46, %v1179_v48  ;;  %v1187_v54 = vcombine.high %v1147_v46, %v1179_v48  ;;  %2271 = vadd.xlane.f32.xlu0 %v2270_v31  ;;  %v3188_v45 = vld [vmem:[#allocation12] sm:$0xff]  ;;  %v3189_v46 = vld [vmem:[#allocation12 + $0x8] sm:$0xff] }
 0x3a9   : > { %2268 = vadd.xlane.f32.xlu1 %v2267_v50 }
 0x3aa   : > { %1192 = vst.msk [vmem:[#allocation3 + $0x20] sm:$0xff] %vm885_vm2, %v1184_v51  ;;  %1193 = vst.msk [vmem:[#allocation3 + $0x28] sm:$0xff] %vm885_vm2, %v1185_v52  ;;  %v3687_v51 = vpack.c.bf16 %v3189_v46, %v3188_v45 }
 0x3ab   : > { %1194 = vst.msk [vmem:[#allocation3 + $0x30] sm:$0xff] %vm885_vm2, %v1186_v53  ;;  %1195 = vst.msk [vmem:[#allocation3 + $0x38] sm:$0xff] %vm885_vm2, %v1187_v54 }
 0x3b1   : > { %v1590_v59 = vld [vmem:[#allocation3 + $0x20] sm:$0xff]  ;;  %v1591_v60 = vld [vmem:[#allocation3 + $0x28] sm:$0xff] }
 0x3b2   : > { %3638 = vmatpush3.msra.mxu0 %v1590_v59  ;;  %3643 = vmatpush3.msra.mxu1 %v1591_v60  ;;  %v1592_v61 = vld [vmem:[#allocation3 + $0x30] sm:$0xff]  ;;  %v1593_v62 = vld [vmem:[#allocation3 + $0x38] sm:$0xff] }
 0x3b3   : > { %3640 = vmatmul.mubr.msk.f32.vlgmr.msra.gmra.mrb[12].mxu0 %vm2203_vm3, %v3823_v58  ;;  %3645 = vmatmul.mubr.msk.f32.vlgmr.msra.gmra.mrb[18].mxu1 %vm2203_vm3, %v3827_v36 }
 0x3b4   : > { %3647 = vmatprep.subr.mxu0 %v4091_v1  ;;  %3652 = vmatprep.subr.mxu1 %v4091_v1 }
 0x3b5   : > { %3648 = vmatpush3.msra.mxu0 %v1592_v61  ;;  %3653 = vmatpush3.msra.mxu1 %v1593_v62 }
 0x3b6   : > { %3649 = vmatprep.mubr.msk.f32.mxu0 %vm4090_vm0, %v4091_v1  ;;  %3654 = vmatprep.mubr.msk.f32.mxu1 %vm4090_vm0, %v4091_v1 }
 0x3b7   : > { %3650 = vmatmul.mubr.msk.f32.vlgmr.msra.gmra.mrb[14].mxu0 %vm2203_vm3, %v3829_v39  ;;  %3686 = vmatprep.subr.bf16.mxu0 %v4089_v0 }
 0x3b8   : > { %3665 = vmatprep.mubr.msk.f32.mxu0 %vm4090_vm0, %v4091_v1  ;;  %3688 = vmatpush3.bf16.msra.mxu0 %v3687_v51 }
 0x3b9   : > { %3689 = vmatprep.subr.bf16.mxu0 %v4089_v0 }
 0x3c8   : > { %v2227_v63 = vpop.xlane.xlu0 %2226 }
 0x3c9   : > { %v2235_v2 = vsub.f32 %v4635_v29, %v2227_v63 }
 0x3cb   : > { %v2250_v3 = vmul.f32 1.442695, %v2235_v2 }
 0x3cd   : > { %3830 = vpow2.f32 %v2250_v3 }
 0x3d7   : > { %v3831_v5 = vpop.eup %3830 }
 0x3d8   : > { %3655 = vmatmul.mubr.msk.f32.vlgmr.msra.gmra.mrb[20].mxu1 %vm2203_vm3, %v3831_v5  ;;  %v2273_v7 = vsel %vm2203_vm3, %v3831_v5, 0.0 }
 0x3d9   : > { %2274 = vadd.xlane.f32.xlu1 %v2273_v7 }
 0x41a   : > { %v2254_v8 = vpop.xlane.xlu0 %2253 }
 0x41b   : > { %3832 = vrcp.f32 %v2254_v8 }
 0x41e   : > { %v2257_v1 = vpop.xlane.xlu1 %2256 }
 0x425   : > { %v3833_v29 = vpop.eup %3832 }
 0x42d   : > { %v2266_v9 = vpop.xlane.xlu0 %2265 }
 0x431   : > { %v2260_v10 = vpop.xlane.xlu0 %2259 }
 0x432   : > { %3834 = vrcp.f32 %v2260_v10  ;;  %v2263_v15 = vpop.xlane.xlu1 %2262 }
 0x433   : > { %3836 = vrcp.f32 %v2257_v1 }
 0x434   : > { %3838 = vrcp.f32 %v2263_v15 }
 0x435   : > { %v2272_v30 = vpop.xlane.xlu0 %2271  ;;  %3840 = vrcp.f32 %v2266_v9 }
 0x436   : > { %3842 = vrcp.f32 %v2272_v30  ;;  %v3190_v30 = vld [vmem:[#allocation12 + $0x10] sm:$0xff] }
 0x43c   : > { %v3835_v16 = vpop.eup %3834 }
 0x43d   : > { %v3837_v56 = vpop.eup %3836 }
 0x43e   : > { %v3839_v57 = vpop.eup %3838 }
 0x43f   : > { %v3841_v5 = vpop.eup %3840 }
 0x45f   : > { %v2345_v11 = vpop.f32.mrb[8].mxu0 }
 0x460   : > { %v3621_v12 = vpop.f32.mrb[9].mxu0  ;;  %v2868_v18 = vmul.f32 %v3833_v29, %v2345_v11  ;;  %v3843_v11 = vpop.eup %3842 }
 0x463   : > { %v2418_v13 = vpop.f32.mrb[14].mxu1 }
 0x464   : > { %v3626_v14 = vpop.f32.mrb[15].mxu1  ;;  %v2869_v4 = vmul.f32 %v3837_v56, %v2418_v13 }
 0x469   : > { %v2491_v17 = vpop.f32.mrb[10].mxu0 }
 0x46a   : > { %v2870_v19 = vmul.f32 %v3835_v16, %v2491_v17  ;;  %v3631_v20 = vpop.f32.mrb[11].mxu0  ;;  %v2269_v17 = vpop.xlane.xlu1 %2268 }
 0x46b   : > { %3844 = vrcp.f32 %v2269_v17 }
 0x46c   : > { %v2876_v21 = vcombine.low %v2868_v18, %v2870_v19  ;;  %v2877_v55 = vcombine.high %v2868_v18, %v2870_v19 }
 0x46e   : > { %v2884_v25 = vrot.slane %v2876_v21, %v4464_v43  ;;  %v2891_v26 = vrot.slane %v2877_v55, %v4464_v43  ;;  %v2275_v18 = vpop.xlane.xlu1 %2274 }
 0x46f   : > { %3846 = vrcp.f32 %v2275_v18 }
 0x475   : > { %v3845_v19 = vpop.eup %3844 }
 0x476   : > { %v2564_v58 = vpop.f32.mrb[16].mxu1 }
 0x477   : > { %v2871_v6 = vmul.f32 %v3839_v57, %v2564_v58  ;;  %v3636_v22 = vpop.f32.mrb[17].mxu1 }
 0x479   : > { %v2892_v23 = vcombine.low %v2869_v4, %v2871_v6  ;;  %v2893_v24 = vcombine.high %v2869_v4, %v2871_v6  ;;  %v3847_v20 = vpop.eup %3846 }
 0x47b   : > { %v2900_v27 = vrot.slane %v2892_v23, %v4464_v43  ;;  %v2907_v28 = vrot.slane %v2893_v24, %v4464_v43 }
 0x47d   : > { %v2940_v32 = vcombine.low %v2884_v25, %v2900_v27  ;;  %v2941_v33 = vcombine.high %v2884_v25, %v2900_v27  ;;  %v2956_v34 = vcombine.low %v2891_v26, %v2907_v28  ;;  %v2957_v35 = vcombine.high %v2891_v26, %v2907_v28 }
 0x47f   : > { %v2948_v36 = vrot.slane %v2940_v32, %v4466_v49  ;;  %v2955_v37 = vrot.slane %v2941_v33, %v4466_v49  ;;  %v2964_v38 = vrot.slane %v2956_v34, %v4466_v49  ;;  %v2971_v39 = vrot.slane %v2957_v35, %v4466_v49  ;;  %v3191_v32 = vld [vmem:[#allocation12 + $0x18] sm:$0xff] }
 0x481   : > { %v3478_v40 = vcombine.low %v2948_v36, %v2955_v37  ;;  %v3480_v41 = vcombine.high %v2948_v36, %v2955_v37  ;;  %v3482_v42 = vcombine.low %v2964_v38, %v2971_v39  ;;  %v3484_v44 = vcombine.high %v2964_v38, %v2971_v39 }
 0x482   : > { %v3690_v37 = vpack.c.bf16 %v3191_v32, %v3190_v30 }
 0x483   : > { %v3020_v47 = vrot.slane %v3478_v40, %v4464_v43  ;;  %v3036_v48 = vrot.slane %v3480_v41, %v4464_v43  ;;  %v3052_v50 = vrot.slane %v3482_v42, %v4464_v43  ;;  %v3068_v31 = vrot.slane %v3484_v44, %v4464_v43 }
 0x484   : > { %3691 = vmatpush3.bf16.msra.mxu0 %v3690_v37 }
 0x485   : > { %v3077_v52 = vcombine.high %v3020_v47, %v3036_v48  ;;  %v3109_v53 = vcombine.high %v3052_v50, %v3068_v31  ;;  %v3076_v54 = vcombine.low %v3020_v47, %v3036_v48  ;;  %v3108_v59 = vcombine.low %v3052_v50, %v3068_v31 }
 0x486   : > { %v2637_v60 = vpop.f32.mrb[12].mxu0  ;;  %v2710_v61 = vpop.f32.mrb[18].mxu1 }
 0x487   : > { %v3641_v62 = vpop.f32.mrb[13].mxu0  ;;  %v3646_v63 = vpop.f32.mrb[19].mxu1  ;;  %v3091_v2 = vrot.slane %v3077_v52, %v4466_v49  ;;  %v3123_v3 = vrot.slane %v3109_v53, %v4466_v49  ;;  %v4717_v7 = vrot.slane %v3076_v54, %v4466_v49  ;;  %v4720_v8 = vrot.slane %v3108_v59, %v4466_v49 }
 0x488   : > { %v2872_v14 = vmul.f32 %v3841_v5, %v2637_v60  ;;  %v2873_v55 = vmul.f32 %v3845_v19, %v2710_v61 }
 0x489   : > { %v3142_v9 = vcombine.low %v3091_v2, %v3123_v3  ;;  %v3143_v10 = vcombine.high %v3091_v2, %v3123_v3  ;;  %v3141_v13 = vcombine.high %v4717_v7, %v4720_v8  ;;  %v3140_v1 = vcombine.low %v4717_v7, %v4720_v8 }
 0x48a   : > { %v2783_v12 = vpop.f32.mrb[14].mxu0 }
 0x48b   : > { %v2874_v15 = vmul.f32 %v3843_v11, %v2783_v12  ;;  %3153 = vrot.lane.b32.xlu1 %v3142_v9, %s4101_s16  ;;  %v3651_v0 = vpop.f32.mrb[15].mxu0  ;;  %3149 = vrot.lane.b32.xlu0 %v3141_v13, %s4102_s17  ;;  %s3288_s16 = sshll.u32 %s419_s22, 4  ;;  %s4759_s16 = int_to_ptr.vmem [resolvable:$true] %s3288_s16 }
 0x48c   : > { %p3997_p0 = scmp.lt.s32.totalorder %s4759_s16, %s3995_s23 }
 0x48d   : > { %v2908_v29 = vcombine.low %v2872_v14, %v2874_v15  ;;  %v2909_v16 = vcombine.high %v2872_v14, %v2874_v15  ;;  %v3486_v14 = vld [vmem:[%s4842_s19] ss:$0 sm:$0xff] }
 0x48f   : > { %3157 = vrot.lane.b32.xlu1 %v3143_v10, %s4103_s12  ;;  %v2916_v6 = vrot.slane %v2908_v29, %v4464_v43  ;;  %v2923_v22 = vrot.slane %v2909_v16, %v4464_v43 }
 0x4ab   : > { %v2856_v21 = vpop.f32.mrb[20].mxu1 }
 0x4ac   : > { %v2875_v56 = vmul.f32 %v3847_v20, %v2856_v21  ;;  %v3656_v57 = vpop.f32.mrb[21].mxu1 }
 0x4ae   : > { %v2924_v58 = vcombine.low %v2873_v55, %v2875_v56  ;;  %v2925_v4 = vcombine.high %v2873_v55, %v2875_v56 }
 0x4b0   : > { %v2932_v23 = vrot.slane %v2924_v58, %v4464_v43  ;;  %v2939_v24 = vrot.slane %v2925_v4, %v4464_v43 }
 0x4b2   : > { %v2972_v25 = vcombine.low %v2916_v6, %v2932_v23  ;;  %v2973_v26 = vcombine.high %v2916_v6, %v2932_v23  ;;  %v2988_v27 = vcombine.low %v2923_v22, %v2939_v24  ;;  %v2989_v28 = vcombine.high %v2923_v22, %v2939_v24 }
 0x4b4   : > { %v2980_v33 = vrot.slane %v2972_v25, %v4466_v49  ;;  %v2987_v34 = vrot.slane %v2973_v26, %v4466_v49  ;;  %v2996_v35 = vrot.slane %v2988_v27, %v4466_v49  ;;  %v3003_v36 = vrot.slane %v2989_v28, %v4466_v49 }
 0x4b6   : > { %v3479_v38 = vcombine.low %v2980_v33, %v2987_v34  ;;  %v3481_v39 = vcombine.high %v2980_v33, %v2987_v34  ;;  %v3483_v40 = vcombine.low %v2996_v35, %v3003_v36  ;;  %v3485_v41 = vcombine.high %v2996_v35, %v3003_v36 }
 0x4b8   : > { %v3027_v42 = vrot.slane %v3479_v38, %v4464_v43  ;;  %v3043_v44 = vrot.slane %v3481_v39, %v4464_v43  ;;  %v3059_v45 = vrot.slane %v3483_v40, %v4464_v43  ;;  %v3075_v46 = vrot.slane %v3485_v41, %v4464_v43 }
 0x4ba   : > { %v3092_v47 = vcombine.low %v3027_v42, %v3043_v44  ;;  %v3124_v48 = vcombine.low %v3059_v45, %v3075_v46  ;;  %v3093_v50 = vcombine.high %v3027_v42, %v3043_v44  ;;  %v3125_v31 = vcombine.high %v3059_v45, %v3075_v46 }
 0x4bc   : > { %v3100_v51 = vrot.slane %v3092_v47, %v4466_v49  ;;  %v3132_v52 = vrot.slane %v3124_v48, %v4466_v49  ;;  %v3107_v53 = vrot.slane %v3093_v50, %v4466_v49  ;;  %v3139_v54 = vrot.slane %v3125_v31, %v4466_v49 }
 0x4be   : > { %v3145_v59 = vcombine.high %v3100_v51, %v3132_v52  ;;  %v3144_v60 = vcombine.low %v3100_v51, %v3132_v52  ;;  %v3147_v61 = vcombine.high %v3107_v53, %v3139_v54  ;;  %v3146_v62 = vcombine.low %v3107_v53, %v3139_v54 }
 0x4c0   : > { %3165 = vrot.lane.b32.xlu1 %v3145_v59, %s4104_s8  ;;  %3161 = vrot.lane.b32.xlu0 %v3144_v60, %s4105_s9  ;;  %s4843_s8 = sld [smem:[#allocation21_spill]] }
 0x4c4   : > { %3173 = vrot.lane.b32.xlu1 %v3147_v61, %s4106_s26  ;;  %3169 = vrot.lane.b32.xlu0 %v3146_v62, %s4107_s27  ;;  %s3274_s26 = scalar_lea.sflag [#allocation6], %s4397_s1  ;;  %s3990_s27 = scalar_lea.vmem %s4759_s16, 128 }
 0x4c5   : > { %p3991_p2 = scmp.ne.s32.totalorder %s4759_s16, %s3990_s27  ;;  %p3998_p7 = scmp.lt.s32.totalorder %s3996_s20, %s3990_s27 }
 0x4c6   : > { %s4757_s9 = scalar_lea.hbm %s4843_s8, %s3489_s24 }
 0x4c7   : > { %p3992_p10 = pnand %p3991_p2, %p4844_p9  ;;  %p3999_p5 = por %p3998_p7, %p3997_p0 }
 0x4c9   : > { %p3993_p1 = pneg %p3992_p10 }
 0x4cb   : > { %p4000_p8 = pnand %p3999_p5, %p3993_p1 }
 0x4fd   : > { %v3154_v43 = vpop.permute.xlu1 %3153  ;;  %v3150_v63 = vpop.permute.xlu0 %3149 }
 0x4fe   : > { %v3176_v2 = vsel %vm885_vm2, %v3140_v1, %v3150_v63 }
 0x4ff   : > { %v3177_v3 = vsel %vm2203_vm3, %v3176_v2, %v3154_v43 }
 0x501   : > { %v3158_v49 = vpop.permute.xlu1 %3157 }
 0x502   : > { %v3179_v5 = vsel %vm3178_vm4, %v3177_v3, %v3158_v49 }
 0x532   : > { %v3166_v9 = vpop.permute.xlu1 %3165  ;;  %v3162_v10 = vpop.permute.xlu0 %3161 }
 0x533   : > { %v3181_v11 = vsel %vm3180_vm5, %v3179_v5, %v3162_v10 }
 0x534   : > { %v3183_v13 = vsel %vm3182_vm6, %v3181_v11, %v3166_v9 }
 0x536   : > { %v3174_v12 = vpop.permute.xlu1 %3173  ;;  %v3170_v7 = vpop.permute.xlu0 %3169 }
 0x537   : > { %v3185_v8 = vsel %vm3184_vm7, %v3183_v13, %v3170_v7 }
 0x538   : > { %v3187_v1 = vsel %vm3186_vm8, %v3185_v8, %v3174_v12 }
 0x539   : > { %3666 = vmatmul.mubr.msk.f32.vlgmr.msra.gmra.mrb[16].mxu0 %vm436_vm1, %v3187_v1 }
 0x60c   : > { %v3268_v15 = vpop.f32.mrb[16].mxu0 }
 0x60d   : > { %v3269_v0 = vadd.f32 %v3486_v14, %v3268_v15  ;;  %v3667_v29 = vpop.f32.mrb[17].mxu0 }
 0x60f   : > { %3272 = vst.msk [vmem:[%s419_s22] sm:$0xff] %vm436_vm1, %v3269_v0 }
 0x610   : > { %4003 = shalt.err (!%p4000_p8)
}
 0x611   : > { %s4004_s1 = scalar_lea.hbm %s4757_s9, 128  ;;  %s4008_s24 = scalar_lea.hbm %s4843_s8, 256 }
 0x612   : > { %p4005_p3 = scmp.ne.s32.totalorder %s4757_s9, %s4004_s1  ;;  %p4009_p13 = scmp.lt.u32.totalorder %s4757_s9, %s4843_s8 }
 0x613   : > { %p4010_p12 = scmp.lt.u32.totalorder %s4008_s24, %s4004_s1  ;;  %p4012_p2 = scmp.lt.u32.totalorder %s4004_s1, %s4757_s9 }
 0x614   : > { %p4006_p11 = pnand %p4005_p3, %p4844_p9 }
 0x615   : > { %p4011_p4 = por %p4010_p12, %p4009_p13 }
 0x616   : > { %p4007_p6 = pneg %p4006_p11 }
 0x617   : > { %p4013_p10 = por %p4012_p2, %p4011_p4 }
 0x619   : > { %p4014_p1 = pnand %p4013_p10, %p4007_p6 }
 0x61b   : > { %4017 = shalt.err (!%p4014_p1)
}
 0x61c   : > { %3710 = dma.vmem_to_hbm [thread:$0]  (%p4844_p9), %s4759_s16, 128, %s4757_s9, %s3274_s26  }
 0x61d PF: > { %s3300_s12 = sand.u32 1, %s4060_s30   ;;  %p4845_p0 = scmp.ne.s32.totalorder %s4837_s21, 0 }
 0x61e   : > { %p4846_p7 = scmp.ge.s32.totalorder %s4080_s14, 2  ;;  %s3301_s27 = scalar_lea.sflag [#allocation6], %s3300_s12 }
 0x620   : > { %p3730_p5 = pnand %p4846_p7, %p4845_p0 }
 0x622   : > { %4055 = dma.done.wait (!%p3730_p5), %s3301_s27, 128  }
 0x623   : > { %4057 = vsyncadd (!%p3730_p5), %s3301_s27, 4294967168  ;;  %s27_s14 = sadd.s32 1, %s4080_s14   ;;  %s4847_s30 = smov %s4064_s10 }
 0x624   : > { %p24_p8 = scmp.ge.s32.totalorder %s27_s14, 4   ;;  %s4848_s10 = smov %s4068_s11 }
 0x625   : > { %s4849_s11 = smov %s4347_s29  ;;  %s4850_s12 = smov %s4076_s13 }
 0x626   : > { %s4851_s13 = smov %s4853_s18  ;;  %26 = sbr.rel (!%p24_p8) target bundleno = 12 (0xc), region = 122 }
 0x62d   :  { %3306 = vsyncpa [#allocation5], 1 }
 0x62e   :  { %3308 = vsyncpa [#allocation5 + $0x1], 1 }
 0x62f   :  { %3309 = vsyncpa [#allocation8], 1 }
 0x630   :  { %3310 = vsyncpa [#allocation11], 1 }
 0x631   :  { %3311 = vsyncpa [#allocation6], 1 }
 0x632   :  { %3313 = vsyncpa [#allocation6 + $0x1], 1 }

// kernel: tpu_custom_call.1
= control target key start
LH: loop header
LB: loop body
LE: loop exit
PB: predicated region body
PF: predicated region fallthrough
CT: control target
= control target key end

     0   :  { %s4807_s0 = inlined_call_operand.hbm [shape: f32[2,8,32], index: 0, kind: input, shape index: {}]   ;;  %s4808_s1 = inlined_call_operand.hbm [shape: f32[32,32], index: 1, kind: input, shape index: {}]   ;;  %s4809_s2 = inlined_call_operand.vmem [shape: f32[1,32], index: 2, kind: input, shape index: {}]   ;;  %s4810_s3 = inlined_call_operand.hbm [shape: f32[32,32], index: 3, kind: input, shape index: {}]   ;;  %s4811_s4 = inlined_call_operand.vmem [shape: f32[1,32], index: 4, kind: input, shape index: {}]   ;;  %s4812_s5 = inlined_call_operand.hbm [shape: f32[32,32], index: 5, kind: input, shape index: {}]   ;;  %s4813_s6 = inlined_call_operand.vmem [shape: f32[1,32], index: 6, kind: input, shape index: {}]   ;;  %s4814_s7 = inlined_call_operand.hbm [shape: f32[32,32], index: 7, kind: input, shape index: {}]   ;;  %s4815_s8 = inlined_call_operand.vmem [shape: f32[1,32], index: 8, kind: input, shape index: {}]   ;;  %s4816_s9 = inlined_call_operand.hbm [shape: f32[2,8,32], index: 9, kind: output, shape index: {}]  }
   0x1   :  { %4823 = sst [smem:[#allocation19_spill]] %s4808_s1 }
   0x2   :  { %4824 = sst [smem:[#allocation20_spill]] %s4815_s8 }
   0x3   :  { %4825 = sst [smem:[#allocation21_spill]] %s4816_s9 }
   0x4   :  { %14 = vsyncpa [#allocation5], 0 }
   0x5   :  { %16 = vsyncpa [#allocation5 + $0x1], 0 }
   0x6   :  { %17 = vsyncpa [#allocation8], 0 }
   0x7   :  { %18 = vsyncpa [#allocation11], 0 }
   0x8   :  { %19 = vsyncpa [#allocation6], 0 }
   0x9   :  { %21 = vsyncpa [#allocation6 + $0x1], 0  ;;  %s4159_s30 = smov 0   ;;  %s4161_s10 = smov 0  }
   0xa   :  { %s4163_s11 = smov 0   ;;  %s4165_s12 = smov 0  }
   0xb   :  { %s4167_s13 = smov 0   ;;  %s4169_s14 = smov 0  }
   0xc LB: > { %4826 = sst [smem:[#allocation18_spill]] %s4072_s12  ;;  %s4817_s15 = sadd.s32 4294967295, %s4080_s14   ;;  %s4080_s14 = sphi %s4169_s14, %s27_s14   ;;  %s4076_s13 = sphi %s4167_s13, %s4851_s13   ;;  %s4072_s12 = sphi %s4165_s12, %s4850_s12   ;;  %s4068_s11 = sphi %s4163_s11, %s4849_s11   ;;  %s4064_s10 = sphi %s4161_s10, %s4848_s10   ;;  %s4060_s30 = sphi %s4159_s30, %s4847_s30  }
   0xd   : > { %p3409_p0 = scmp.ge.s32.totalorder %s4080_s14, 1  ;;  %p4193_p1 = scmp.eq.s32.totalorder %s4817_s15, 0 }
   0xe   : > { %p266_p2 = scmp.lt.s32.totalorder %s4080_s14, 3  ;;  %s4082_s18 = smov [#allocation7]  }
   0xf   : > { %s4827_s16 = scalar_select %p4193_p1, 1, 0 }
  0x10   : > { %p4198_p3 = pnand %p3409_p0, %p266_p2  ;;  %s278_s19 = sshll.u32 %s4082_s18, 4  ;;  %s4202_s19 = int_to_ptr.vmem [resolvable:$true] %s278_s19 }
  0x11   : > { %s4083_s21 = smov [#allocation10]   ;;  %s4084_s23 = smov [#allocation9]  }
  0x12   : > { %s4828_s17 = scalar_select %p4198_p3, 1, 0 }
  0x13   : > { %p3712_p4 = pneg %p4198_p3  ;;  %s310_s22 = sshll.u32 %s4083_s21, 4  ;;  %s4213_s22 = int_to_ptr.vmem [resolvable:$true] %s310_s22 }
  0x14   : > { %s4215_s24 = sshll.u32 %s4084_s23, 4  ;;  %s4830_s1 = sld [smem:[#allocation19_spill]]  ;;  %s295_s24 = int_to_ptr.vmem [resolvable:$true] %s4215_s24 }
  0x15   : > { %p4209_p6 = pnand %p3712_p4, %p4193_p1 }
  0x17   : > { %p4225_p8 = pneg %p4209_p6 }
  0x1a   : > { %s3848_s27 = scalar_lea.hbm %s4830_s1, 512 }
  0x1b   : > { %p3849_p7 = scmp.ne.s32.totalorder %s4830_s1, %s3848_s27  ;;  %p3855_p11 = scmp.lt.u32.totalorder %s3848_s27, %s4830_s1 }
  0x1d   : > { %p3851_p9 = pnand %p4225_p8, %p3849_p7 }
  0x1f   : > { %p3852_p10 = pneg %p3851_p9 }
  0x21   : > { %p3857_p12 = pnand %p3855_p11, %p3852_p10 }
  0x23   : > { %3860 = shalt.err (!%p3857_p12)
}
  0x24   : > { %s3861_s25 = scalar_lea.vmem %s4202_s19, 512  ;;  %p3869_p4 = scmp.lt.s32.totalorder %s4202_s19, %s4202_s19 }
  0x25   : > { %p3862_p13 = scmp.ne.s32.totalorder %s4202_s19, %s3861_s25  ;;  %p3870_p5 = scmp.lt.s32.totalorder %s3861_s25, %s3861_s25 }
  0x27   : > { %p3864_p0 = pnand %p3862_p13, %p4225_p8  ;;  %p3871_p7 = por %p3870_p5, %p3869_p4 }
  0x29   : > { %p3865_p2 = pneg %p3864_p0 }
  0x2b   : > { %p3872_p9 = pnand %p3871_p7, %p3865_p2 }
  0x2d   : > { %3875 = shalt.err (!%p3872_p9)
}
  0x2e   : > { %s4085_s26 = smov 128   ;;  %s4086_s27 = smov 8  }
  0x2f   : > { %3715 = dma.hbm_to_vmem [thread:$0]  (!%p4209_p6), %s4830_s1, 512, %s4202_s19, [#allocation8], %s4085_s26, %s4085_s26, %s4086_s27  }
  0x30   : > { %s3876_s25 = scalar_lea.hbm %s4812_s5, 512 }
  0x31   : > { %p3877_p5 = scmp.ne.s32.totalorder %s4812_s5, %s3876_s25  ;;  %p3883_p12 = scmp.lt.u32.totalorder %s3876_s25, %s4812_s5 }
  0x33   : > { %p3879_p10 = pnand %p3877_p5, %p4225_p8 }
  0x35   : > { %p3880_p11 = pneg %p3879_p10 }
  0x37   : > { %p3885_p13 = pnand %p3883_p12, %p3880_p11 }
  0x39   : > { %3888 = shalt.err (!%p3885_p13)
}
  0x3a   : > { %s3889_s19 = scalar_lea.vmem %s4213_s22, 512  ;;  %p3897_p7 = scmp.lt.s32.totalorder %s4213_s22, %s4213_s22 }
  0x3b   : > { %p3890_p0 = scmp.ne.s32.totalorder %s4213_s22, %s3889_s19  ;;  %p3898_p9 = scmp.lt.s32.totalorder %s3889_s19, %s3889_s19 }
  0x3d   : > { %p3892_p2 = pnand %p3890_p0, %p4225_p8  ;;  %p3899_p5 = por %p3898_p9, %p3897_p7 }
  0x3f   : > { %p3893_p4 = pneg %p3892_p2 }
  0x41   : > { %p3900_p10 = pnand %p3899_p5, %p3893_p4 }
  0x43   : > { %3903 = shalt.err (!%p3900_p10)
}
  0x44   : > { %3721 = dma.hbm_to_vmem [thread:$0]  (!%p4209_p6), %s4812_s5, 512, %s4213_s22, [#allocation11], %s4085_s26, %s4085_s26, %s4086_s27  }
  0x45   : > { %s3904_s28 = scalar_lea.hbm %s4810_s3, 512 }
  0x46   : > { %p3905_p11 = scmp.ne.s32.totalorder %s4810_s3, %s3904_s28  ;;  %p3911_p0 = scmp.lt.u32.totalorder %s3904_s28, %s4810_s3 }
  0x48   : > { %p3907_p12 = pnand %p3905_p11, %p4225_p8 }
  0x4a   : > { %p3908_p13 = pneg %p3907_p12 }
  0x4c   : > { %p3913_p2 = pnand %p3911_p0, %p3908_p13 }
  0x4e   : > { %3916 = shalt.err (!%p3913_p2)
}
  0x4f   : > { %s3917_s19 = scalar_lea.vmem %s295_s24, 512  ;;  %p3925_p5 = scmp.lt.s32.totalorder %s295_s24, %s295_s24 }
  0x50   : > { %p3918_p4 = scmp.ne.s32.totalorder %s295_s24, %s3917_s19  ;;  %p3926_p10 = scmp.lt.s32.totalorder %s3917_s19, %s3917_s19 }
  0x52   : > { %p3920_p7 = pnand %p3918_p4, %p4225_p8  ;;  %p3927_p3 = por %p3926_p10, %p3925_p5 }
  0x54   : > { %p3921_p9 = pneg %p3920_p7 }
  0x56   : > { %p3928_p1 = pnand %p3927_p3, %p3921_p9 }
  0x58   : > { %3931 = shalt.err (!%p3928_p1)
}
  0x59   : > { %3718 = dma.hbm_to_vmem [thread:$0]  (!%p4209_p6), %s4810_s3, 512, %s295_s24, [#allocation8], %s4085_s26, %s4085_s26, %s4086_s27  }
  0x5a   : > { %s4087_s9 = smov [#allocation12]   ;;  %s3932_s29 = scalar_lea.hbm %s4814_s7, 512 }
  0x5b   : > { %s326_s12 = sshll.u32 %s4087_s9, 4  ;;  %p3933_p1 = scmp.ne.s32.totalorder %s4814_s7, %s3932_s29  ;;  %s327_s12 = int_to_ptr.vmem [resolvable:$true] %s326_s12 }
  0x5c   : > { %p3939_p12 = scmp.lt.u32.totalorder %s3932_s29, %s4814_s7 }
  0x5d   : > { %p3935_p3 = pnand %p3933_p1, %p4225_p8 }
  0x5f   : > { %p3936_p11 = pneg %p3935_p3 }
  0x61   : > { %p3941_p13 = pnand %p3939_p12, %p3936_p11 }
  0x63   : > { %3944 = shalt.err (!%p3941_p13)
}
  0x64   : > { %s3945_s24 = scalar_lea.vmem %s327_s12, 512  ;;  %p3953_p7 = scmp.lt.s32.totalorder %s327_s12, %s327_s12 }
  0x65   : > { %p3946_p0 = scmp.ne.s32.totalorder %s327_s12, %s3945_s24  ;;  %p3954_p9 = scmp.lt.s32.totalorder %s3945_s24, %s3945_s24 }
  0x67   : > { %p3948_p2 = pnand %p3946_p0, %p4225_p8  ;;  %p3955_p5 = por %p3954_p9, %p3953_p7 }
  0x69   : > { %p3949_p4 = pneg %p3948_p2 }
  0x6b   : > { %p3956_p10 = pnand %p3955_p5, %p3949_p4 }
  0x6d   : > { %3959 = shalt.err (!%p3956_p10)
}
  0x6e   : > { %3724 = dma.hbm_to_vmem [thread:$0]  (!%p4209_p6), %s4814_s7, 512, %s327_s12, [#allocation11], %s4085_s26, %s4085_s26, %s4086_s27  }
  0x6f   : > { %s3408_s20 = sadd.s32 4294967294, %s4080_s14   ;;  %s39_s18 = sadd.s32 1, %s4076_s13 }
  0x70   : > { %p41_p8 = scmp.ge.s32.totalorder %s39_s18, 2  ;;  %s46_s9 = sadd.s32 1, %s4068_s11 }
  0x71   : > { %p53_p1 = scmp.ne.s32.totalorder %s4068_s11, %s4064_s10  ;;  %p54_p3 = scmp.eq.s32.totalorder %s4080_s14, 0 }
  0x72   : > { %s4853_s18 = smov (%p41_p8, %s39_s18), 0  ;;  %p59_p12 = scmp.ne.s32.totalorder %s4064_s10, %s4060_s30 }
  0x73   : > { %p4326_p11 = por %p54_p3, %p53_p1  ;;  %s43_s26 = ssub.s32 %s4076_s13, %s4853_s18 }
  0x74   : > { %s4833_s27 = sadd.s32 4294967295, %s4080_s14   ;;  %p44_p13 = scmp.eq.s32.totalorder %s43_s26, 0 }
  0x75   : > { %p253_p6 = scmp.eq.s32.totalorder %s4833_s27, 1  ;;  %p4834_p0 = scmp.ne.s32.totalorder %s4827_s16, 0 }
  0x76   : > { %p259_p7 = scmp.eq.s32.totalorder %s3408_s20, 1  ;;  %p3737_p5 = scmp.lt.s32.totalorder %s4080_s14, 2 }
  0x77   : > { %p4338_p2 = por %p4834_p0, %p59_p12  ;;  %p4342_p4 = por %p253_p6, %p53_p1 }
  0x78   : > { %s4347_s29 = scalar_select %p44_p13, %s4068_s11, %s46_s9  }
  0x79   : > { %s4836_s28 = scalar_select %p4342_p4, 1, 0 }
  0x7a   : > { %p4349_p9 = por %p259_p7, %p59_p12  ;;  %s343_s23 = sand.u32 1, %s4068_s11  }
  0x7b   : > { %s3416_s25 = sshll.u32 %s4076_s13, 7  ;;  %s3415_s19 = sshll.u32 %s343_s23, 3 }
  0x7c   : > { %s4837_s21 = scalar_select %p4349_p9, 1, 0 }
  0x7d   : > { %s4359_s8 = scalar_lea.hbm %s4807_s0, %s3416_s25  ;;  %s347_s20 = scalar_lea.vmem [#allocation4], %s3415_s19 }
  0x7e   : > { %s354_s9 = sshll.u32 %s347_s20, 4  ;;  %p4363_p10 = pnand %p3737_p5, %p4326_p11  ;;  %s4367_s9 = int_to_ptr.vmem [resolvable:$true] %s354_s9 }
  0x7f   : > { %s344_s27 = scalar_lea.sflag [#allocation5], %s343_s23  ;;  %s3960_s1 = scalar_lea.hbm %s4359_s8, 128 }
  0x80   : > { %p3961_p8 = scmp.ne.s32.totalorder %s4359_s8, %s3960_s1  ;;  %p3962_p1 = pneg %p4363_p10 }
  0x81   : > { %s3965_s15 = scalar_lea.hbm %s4807_s0, 256  ;;  %p3966_p11 = scmp.lt.u32.totalorder %s4359_s8, %s4807_s0 }
  0x82   : > { %p3963_p3 = pnand %p3962_p1, %p3961_p8  ;;  %p3967_p6 = scmp.lt.u32.totalorder %s3965_s15, %s3960_s1 }
  0x83   : > { %p3969_p0 = scmp.lt.u32.totalorder %s3960_s1, %s4359_s8 }
  0x84   : > { %p3964_p12 = pneg %p3963_p3  ;;  %p3968_p13 = por %p3967_p6, %p3966_p11 }
  0x86   : > { %p3970_p7 = por %p3969_p0, %p3968_p13 }
  0x88   : > { %p3971_p5 = pnand %p3970_p7, %p3964_p12 }
  0x8a   : > { %3974 = shalt.err (!%p3971_p5)
}
  0x8b   : > { %s3975_s23 = scalar_lea.vmem %s4367_s9, 128  ;;  %s4088_s20 = smov [#allocation4]  }
  0x8c   : > { %p3976_p8 = scmp.ne.s32.totalorder %s4367_s9, %s3975_s23  ;;  %s3980_s25 = sshll.u32 %s4088_s20, 4  ;;  %s3981_s25 = int_to_ptr.vmem [resolvable:$false] %s3980_s25 }
  0x8d   : > { %s3982_s19 = scalar_lea.vmem %s3981_s25, 256  ;;  %p3983_p4 = scmp.lt.s32.totalorder %s4367_s9, %s3981_s25 }
  0x8e   : > { %p3978_p3 = pnand %p3976_p8, %p3962_p1  ;;  %p3984_p11 = scmp.lt.s32.totalorder %s3982_s19, %s3975_s23 }
  0x90   : > { %p3979_p9 = pneg %p3978_p3  ;;  %p3985_p6 = por %p3984_p11, %p3983_p4 }
  0x92   : > { %p3986_p13 = pnand %p3985_p6, %p3979_p9 }
  0x94   : > { %3989 = shalt.err (!%p3986_p13)
}
  0x95   : > { %3728 = dma.hbm_to_vmem [thread:$0]  (!%p4363_p10), %s4359_s8, 128, %s4367_s9, %s344_s27  }
  0x96   : > { %p4839_p12 = scmp.ne.s32.totalorder %s4828_s17, 0 }
  0x97   : > { %s4397_s1 = sand.u32 (!%p4839_p12), 1, %s4064_s10  }
  0x98   : > { %363 = sbr.rel (%p4839_p12) target bundleno = 1565 (0x61d), region = 56  ;;  %s3418_s15 = sshll.u32 (!%p4839_p12), %s4397_s1, 3 }
  0x99   : > { %s366_s24 = scalar_lea.sflag (!%p4839_p12), [#allocation5], %s4397_s1  ;;  %s369_s22 = scalar_lea.vmem (!%p4839_p12), [#allocation4], %s3418_s15 }
  0x9f   : > { %4043 = dma.done.wait (%p4338_p2), %s366_s24, 128  }
  0xa0   : > { %4045 = vsyncadd (%p4338_p2), %s366_s24, 4294967168  ;;  %p4840_p4 = scmp.ne.s32.totalorder %s4827_s16, 0 }
  0xa2   : > { %4047 = dma.done.wait (%p4840_p4), [#allocation8], 1024  }
  0xa3   : > { %4049 = vsyncadd (%p4840_p4), [#allocation8], 4294966272 }
  0xa4   : > { %4051 = dma.done.wait (%p4840_p4), [#allocation11], 1024  }
  0xa5   : > { %4053 = vsyncadd (%p4840_p4), [#allocation11], 4294966272  ;;  %v4089_v0 = vmov 0.0|0.0   ;;  %vm4090_vm0 = vmmov 0   ;;  %v4091_v1 = vmov 0.0   ;;  %v425_v2 = vld [vmem:[#allocation9] sm:$0xff]  ;;  %v618_v35 = vlaneseq }
  0xa6   : > { %3668 = vmatprep.subr.bf16.mxu0 %v4089_v0  ;;  %3552 = vmatprep.mubr.msk.f32.mxu0 %vm4090_vm0, %v4091_v1  ;;  %v426_v3 = vld [vmem:[#allocation9 + $0x8] sm:$0xff]  ;;  %v427_v4 = vld [vmem:[#allocation9 + $0x10] sm:$0xff]  ;;  %v428_v6 = vld [vmem:[#allocation9 + $0x18] sm:$0xff]  ;;  %vm436_vm1 = vcmask 261120   ;;  %s4092_s12 = smov 124   ;;  %s4093_s8 = smov 116  }
  0xa7   : > { %3674 = vmatprep.subr.bf16.mxu1 %v4089_v0  ;;  %3563 = vmatprep.mubr.msk.f32.mxu1 %vm4090_vm0, %v4091_v1  ;;  %v3669_v5 = vpack.c.bf16 %v426_v3, %v425_v2  ;;  %v3672_v7 = vpack.c.bf16 %v428_v6, %v427_v4  ;;  %v510_v8 = vld [vmem:[#allocation10] sm:$0xff]  ;;  %v511_v9 = vld [vmem:[#allocation10 + $0x8] sm:$0xff]  ;;  %v424_v13 = vld [vmem:[%s369_s22] sm:$0xff]  ;;  %s4094_s27 = smov 120   ;;  %s4095_s23 = smov 112   ;;  %v619_v39 = vshrl.u32 %v618_v35, 7 }
  0xa8   : > { %v1199_v10 = vld [vmem:[#allocation7] sm:$0xff]  ;;  %v1200_v11 = vld [vmem:[#allocation7 + $0x8] sm:$0xff]  ;;  %v3675_v12 = vpack.c.bf16 %v511_v9, %v510_v8  ;;  %v1201_v15 = vld [vmem:[#allocation7 + $0x10] sm:$0xff]  ;;  %s4096_s20 = smov 104   ;;  %s4097_s25 = smov 108   ;;  %vm885_vm2 = vcmask 31744  }
  0xa9   : > { %3670 = vmatpush3.bf16.msra.mxu0 %v3669_v5  ;;  %v3681_v14 = vpack.c.bf16 %v1200_v11, %v1199_v10  ;;  %v1202_v16 = vld [vmem:[#allocation7 + $0x18] sm:$0xff]  ;;  %v512_v18 = vld [vmem:[#allocation10 + $0x10] sm:$0xff]  ;;  %s4098_s19 = smov 100   ;;  %v4099_v33 = vmov 1983009808   ;;  %vm2203_vm3 = vcmask 64512  }
  0xaa   : > { %3671 = vmatprep.subr.bf16.mxu0 %v4089_v0  ;;  %3676 = vmatpush3.bf16.msra.mxu1 %v3675_v12  ;;  %v3684_v17 = vpack.c.bf16 %v1202_v16, %v1201_v15  ;;  %v513_v19 = vld [vmem:[#allocation10 + $0x18] sm:$0xff]  ;;  %v3424_v21 = vld [vmem:[%s4811_s4] ss:$0 sm:$0xff]  ;;  %v616_v34 = vunpack.c.l.s4 %v4099_v33  ;;  %v4100_v36 = vmov 1934713408   ;;  %s4101_s16 = smov 8  }
  0xab   : > { %3677 = vmatprep.subr.bf16.mxu1 %v4089_v0  ;;  %v3678_v20 = vpack.c.bf16 %v513_v19, %v512_v18  ;;  %v3444_v25 = vld [vmem:[%s4809_s2] ss:$0 sm:$0xff]  ;;  %v680_v37 = vunpack.c.l.s4 %v4100_v36  ;;  %s4102_s17 = smov 4   ;;  %s4105_s9 = smov 16   ;;  %vm3178_vm4 = vcmask 97280   ;;  %vm3180_vm5 = vcmask 130048  }
  0xac   : > { %v3426_v29 = vld [vmem:[%s4813_s6] ss:$0 sm:$0xff]  ;;  %v617_v38 = vunpack.c.0.s8 %v616_v34  ;;  %s4106_s26 = smov 28   ;;  %vm3182_vm6 = vcmask 162816   ;;  %vm3184_vm7 = vcmask 195584   ;;  %vm3186_vm8 = vcmask 228352  }
  0xad   : > { %3673 = vmatpush3.bf16.msra.mxu0 %v3672_v7  ;;  %v681_v42 = vunpack.c.0.s8 %v680_v37  ;;  %s419_s22 = scalar_lea.vmem [#allocation13], %s3418_s15  ;;  %p4844_p9 = scmp.ne.s32.totalorder %s4836_s28, 0 }
  0xae   : > { %3680 = vmatprep.subr.bf16.mxu0 %v4089_v0  ;;  %3679 = vmatpush3.bf16.msra.mxu1 %v3678_v20  ;;  %v4464_v43 = vsub.s32 %v617_v38, %v619_v39  ;;  %s4108_s15 = smov [#allocation13]  }
  0xaf   : > { %3577 = vmatprep.subr.mxu1 %v4091_v1  ;;  %v4466_v49 = vsub.s32 %v681_v42, %v619_v39 }
  0xb0   : > { %3553 = vmatmul.mubr.msk.f32.vlgmr.msra.gmra.mrb[0].mxu0 %vm436_vm1, %v424_v13 }
  0xb1   : > { %3682 = vmatpush3.bf16.msra.mxu0 %v3681_v14  ;;  %3574 = vmatprep.mubr.msk.f32.mxu0 %vm4090_vm0, %v4091_v1 }
  0xb2   : > { %3683 = vmatprep.subr.bf16.mxu0 %v4089_v0  ;;  %3564 = vmatmul.mubr.msk.f32.vlgmr.msra.gmra.mrb[0].mxu1 %vm436_vm1, %v424_v13 }
  0xb3   : > { %3579 = vmatprep.mubr.msk.f32.mxu1 %vm4090_vm0, %v4091_v1 }
  0xb5   : > { %3685 = vmatpush3.bf16.msra.mxu0 %v3684_v17 }
  0xb6   : > { %3597 = vmatprep.subr.mxu0 %v4091_v1 }
  0xb8   : > { %3575 = vmatmul.mubr.msk.f32.vlgmr.msra.gmra.mrb[2].mxu0 %vm436_vm1, %v424_v13 }
  0xb9   : > { %3599 = vmatprep.mubr.msk.f32.mxu0 %vm4090_vm0, %v4091_v1 }
 0x183   : > { %v506_v22 = vpop.f32.mrb[0].mxu0 }
 0x184   : > { %v507_v23 = vadd.f32 %v3424_v21, %v506_v22  ;;  %v3554_v24 = vpop.f32.mrb[1].mxu0 }
 0x185   : > { %v587_v30 = vpop.f32.mrb[0].mxu1 }
 0x186   : > { %592 = vrot.lane.b32.xlu0 %v507_v23, %s4092_s12  ;;  %598 = vrot.lane.b32.xlu1 %v507_v23, %s4093_s8  ;;  %v4456_v31 = vadd.f32 %v3426_v29, %v587_v30  ;;  %v3565_v32 = vpop.f32.mrb[1].mxu1 }
 0x18a   : > { %595 = vrot.lane.b32.xlu0 %v507_v23, %s4094_s27 }
 0x18b   : > { %v1280_v26 = vpop.f32.mrb[2].mxu0 }
 0x18c   : > { %v4442_v27 = vadd.f32 %v3444_v25, %v1280_v26  ;;  %v3576_v28 = vpop.f32.mrb[3].mxu0 }
 0x18e   : > { %1288 = vrot.lane.b32.xlu0 %v4442_v27, %s4094_s27  ;;  %1285 = vrot.lane.b32.xlu1 %v4442_v27, %s4092_s12 }
 0x192   : > { %601 = vrot.lane.b32.xlu0 %v507_v23, %s4095_s23  ;;  %1291 = vrot.lane.b32.xlu1 %v4442_v27, %s4093_s8 }
 0x196   : > { %607 = vrot.lane.b32.xlu0 %v507_v23, %s4096_s20  ;;  %604 = vrot.lane.b32.xlu1 %v507_v23, %s4097_s25 }
 0x19a   : > { %1294 = vrot.lane.b32.xlu0 %v4442_v27, %s4095_s23  ;;  %610 = vrot.lane.b32.xlu1 %v507_v23, %s4098_s19 }
 0x19e   : > { %1300 = vrot.lane.b32.xlu0 %v4442_v27, %s4096_s20  ;;  %1297 = vrot.lane.b32.xlu1 %v4442_v27, %s4097_s25 }
 0x1a2   : > { %1303 = vrot.lane.b32.xlu1 %v4442_v27, %s4098_s19  ;;  %895 = vrot.lane.b32.xlu0 %v4456_v31, %s4092_s12  ;;  %s4103_s12 = smov 12  }
 0x1a6   : > { %898 = vrot.lane.b32.xlu1 %v4456_v31, %s4094_s27  ;;  %901 = vrot.lane.b32.xlu0 %v4456_v31, %s4093_s8  ;;  %s4104_s8 = smov 20   ;;  %s4107_s27 = smov 24  }
 0x1aa   : > { %907 = vrot.lane.b32.xlu1 %v4456_v31, %s4097_s25  ;;  %904 = vrot.lane.b32.xlu0 %v4456_v31, %s4095_s23  ;;  %s4841_s23 = sld [smem:[#allocation18_spill]] }
 0x1ae   : > { %910 = vrot.lane.b32.xlu1 %v4456_v31, %s4096_s20 }
 0x1b0   : > { %s3489_s24 = sshll.u32 %s4841_s23, 7  ;;  %s3994_s23 = sshll.u32 %s4108_s15, 4  ;;  %s3995_s23 = int_to_ptr.vmem [resolvable:$false] %s3994_s23 }
 0x1b1   : > { %s3996_s20 = scalar_lea.vmem %s3995_s23, 256 }
 0x1f8   : > { %v593_v40 = vpop.permute.xlu0 %592  ;;  %v599_v41 = vpop.permute.xlu1 %598 }
 0x1f9   : > { %v629_v44 = vcombine.low %v593_v40, %v599_v41  ;;  %v630_v45 = vcombine.high %v593_v40, %v599_v41 }
 0x1fb   : > { %v637_v50 = vrot.slane %v629_v44, %v4464_v43  ;;  %v644_v51 = vrot.slane %v630_v45, %v4464_v43 }
 0x1fc   : > { %v596_v46 = vpop.permute.xlu0 %595 }
 0x1fd   : > { %v613_v47 = vcombine.low %v507_v23, %v596_v46  ;;  %v614_v48 = vcombine.high %v507_v23, %v596_v46 }
 0x1ff   : > { %v621_v52 = vrot.slane %v613_v47, %v4464_v43  ;;  %v628_v53 = vrot.slane %v614_v48, %v4464_v43 }
 0x200   : > { %v1289_v54 = vpop.permute.xlu0 %1288  ;;  %v1286_v55 = vpop.permute.xlu1 %1285 }
 0x201   : > { %v677_v56 = vcombine.low %v621_v52, %v637_v50  ;;  %v678_v57 = vcombine.high %v621_v52, %v637_v50  ;;  %v693_v58 = vcombine.low %v628_v53, %v644_v51  ;;  %v694_v59 = vcombine.high %v628_v53, %v644_v51 }
 0x202   : > { %v1306_v2 = vcombine.low %v4442_v27, %v1289_v54  ;;  %v1307_v3 = vcombine.high %v4442_v27, %v1289_v54 }
 0x203   : > { %v685_v60 = vrot.slane %v677_v56, %v4466_v49  ;;  %v692_v61 = vrot.slane %v678_v57, %v4466_v49  ;;  %v701_v62 = vrot.slane %v693_v58, %v4466_v49  ;;  %v708_v63 = vrot.slane %v694_v59, %v4466_v49 }
 0x204   : > { %v602_v4 = vpop.permute.xlu0 %601  ;;  %v1292_v5 = vpop.permute.xlu1 %1291  ;;  %v1314_v16 = vrot.slane %v1306_v2, %v4464_v43  ;;  %v1321_v17 = vrot.slane %v1307_v3, %v4464_v43 }
 0x205   : > { %v3428_v6 = vcombine.low %v685_v60, %v692_v61  ;;  %v3430_v7 = vcombine.high %v685_v60, %v692_v61  ;;  %v3432_v8 = vcombine.low %v701_v62, %v708_v63  ;;  %v3434_v9 = vcombine.high %v701_v62, %v708_v63 }
 0x206   : > { %v1322_v10 = vcombine.low %v1286_v55, %v1292_v5  ;;  %v1323_v11 = vcombine.high %v1286_v55, %v1292_v5 }
 0x207   : > { %v757_v12 = vrot.slane %v3428_v6, %v4464_v43  ;;  %v773_v13 = vrot.slane %v3430_v7, %v4464_v43  ;;  %v789_v14 = vrot.slane %v3432_v8, %v4464_v43  ;;  %v805_v15 = vrot.slane %v3434_v9, %v4464_v43 }
 0x208   : > { %v1330_v18 = vrot.slane %v1322_v10, %v4464_v43  ;;  %v1337_v19 = vrot.slane %v1323_v11, %v4464_v43  ;;  %v608_v20 = vpop.permute.xlu0 %607  ;;  %v605_v21 = vpop.permute.xlu1 %604 }
 0x209   : > { %v813_v22 = vcombine.low %v757_v12, %v773_v13  ;;  %v814_v23 = vcombine.high %v757_v12, %v773_v13  ;;  %v845_v24 = vcombine.low %v789_v14, %v805_v15  ;;  %v846_v25 = vcombine.high %v789_v14, %v805_v15 }
 0x20a   : > { %v1370_v26 = vcombine.low %v1314_v16, %v1330_v18  ;;  %v1371_v27 = vcombine.high %v1314_v16, %v1330_v18  ;;  %v1386_v28 = vcombine.low %v1321_v17, %v1337_v19  ;;  %v1387_v29 = vcombine.high %v1321_v17, %v1337_v19 }
 0x20b   : > { %v821_v30 = vrot.slane %v813_v22, %v4466_v49  ;;  %v828_v32 = vrot.slane %v814_v23, %v4466_v49  ;;  %v853_v33 = vrot.slane %v845_v24, %v4466_v49  ;;  %v860_v34 = vrot.slane %v846_v25, %v4466_v49 }
 0x20c   : > { %v1378_v35 = vrot.slane %v1370_v26, %v4466_v49  ;;  %v1385_v36 = vrot.slane %v1371_v27, %v4466_v49  ;;  %v1394_v37 = vrot.slane %v1386_v28, %v4466_v49  ;;  %v1401_v38 = vrot.slane %v1387_v29, %v4466_v49  ;;  %v1295_v39 = vpop.permute.xlu0 %1294  ;;  %v611_v40 = vpop.permute.xlu1 %610 }
 0x20d   : > { %v877_v41 = vcombine.low %v821_v30, %v853_v33  ;;  %v878_v42 = vcombine.high %v821_v30, %v853_v33  ;;  %v879_v44 = vcombine.low %v828_v32, %v860_v34  ;;  %v880_v45 = vcombine.high %v828_v32, %v860_v34 }
 0x20e   : > { %v3446_v46 = vcombine.low %v1378_v35, %v1385_v36  ;;  %v3448_v47 = vcombine.high %v1378_v35, %v1385_v36  ;;  %v3450_v48 = vcombine.low %v1394_v37, %v1401_v38  ;;  %v3452_v50 = vcombine.high %v1394_v37, %v1401_v38 }
 0x20f   : > { %886 = vst.msk [vmem:[#allocation2] sm:$0xff] %vm885_vm2, %v877_v41  ;;  %887 = vst.msk [vmem:[#allocation2 + $0x8] sm:$0xff] %vm885_vm2, %v878_v42  ;;  %v645_v51 = vcombine.low %v602_v4, %v608_v20  ;;  %v646_v52 = vcombine.high %v602_v4, %v608_v20  ;;  %v661_v53 = vcombine.low %v605_v21, %v611_v40 }
 0x210   : > { %888 = vst.msk [vmem:[#allocation2 + $0x10] sm:$0xff] %vm885_vm2, %v879_v44  ;;  %889 = vst.msk [vmem:[#allocation2 + $0x18] sm:$0xff] %vm885_vm2, %v880_v45  ;;  %v662_v54 = vcombine.high %v605_v21, %v611_v40  ;;  %v4499_v55 = vrot.slane %v3446_v46, %v4464_v43  ;;  %v4502_v56 = vrot.slane %v3448_v47, %v4464_v43  ;;  %v1298_v59 = vpop.permute.xlu1 %1297  ;;  %v1301_v2 = vpop.permute.xlu0 %1300 }
 0x211   : > { %v4505_v57 = vrot.slane %v3450_v48, %v4464_v43  ;;  %v4508_v58 = vrot.slane %v3452_v50, %v4464_v43  ;;  %v653_v60 = vrot.slane %v645_v51, %v4464_v43  ;;  %v660_v61 = vrot.slane %v646_v52, %v4464_v43 }
 0x212   : > { %v669_v62 = vrot.slane %v661_v53, %v4464_v43  ;;  %v676_v63 = vrot.slane %v662_v54, %v4464_v43  ;;  %v1506_v3 = vcombine.low %v4499_v55, %v4502_v56  ;;  %v1507_v4 = vcombine.high %v4499_v55, %v4502_v56 }
 0x213   : > { %v1538_v5 = vcombine.low %v4505_v57, %v4508_v58  ;;  %v1539_v6 = vcombine.high %v4505_v57, %v4508_v58  ;;  %v1338_v11 = vcombine.low %v1295_v39, %v1301_v2  ;;  %v1339_v12 = vcombine.high %v1295_v39, %v1301_v2 }
 0x214   : > { %v709_v7 = vcombine.low %v653_v60, %v669_v62  ;;  %v710_v8 = vcombine.high %v653_v60, %v669_v62  ;;  %v725_v9 = vcombine.low %v660_v61, %v676_v63  ;;  %v726_v10 = vcombine.high %v660_v61, %v676_v63  ;;  %v1304_v13 = vpop.permute.xlu1 %1303 }
 0x215   : > { %v1514_v14 = vrot.slane %v1506_v3, %v4466_v49  ;;  %v1546_v15 = vrot.slane %v1538_v5, %v4466_v49  ;;  %v1346_v20 = vrot.slane %v1338_v11, %v4464_v43  ;;  %v1353_v21 = vrot.slane %v1339_v12, %v4464_v43 }
 0x216   : > { %v717_v16 = vrot.slane %v709_v7, %v4466_v49  ;;  %v724_v17 = vrot.slane %v710_v8, %v4466_v49  ;;  %v733_v18 = vrot.slane %v725_v9, %v4466_v49  ;;  %v740_v19 = vrot.slane %v726_v10, %v4466_v49  ;;  %v1578_v24 = vld [vmem:[#allocation2] sm:$0xff]  ;;  %v1579_v42 = vld [vmem:[#allocation2 + $0x8] sm:$0xff] }
 0x217   : > { %v1354_v22 = vcombine.low %v1298_v59, %v1304_v13  ;;  %v1355_v23 = vcombine.high %v1298_v59, %v1304_v13  ;;  %3578 = vmatpush3.xpose.msk.msra.mxu1 %vm885_vm2, %v1578_v24  ;;  %v1570_v32 = vcombine.low %v1514_v14, %v1546_v15  ;;  %v1571_v33 = vcombine.high %v1514_v14, %v1546_v15  ;;  %v1580_v3 = vld [vmem:[#allocation2 + $0x10] sm:$0xff] }
 0x218   : > { %v3429_v25 = vcombine.low %v717_v16, %v724_v17  ;;  %v3431_v26 = vcombine.high %v717_v16, %v724_v17  ;;  %v3433_v27 = vcombine.low %v733_v18, %v740_v19  ;;  %v3435_v28 = vcombine.high %v733_v18, %v740_v19  ;;  %3582 = vmatprep.subr.mxu1 %v4091_v1 }
 0x219   : > { %v1362_v29 = vrot.slane %v1354_v22, %v4464_v43  ;;  %v1369_v30 = vrot.slane %v1355_v23, %v4464_v43  ;;  %v1521_v14 = vrot.slane %v1507_v4, %v4466_v49  ;;  %v1553_v15 = vrot.slane %v1539_v6, %v4466_v49 }
 0x21a   : > { %v764_v34 = vrot.slane %v3429_v25, %v4464_v43  ;;  %v780_v35 = vrot.slane %v3431_v26, %v4464_v43  ;;  %v796_v36 = vrot.slane %v3433_v27, %v4464_v43  ;;  %v812_v37 = vrot.slane %v3435_v28, %v4464_v43  ;;  %3580 = vmatmul.mubr.msk.f32.vlgmr.msra.gmra.mrb[2].mxu1 %vm885_vm2, %v1570_v32 }
 0x21b   : > { %v1402_v38 = vcombine.low %v1346_v20, %v1362_v29  ;;  %v1403_v39 = vcombine.high %v1346_v20, %v1362_v29  ;;  %v1418_v40 = vcombine.low %v1353_v21, %v1369_v30  ;;  %v1419_v41 = vcombine.high %v1353_v21, %v1369_v30  ;;  %3583 = vmatpush3.xpose.msk.msra.mxu1 %vm885_vm2, %v1579_v42  ;;  %v1581_v20 = vld [vmem:[#allocation2 + $0x18] sm:$0xff]  ;;  %v896_v29 = vpop.permute.xlu0 %895  ;;  %v899_v30 = vpop.permute.xlu1 %898 }
 0x21c   : > { %v829_v44 = vcombine.low %v764_v34, %v780_v35  ;;  %v830_v45 = vcombine.high %v764_v34, %v780_v35  ;;  %v861_v46 = vcombine.low %v796_v36, %v812_v37  ;;  %v862_v47 = vcombine.high %v796_v36, %v812_v37  ;;  %3584 = vmatprep.mubr.msk.f32.mxu1 %vm4090_vm0, %v4091_v1 }
 0x21d   : > { %v1410_v48 = vrot.slane %v1402_v38, %v4466_v49  ;;  %v1417_v50 = vrot.slane %v1403_v39, %v4466_v49  ;;  %v1426_v51 = vrot.slane %v1418_v40, %v4466_v49  ;;  %v1433_v52 = vrot.slane %v1419_v41, %v4466_v49  ;;  %3587 = vmatprep.subr.mxu1 %v4091_v1 }
 0x21e   : > { %v837_v53 = vrot.slane %v829_v44, %v4466_v49  ;;  %v844_v54 = vrot.slane %v830_v45, %v4466_v49  ;;  %v869_v59 = vrot.slane %v861_v46, %v4466_v49  ;;  %v876_v60 = vrot.slane %v862_v47, %v4466_v49  ;;  %3585 = vmatmul.mubr.msk.f32.vlgmr.msra.gmra.mrb[4].mxu1 %vm885_vm2, %v1571_v33 }
 0x21f   : > { %v3447_v61 = vcombine.low %v1410_v48, %v1417_v50  ;;  %v3449_v62 = vcombine.high %v1410_v48, %v1417_v50  ;;  %v3451_v63 = vcombine.low %v1426_v51, %v1433_v52  ;;  %v3453_v2 = vcombine.high %v1426_v51, %v1433_v52  ;;  %3588 = vmatpush3.xpose.msk.msra.mxu1 %vm885_vm2, %v1580_v3  ;;  %v902_v34 = vpop.permute.xlu0 %901 }
 0x220   : > { %v881_v5 = vcombine.low %v837_v53, %v869_v59  ;;  %v882_v7 = vcombine.high %v837_v53, %v869_v59  ;;  %v883_v8 = vcombine.low %v844_v54, %v876_v60  ;;  %v884_v9 = vcombine.high %v844_v54, %v876_v60  ;;  %3589 = vmatprep.mubr.msk.f32.mxu1 %vm4090_vm0, %v4091_v1 }
 0x221   : > { %v1457_v10 = vrot.slane %v3447_v61, %v4464_v43  ;;  %v1473_v11 = vrot.slane %v3449_v62, %v4464_v43  ;;  %v1489_v12 = vrot.slane %v3451_v63, %v4464_v43  ;;  %v1505_v13 = vrot.slane %v3453_v2, %v4464_v43  ;;  %3592 = vmatprep.subr.mxu1 %v4091_v1 }
 0x222   : > { %890 = vst.msk [vmem:[#allocation2 + $0x20] sm:$0xff] %vm885_vm2, %v881_v5  ;;  %891 = vst.msk [vmem:[#allocation2 + $0x28] sm:$0xff] %vm885_vm2, %v882_v7  ;;  %v1572_v18 = vcombine.low %v1521_v14, %v1553_v15  ;;  %v1573_v57 = vcombine.high %v1521_v14, %v1553_v15  ;;  %v916_v32 = vcombine.low %v4456_v31, %v899_v30 }
 0x223   : > { %892 = vst.msk [vmem:[#allocation2 + $0x30] sm:$0xff] %vm885_vm2, %v883_v8  ;;  %893 = vst.msk [vmem:[#allocation2 + $0x38] sm:$0xff] %vm885_vm2, %v884_v9  ;;  %v1522_v16 = vcombine.low %v1457_v10, %v1473_v11  ;;  %v1554_v17 = vcombine.low %v1489_v12, %v1505_v13  ;;  %v1523_v19 = vcombine.high %v1457_v10, %v1473_v11 }
 0x224   : > { %3590 = vmatmul.mubr.msk.f32.vlgmr.msra.gmra.mrb[6].mxu1 %vm885_vm2, %v1572_v18  ;;  %v1555_v21 = vcombine.high %v1489_v12, %v1505_v13  ;;  %v917_v33 = vcombine.high %v4456_v31, %v899_v30  ;;  %v932_v35 = vcombine.low %v896_v29, %v902_v34  ;;  %v933_v36 = vcombine.high %v896_v29, %v902_v34 }
 0x225   : > { %3593 = vmatpush3.xpose.msk.msra.mxu1 %vm885_vm2, %v1581_v20  ;;  %3594 = vmatprep.mubr.msk.f32.mxu1 %vm4090_vm0, %v4091_v1  ;;  %v1530_v55 = vrot.slane %v1522_v16, %v4466_v49  ;;  %v1562_v56 = vrot.slane %v1554_v17, %v4466_v49  ;;  %v1537_v22 = vrot.slane %v1523_v19, %v4466_v49 }
 0x226   : > { %3602 = vmatprep.subr.mxu1 %v4091_v1  ;;  %v1569_v23 = vrot.slane %v1555_v21, %v4466_v49  ;;  %v924_v37 = vrot.slane %v916_v32, %v4464_v43  ;;  %v931_v38 = vrot.slane %v917_v33, %v4464_v43  ;;  %v940_v39 = vrot.slane %v932_v35, %v4464_v43 }
 0x227   : > { %v1574_v6 = vcombine.low %v1530_v55, %v1562_v56  ;;  %v1575_v24 = vcombine.high %v1530_v55, %v1562_v56  ;;  %v947_v40 = vrot.slane %v933_v36, %v4464_v43  ;;  %v908_v36 = vpop.permute.xlu1 %907 }
 0x228   : > { %3595 = vmatmul.mubr.msk.f32.vlgmr.msra.gmra.mrb[8].mxu1 %vm885_vm2, %v1573_v57  ;;  %v1576_v27 = vcombine.low %v1537_v22, %v1569_v23  ;;  %v1577_v28 = vcombine.high %v1537_v22, %v1569_v23  ;;  %v980_v41 = vcombine.low %v924_v37, %v940_v39  ;;  %v981_v42 = vcombine.high %v924_v37, %v940_v39  ;;  %v905_v37 = vpop.permute.xlu0 %904 }
 0x229   : > { %v1582_v58 = vld [vmem:[#allocation2 + $0x20] sm:$0xff]  ;;  %v1583_v4 = vld [vmem:[#allocation2 + $0x28] sm:$0xff]  ;;  %3604 = vmatprep.mubr.msk.f32.mxu1 %vm4090_vm0, %v4091_v1  ;;  %v996_v44 = vcombine.low %v931_v38, %v947_v40  ;;  %v997_v45 = vcombine.high %v931_v38, %v947_v40 }
 0x22a   : > { %3598 = vmatpush3.xpose.msk.msra.mxu0 %vm885_vm2, %v1582_v58  ;;  %3603 = vmatpush3.xpose.msk.msra.mxu1 %vm885_vm2, %v1583_v4  ;;  %v1584_v25 = vld [vmem:[#allocation2 + $0x30] sm:$0xff]  ;;  %v1585_v26 = vld [vmem:[#allocation2 + $0x38] sm:$0xff]  ;;  %v988_v46 = vrot.slane %v980_v41, %v4466_v49  ;;  %v995_v47 = vrot.slane %v981_v42, %v4466_v49 }
 0x22b   : > { %3607 = vmatprep.subr.mxu0 %v4091_v1  ;;  %3612 = vmatprep.subr.mxu1 %v4091_v1  ;;  %v1004_v48 = vrot.slane %v996_v44, %v4466_v49  ;;  %v1011_v50 = vrot.slane %v997_v45, %v4466_v49  ;;  %v911_v38 = vpop.permute.xlu1 %910 }
 0x22c   : > { %v3436_v51 = vcombine.low %v988_v46, %v995_v47  ;;  %v3438_v52 = vcombine.high %v988_v46, %v995_v47 }
 0x22d   : > { %3600 = vmatmul.mubr.msk.f32.vlgmr.msra.gmra.mrb[4].mxu0 %vm885_vm2, %v1574_v6  ;;  %3605 = vmatmul.mubr.msk.f32.vlgmr.msra.gmra.mrb[10].mxu1 %vm885_vm2, %v1575_v24  ;;  %v3440_v53 = vcombine.low %v1004_v48, %v1011_v50  ;;  %v3442_v54 = vcombine.high %v1004_v48, %v1011_v50 }
 0x22e   : > { %3608 = vmatpush3.xpose.msk.msra.mxu0 %vm885_vm2, %v1584_v25  ;;  %3613 = vmatpush3.xpose.msk.msra.mxu1 %vm885_vm2, %v1585_v26  ;;  %v1060_v59 = vrot.slane %v3436_v51, %v4464_v43  ;;  %v1076_v60 = vrot.slane %v3438_v52, %v4464_v43 }
 0x22f   : > { %3609 = vmatprep.mubr.msk.f32.mxu0 %vm4090_vm0, %v4091_v1  ;;  %3614 = vmatprep.mubr.msk.f32.mxu1 %vm4090_vm0, %v4091_v1  ;;  %v1092_v61 = vrot.slane %v3440_v53, %v4464_v43  ;;  %v1108_v62 = vrot.slane %v3442_v54, %v4464_v43 }
 0x230   : > { %3617 = vmatprep.subr.mxu0 %v4091_v1  ;;  %3622 = vmatprep.subr.mxu1 %v4091_v1  ;;  %v1116_v63 = vcombine.low %v1060_v59, %v1076_v60  ;;  %v1117_v2 = vcombine.high %v1060_v59, %v1076_v60 }
 0x231   : > { %3610 = vmatmul.mubr.msk.f32.vlgmr.msra.gmra.mrb[6].mxu0 %vm885_vm2, %v1576_v27  ;;  %3615 = vmatmul.mubr.msk.f32.vlgmr.msra.gmra.mrb[12].mxu1 %vm885_vm2, %v1577_v28  ;;  %v1148_v3 = vcombine.low %v1092_v61, %v1108_v62  ;;  %v1149_v5 = vcombine.high %v1092_v61, %v1108_v62 }
 0x232   : > { %3619 = vmatprep.mubr.msk.f32.mxu0 %vm4090_vm0, %v4091_v1  ;;  %3624 = vmatprep.mubr.msk.f32.mxu1 %vm4090_vm0, %v4091_v1  ;;  %v1124_v7 = vrot.slane %v1116_v63, %v4466_v49  ;;  %v1131_v8 = vrot.slane %v1117_v2, %v4466_v49 }
 0x233   : > { %v1156_v9 = vrot.slane %v1148_v3, %v4466_v49  ;;  %v1163_v10 = vrot.slane %v1149_v5, %v4466_v49 }
 0x235   : > { %v1180_v11 = vcombine.low %v1124_v7, %v1156_v9  ;;  %v1181_v12 = vcombine.high %v1124_v7, %v1156_v9  ;;  %v1182_v13 = vcombine.low %v1131_v8, %v1163_v10  ;;  %v1183_v14 = vcombine.high %v1131_v8, %v1163_v10 }
 0x236   : > { %v948_v7 = vcombine.low %v905_v37, %v911_v38  ;;  %v949_v10 = vcombine.high %v905_v37, %v911_v38 }
 0x237   : > { %1188 = vst.msk [vmem:[#allocation3] sm:$0xff] %vm885_vm2, %v1180_v11  ;;  %1189 = vst.msk [vmem:[#allocation3 + $0x8] sm:$0xff] %vm885_vm2, %v1181_v12 }
 0x238   : > { %1190 = vst.msk [vmem:[#allocation3 + $0x10] sm:$0xff] %vm885_vm2, %v1182_v13  ;;  %1191 = vst.msk [vmem:[#allocation3 + $0x18] sm:$0xff] %vm885_vm2, %v1183_v14 }
 0x23e   : > { %v1586_v15 = vld [vmem:[#allocation3] sm:$0xff]  ;;  %v1587_v16 = vld [vmem:[#allocation3 + $0x8] sm:$0xff] }
 0x23f   : > { %3618 = vmatpush3.msra.mxu0 %v1586_v15  ;;  %3623 = vmatpush3.msra.mxu1 %v1587_v16  ;;  %v1589_v61 = vld [vmem:[#allocation3 + $0x18] sm:$0xff] }
 0x240   : > { %3627 = vmatprep.subr.mxu0 %v4091_v1  ;;  %3632 = vmatprep.subr.mxu1 %v4091_v1 }
 0x2ed   : > { %v1667_v17 = vpop.f32.mrb[2].mxu1 }
 0x2ee   : > { %v3581_v18 = vpop.f32.mrb[3].mxu1  ;;  %v2204_v19 = vsel %vm2203_vm3, %v1667_v17, -inf }
 0x2ef   : > { %2205 = vmax.xlane.f32.xlu0 %v2204_v19  ;;  %v963_v18 = vrot.slane %v949_v10, %v4464_v43 }
 0x2f1   : > { %v1743_v20 = vpop.f32.mrb[4].mxu1 }
 0x2f2   : > { %v3586_v21 = vpop.f32.mrb[5].mxu1  ;;  %v2207_v55 = vsel %vm2203_vm3, %v1743_v20, -inf }
 0x2f3   : > { %2208 = vmax.xlane.f32.xlu1 %v2207_v55 }
 0x2f7   : > { %v1819_v56 = vpop.f32.mrb[6].mxu1 }
 0x2f8   : > { %v3591_v57 = vpop.f32.mrb[7].mxu1  ;;  %v2210_v58 = vsel %vm2203_vm3, %v1819_v56, -inf }
 0x2f9   : > { %2211 = vmax.xlane.f32.xlu1 %v2210_v58 }
 0x2fb   : > { %v4631_v4 = vpop.f32.mrb[8].mxu1 }
 0x2fc   : > { %v3596_v6 = vpop.f32.mrb[9].mxu1  ;;  %v2213_v32 = vsel %vm2203_vm3, %v4631_v4, -inf }
 0x300   : > { %v1971_v22 = vpop.f32.mrb[4].mxu0  ;;  %v2047_v23 = vpop.f32.mrb[10].mxu1 }
 0x301   : > { %v3601_v24 = vpop.f32.mrb[5].mxu0  ;;  %v2216_v25 = vsel %vm2203_vm3, %v1971_v22, -inf  ;;  %v3606_v26 = vpop.f32.mrb[11].mxu1  ;;  %v2219_v27 = vsel %vm2203_vm3, %v2047_v23, -inf }
 0x302   : > { %2217 = vmax.xlane.f32.xlu0 %v2216_v25  ;;  %2220 = vmax.xlane.f32.xlu1 %v2219_v27 }
 0x304   : > { %v2123_v28 = vpop.f32.mrb[6].mxu0  ;;  %v4635_v29 = vpop.f32.mrb[12].mxu1 }
 0x305   : > { %v3611_v30 = vpop.f32.mrb[7].mxu0  ;;  %v2222_v33 = vsel %vm2203_vm3, %v2123_v28, -inf  ;;  %v3616_v34 = vpop.f32.mrb[13].mxu1  ;;  %v2225_v35 = vsel %vm2203_vm3, %v4635_v29, -inf }
 0x306   : > { %2214 = vmax.xlane.f32.xlu0 %v2213_v32  ;;  %2223 = vmax.xlane.f32.xlu1 %v2222_v33 }
 0x31c   : > { %913 = vrot.lane.b32.xlu0 %v4456_v31, %s4098_s19  ;;  %v1588_v31 = vld [vmem:[#allocation3 + $0x10] sm:$0xff]  ;;  %s4842_s19 = sld [smem:[#allocation20_spill]] }
 0x33b   : > { %2226 = vmax.xlane.f32.xlu0 %v2225_v35 }
 0x37c   : > { %v2206_v39 = vpop.xlane.xlu0 %2205 }
 0x37d   : > { %v2228_v40 = vsub.f32 %v1667_v17, %v2206_v39  ;;  %v956_v17 = vrot.slane %v948_v7, %v4464_v43 }
 0x37f   : > { %v2236_v41 = vmul.f32 1.442695, %v2228_v40 }
 0x380   : > { %v2209_v42 = vpop.xlane.xlu1 %2208 }
 0x381   : > { %3816 = vpow2.f32 %v2236_v41  ;;  %v2229_v44 = vsub.f32 %v1743_v20, %v2209_v42 }
 0x383   : > { %v2238_v45 = vmul.f32 1.442695, %v2229_v44 }
 0x385   : > { %3818 = vpow2.f32 %v2238_v45 }
 0x386   : > { %v2212_v46 = vpop.xlane.xlu1 %2211 }
 0x387   : > { %v2230_v47 = vsub.f32 %v1819_v56, %v2212_v46 }
 0x389   : > { %v2240_v48 = vmul.f32 1.442695, %v2230_v47 }
 0x38b   : > { %v3817_v50 = vpop.eup %3816  ;;  %3820 = vpow2.f32 %v2240_v48 }
 0x38c   : > { %3620 = vmatmul.mubr.msk.f32.vlgmr.msra.gmra.mrb[8].mxu0 %vm2203_vm3, %v3817_v50  ;;  %v2252_v51 = vsel %vm2203_vm3, %v3817_v50, 0.0 }
 0x38d   : > { %3628 = vmatpush3.msra.mxu0 %v1588_v31  ;;  %2253 = vadd.xlane.f32.xlu0 %v2252_v51 }
 0x38e   : > { %3629 = vmatprep.mubr.msk.f32.mxu0 %vm4090_vm0, %v4091_v1  ;;  %3637 = vmatprep.subr.mxu0 %v4091_v1 }
 0x38f   : > { %v2218_v52 = vpop.xlane.xlu0 %2217  ;;  %v3819_v53 = vpop.eup %3818 }
 0x390   : > { %v2221_v54 = vpop.xlane.xlu1 %2220  ;;  %v2232_v59 = vsub.f32 %v1971_v22, %v2218_v52  ;;  %3625 = vmatmul.mubr.msk.f32.vlgmr.msra.gmra.mrb[14].mxu1 %vm2203_vm3, %v3819_v53  ;;  %v2255_v62 = vsel %vm2203_vm3, %v3819_v53, 0.0 }
 0x391   : > { %v2233_v60 = vsub.f32 %v2047_v23, %v2221_v54  ;;  %3633 = vmatpush3.msra.mxu1 %v1589_v61  ;;  %2256 = vadd.xlane.f32.xlu1 %v2255_v62 }
 0x392   : > { %v2244_v63 = vmul.f32 1.442695, %v2232_v59  ;;  %3634 = vmatprep.mubr.msk.f32.mxu1 %vm4090_vm0, %v4091_v1  ;;  %3642 = vmatprep.subr.mxu1 %v4091_v1 }
 0x393   : > { %v2215_v2 = vpop.xlane.xlu0 %2214  ;;  %v2246_v8 = vmul.f32 1.442695, %v2233_v60 }
 0x394   : > { %3822 = vpow2.f32 %v2244_v63  ;;  %v2231_v3 = vsub.f32 %v4631_v4, %v2215_v2  ;;  %v2224_v5 = vpop.xlane.xlu1 %2223 }
 0x395   : > { %v2234_v9 = vsub.f32 %v2123_v28, %v2224_v5  ;;  %v3821_v12 = vpop.eup %3820 }
 0x396   : > { %v2242_v11 = vmul.f32 1.442695, %v2231_v3  ;;  %3630 = vmatmul.mubr.msk.f32.vlgmr.msra.gmra.mrb[10].mxu0 %vm2203_vm3, %v3821_v12  ;;  %v2258_v37 = vsel %vm2203_vm3, %v3821_v12, 0.0 }
 0x397   : > { %v2248_v13 = vmul.f32 1.442695, %v2234_v9  ;;  %v914_v14 = vpop.permute.xlu0 %913  ;;  %3639 = vmatprep.mubr.msk.f32.mxu0 %vm4090_vm0, %v4091_v1 }
 0x398   : > { %3824 = vpow2.f32 %v2242_v11  ;;  %v964_v15 = vcombine.low %v908_v36, %v914_v14  ;;  %v965_v16 = vcombine.high %v908_v36, %v914_v14 }
 0x399   : > { %3826 = vpow2.f32 %v2246_v8 }
 0x39a   : > { %3828 = vpow2.f32 %v2248_v13  ;;  %v972_v19 = vrot.slane %v964_v15, %v4464_v43  ;;  %v979_v20 = vrot.slane %v965_v16, %v4464_v43 }
 0x39c   : > { %v1012_v21 = vcombine.low %v956_v17, %v972_v19  ;;  %v1013_v55 = vcombine.high %v956_v17, %v972_v19  ;;  %v1028_v56 = vcombine.low %v963_v18, %v979_v20  ;;  %v1029_v57 = vcombine.high %v963_v18, %v979_v20 }
 0x39e   : > { %v3823_v58 = vpop.eup %3822  ;;  %v1020_v4 = vrot.slane %v1012_v21, %v4466_v49  ;;  %v1027_v6 = vrot.slane %v1013_v55, %v4466_v49  ;;  %v1036_v22 = vrot.slane %v1028_v56, %v4466_v49  ;;  %v1043_v23 = vrot.slane %v1029_v57, %v4466_v49 }
 0x39f   : > { %v2264_v24 = vsel %vm2203_vm3, %v3823_v58, 0.0 }
 0x3a0   : > { %v3437_v25 = vcombine.low %v1020_v4, %v1027_v6  ;;  %v3439_v26 = vcombine.high %v1020_v4, %v1027_v6  ;;  %v3441_v27 = vcombine.low %v1036_v22, %v1043_v23  ;;  %v3443_v28 = vcombine.high %v1036_v22, %v1043_v23  ;;  %2265 = vadd.xlane.f32.xlu0 %v2264_v24 }
 0x3a2   : > { %v3825_v30 = vpop.eup %3824  ;;  %v1067_v32 = vrot.slane %v3437_v25, %v4464_v43  ;;  %v1083_v33 = vrot.slane %v3439_v26, %v4464_v43  ;;  %v1099_v34 = vrot.slane %v3441_v27, %v4464_v43  ;;  %v1115_v35 = vrot.slane %v3443_v28, %v4464_v43 }
 0x3a3   : > { %v3827_v36 = vpop.eup %3826  ;;  %3635 = vmatmul.mubr.msk.f32.vlgmr.msra.gmra.mrb[16].mxu1 %vm2203_vm3, %v3825_v30  ;;  %v2261_v38 = vsel %vm2203_vm3, %v3825_v30, 0.0 }
 0x3a4   : > { %v3829_v39 = vpop.eup %3828  ;;  %v1132_v40 = vcombine.low %v1067_v32, %v1083_v33  ;;  %v1133_v41 = vcombine.high %v1067_v32, %v1083_v33  ;;  %v1164_v42 = vcombine.low %v1099_v34, %v1115_v35  ;;  %v1165_v44 = vcombine.high %v1099_v34, %v1115_v35  ;;  %2259 = vadd.xlane.f32.xlu0 %v2258_v37 }
 0x3a5   : > { %2262 = vadd.xlane.f32.xlu1 %v2261_v38  ;;  %3644 = vmatprep.mubr.msk.f32.mxu1 %vm4090_vm0, %v4091_v1  ;;  %v2267_v50 = vsel %vm2203_vm3, %v3827_v36, 0.0  ;;  %v2270_v31 = vsel %vm2203_vm3, %v3829_v39, 0.0 }
 0x3a6   : > { %v1140_v45 = vrot.slane %v1132_v40, %v4466_v49  ;;  %v1147_v46 = vrot.slane %v1133_v41, %v4466_v49  ;;  %v1172_v47 = vrot.slane %v1164_v42, %v4466_v49  ;;  %v1179_v48 = vrot.slane %v1165_v44, %v4466_v49 }
 0x3a8   : > { %v1184_v51 = vcombine.low %v1140_v45, %v1172_v47  ;;  %v1185_v52 = vcombine.high %v1140_v45, %v1172_v47  ;;  %v1186_v53 = vcombine.low %v1147_v46, %v1179_v48  ;;  %v1187_v54 = vcombine.high %v1147_v46, %v1179_v48  ;;  %2271 = vadd.xlane.f32.xlu0 %v2270_v31  ;;  %v3188_v45 = vld [vmem:[#allocation12] sm:$0xff]  ;;  %v3189_v46 = vld [vmem:[#allocation12 + $0x8] sm:$0xff] }
 0x3a9   : > { %2268 = vadd.xlane.f32.xlu1 %v2267_v50 }
 0x3aa   : > { %1192 = vst.msk [vmem:[#allocation3 + $0x20] sm:$0xff] %vm885_vm2, %v1184_v51  ;;  %1193 = vst.msk [vmem:[#allocation3 + $0x28] sm:$0xff] %vm885_vm2, %v1185_v52  ;;  %v3687_v51 = vpack.c.bf16 %v3189_v46, %v3188_v45 }
 0x3ab   : > { %1194 = vst.msk [vmem:[#allocation3 + $0x30] sm:$0xff] %vm885_vm2, %v1186_v53  ;;  %1195 = vst.msk [vmem:[#allocation3 + $0x38] sm:$0xff] %vm885_vm2, %v1187_v54 }
 0x3b1   : > { %v1590_v59 = vld [vmem:[#allocation3 + $0x20] sm:$0xff]  ;;  %v1591_v60 = vld [vmem:[#allocation3 + $0x28] sm:$0xff] }
 0x3b2   : > { %3638 = vmatpush3.msra.mxu0 %v1590_v59  ;;  %3643 = vmatpush3.msra.mxu1 %v1591_v60  ;;  %v1592_v61 = vld [vmem:[#allocation3 + $0x30] sm:$0xff]  ;;  %v1593_v62 = vld [vmem:[#allocation3 + $0x38] sm:$0xff] }
 0x3b3   : > { %3640 = vmatmul.mubr.msk.f32.vlgmr.msra.gmra.mrb[12].mxu0 %vm2203_vm3, %v3823_v58  ;;  %3645 = vmatmul.mubr.msk.f32.vlgmr.msra.gmra.mrb[18].mxu1 %vm2203_vm3, %v3827_v36 }
 0x3b4   : > { %3647 = vmatprep.subr.mxu0 %v4091_v1  ;;  %3652 = vmatprep.subr.mxu1 %v4091_v1 }
 0x3b5   : > { %3648 = vmatpush3.msra.mxu0 %v1592_v61  ;;  %3653 = vmatpush3.msra.mxu1 %v1593_v62 }
 0x3b6   : > { %3649 = vmatprep.mubr.msk.f32.mxu0 %vm4090_vm0, %v4091_v1  ;;  %3654 = vmatprep.mubr.msk.f32.mxu1 %vm4090_vm0, %v4091_v1 }
 0x3b7   : > { %3650 = vmatmul.mubr.msk.f32.vlgmr.msra.gmra.mrb[14].mxu0 %vm2203_vm3, %v3829_v39  ;;  %3686 = vmatprep.subr.bf16.mxu0 %v4089_v0 }
 0x3b8   : > { %3665 = vmatprep.mubr.msk.f32.mxu0 %vm4090_vm0, %v4091_v1  ;;  %3688 = vmatpush3.bf16.msra.mxu0 %v3687_v51 }
 0x3b9   : > { %3689 = vmatprep.subr.bf16.mxu0 %v4089_v0 }
 0x3c8   : > { %v2227_v63 = vpop.xlane.xlu0 %2226 }
 0x3c9   : > { %v2235_v2 = vsub.f32 %v4635_v29, %v2227_v63 }
 0x3cb   : > { %v2250_v3 = vmul.f32 1.442695, %v2235_v2 }
 0x3cd   : > { %3830 = vpow2.f32 %v2250_v3 }
 0x3d7   : > { %v3831_v5 = vpop.eup %3830 }
 0x3d8   : > { %3655 = vmatmul.mubr.msk.f32.vlgmr.msra.gmra.mrb[20].mxu1 %vm2203_vm3, %v3831_v5  ;;  %v2273_v7 = vsel %vm2203_vm3, %v3831_v5, 0.0 }
 0x3d9   : > { %2274 = vadd.xlane.f32.xlu1 %v2273_v7 }
 0x41a   : > { %v2254_v8 = vpop.xlane.xlu0 %2253 }
 0x41b   : > { %3832 = vrcp.f32 %v2254_v8 }
 0x41e   : > { %v2257_v1 = vpop.xlane.xlu1 %2256 }
 0x425   : > { %v3833_v29 = vpop.eup %3832 }
 0x42d   : > { %v2266_v9 = vpop.xlane.xlu0 %2265 }
 0x431   : > { %v2260_v10 = vpop.xlane.xlu0 %2259 }
 0x432   : > { %3834 = vrcp.f32 %v2260_v10  ;;  %v2263_v15 = vpop.xlane.xlu1 %2262 }
 0x433   : > { %3836 = vrcp.f32 %v2257_v1 }
 0x434   : > { %3838 = vrcp.f32 %v2263_v15 }
 0x435   : > { %v2272_v30 = vpop.xlane.xlu0 %2271  ;;  %3840 = vrcp.f32 %v2266_v9 }
 0x436   : > { %3842 = vrcp.f32 %v2272_v30  ;;  %v3190_v30 = vld [vmem:[#allocation12 + $0x10] sm:$0xff] }
 0x43c   : > { %v3835_v16 = vpop.eup %3834 }
 0x43d   : > { %v3837_v56 = vpop.eup %3836 }
 0x43e   : > { %v3839_v57 = vpop.eup %3838 }
 0x43f   : > { %v3841_v5 = vpop.eup %3840 }
 0x45f   : > { %v2345_v11 = vpop.f32.mrb[8].mxu0 }
 0x460   : > { %v3621_v12 = vpop.f32.mrb[9].mxu0  ;;  %v2868_v18 = vmul.f32 %v3833_v29, %v2345_v11  ;;  %v3843_v11 = vpop.eup %3842 }
 0x463   : > { %v2418_v13 = vpop.f32.mrb[14].mxu1 }
 0x464   : > { %v3626_v14 = vpop.f32.mrb[15].mxu1  ;;  %v2869_v4 = vmul.f32 %v3837_v56, %v2418_v13 }
 0x469   : > { %v2491_v17 = vpop.f32.mrb[10].mxu0 }
 0x46a   : > { %v2870_v19 = vmul.f32 %v3835_v16, %v2491_v17  ;;  %v3631_v20 = vpop.f32.mrb[11].mxu0  ;;  %v2269_v17 = vpop.xlane.xlu1 %2268 }
 0x46b   : > { %3844 = vrcp.f32 %v2269_v17 }
 0x46c   : > { %v2876_v21 = vcombine.low %v2868_v18, %v2870_v19  ;;  %v2877_v55 = vcombine.high %v2868_v18, %v2870_v19 }
 0x46e   : > { %v2884_v25 = vrot.slane %v2876_v21, %v4464_v43  ;;  %v2891_v26 = vrot.slane %v2877_v55, %v4464_v43  ;;  %v2275_v18 = vpop.xlane.xlu1 %2274 }
 0x46f   : > { %3846 = vrcp.f32 %v2275_v18 }
 0x475   : > { %v3845_v19 = vpop.eup %3844 }
 0x476   : > { %v2564_v58 = vpop.f32.mrb[16].mxu1 }
 0x477   : > { %v2871_v6 = vmul.f32 %v3839_v57, %v2564_v58  ;;  %v3636_v22 = vpop.f32.mrb[17].mxu1 }
 0x479   : > { %v2892_v23 = vcombine.low %v2869_v4, %v2871_v6  ;;  %v2893_v24 = vcombine.high %v2869_v4, %v2871_v6  ;;  %v3847_v20 = vpop.eup %3846 }
 0x47b   : > { %v2900_v27 = vrot.slane %v2892_v23, %v4464_v43  ;;  %v2907_v28 = vrot.slane %v2893_v24, %v4464_v43 }
 0x47d   : > { %v2940_v32 = vcombine.low %v2884_v25, %v2900_v27  ;;  %v2941_v33 = vcombine.high %v2884_v25, %v2900_v27  ;;  %v2956_v34 = vcombine.low %v2891_v26, %v2907_v28  ;;  %v2957_v35 = vcombine.high %v2891_v26, %v2907_v28 }
 0x47f   : > { %v2948_v36 = vrot.slane %v2940_v32, %v4466_v49  ;;  %v2955_v37 = vrot.slane %v2941_v33, %v4466_v49  ;;  %v2964_v38 = vrot.slane %v2956_v34, %v4466_v49  ;;  %v2971_v39 = vrot.slane %v2957_v35, %v4466_v49  ;;  %v3191_v32 = vld [vmem:[#allocation12 + $0x18] sm:$0xff] }
 0x481   : > { %v3478_v40 = vcombine.low %v2948_v36, %v2955_v37  ;;  %v3480_v41 = vcombine.high %v2948_v36, %v2955_v37  ;;  %v3482_v42 = vcombine.low %v2964_v38, %v2971_v39  ;;  %v3484_v44 = vcombine.high %v2964_v38, %v2971_v39 }
 0x482   : > { %v3690_v37 = vpack.c.bf16 %v3191_v32, %v3190_v30 }
 0x483   : > { %v3020_v47 = vrot.slane %v3478_v40, %v4464_v43  ;;  %v3036_v48 = vrot.slane %v3480_v41, %v4464_v43  ;;  %v3052_v50 = vrot.slane %v3482_v42, %v4464_v43  ;;  %v3068_v31 = vrot.slane %v3484_v44, %v4464_v43 }
 0x484   : > { %3691 = vmatpush3.bf16.msra.mxu0 %v3690_v37 }
 0x485   : > { %v3077_v52 = vcombine.high %v3020_v47, %v3036_v48  ;;  %v3109_v53 = vcombine.high %v3052_v50, %v3068_v31  ;;  %v3076_v54 = vcombine.low %v3020_v47, %v3036_v48  ;;  %v3108_v59 = vcombine.low %v3052_v50, %v3068_v31 }
 0x486   : > { %v2637_v60 = vpop.f32.mrb[12].mxu0  ;;  %v2710_v61 = vpop.f32.mrb[18].mxu1 }
 0x487   : > { %v3641_v62 = vpop.f32.mrb[13].mxu0  ;;  %v3646_v63 = vpop.f32.mrb[19].mxu1  ;;  %v3091_v2 = vrot.slane %v3077_v52, %v4466_v49  ;;  %v3123_v3 = vrot.slane %v3109_v53, %v4466_v49  ;;  %v4717_v7 = vrot.slane %v3076_v54, %v4466_v49  ;;  %v4720_v8 = vrot.slane %v3108_v59, %v4466_v49 }
 0x488   : > { %v2872_v14 = vmul.f32 %v3841_v5, %v2637_v60  ;;  %v2873_v55 = vmul.f32 %v3845_v19, %v2710_v61 }
 0x489   : > { %v3142_v9 = vcombine.low %v3091_v2, %v3123_v3  ;;  %v3143_v10 = vcombine.high %v3091_v2, %v3123_v3  ;;  %v3141_v13 = vcombine.high %v4717_v7, %v4720_v8  ;;  %v3140_v1 = vcombine.low %v4717_v7, %v4720_v8 }
 0x48a   : > { %v2783_v12 = vpop.f32.mrb[14].mxu0 }
 0x48b   : > { %v2874_v15 = vmul.f32 %v3843_v11, %v2783_v12  ;;  %3153 = vrot.lane.b32.xlu1 %v3142_v9, %s4101_s16  ;;  %v3651_v0 = vpop.f32.mrb[15].mxu0  ;;  %3149 = vrot.lane.b32.xlu0 %v3141_v13, %s4102_s17  ;;  %s3288_s16 = sshll.u32 %s419_s22, 4  ;;  %s4759_s16 = int_to_ptr.vmem [resolvable:$true] %s3288_s16 }
 0x48c   : > { %p3997_p0 = scmp.lt.s32.totalorder %s4759_s16, %s3995_s23 }
 0x48d   : > { %v2908_v29 = vcombine.low %v2872_v14, %v2874_v15  ;;  %v2909_v16 = vcombine.high %v2872_v14, %v2874_v15  ;;  %v3486_v14 = vld [vmem:[%s4842_s19] ss:$0 sm:$0xff] }
 0x48f   : > { %3157 = vrot.lane.b32.xlu1 %v3143_v10, %s4103_s12  ;;  %v2916_v6 = vrot.slane %v2908_v29, %v4464_v43  ;;  %v2923_v22 = vrot.slane %v2909_v16, %v4464_v43 }
 0x4ab   : > { %v2856_v21 = vpop.f32.mrb[20].mxu1 }
 0x4ac   : > { %v2875_v56 = vmul.f32 %v3847_v20, %v2856_v21  ;;  %v3656_v57 = vpop.f32.mrb[21].mxu1 }
 0x4ae   : > { %v2924_v58 = vcombine.low %v2873_v55, %v2875_v56  ;;  %v2925_v4 = vcombine.high %v2873_v55, %v2875_v56 }
 0x4b0   : > { %v2932_v23 = vrot.slane %v2924_v58, %v4464_v43  ;;  %v2939_v24 = vrot.slane %v2925_v4, %v4464_v43 }
 0x4b2   : > { %v2972_v25 = vcombine.low %v2916_v6, %v2932_v23  ;;  %v2973_v26 = vcombine.high %v2916_v6, %v2932_v23  ;;  %v2988_v27 = vcombine.low %v2923_v22, %v2939_v24  ;;  %v2989_v28 = vcombine.high %v2923_v22, %v2939_v24 }
 0x4b4   : > { %v2980_v33 = vrot.slane %v2972_v25, %v4466_v49  ;;  %v2987_v34 = vrot.slane %v2973_v26, %v4466_v49  ;;  %v2996_v35 = vrot.slane %v2988_v27, %v4466_v49  ;;  %v3003_v36 = vrot.slane %v2989_v28, %v4466_v49 }
 0x4b6   : > { %v3479_v38 = vcombine.low %v2980_v33, %v2987_v34  ;;  %v3481_v39 = vcombine.high %v2980_v33, %v2987_v34  ;;  %v3483_v40 = vcombine.low %v2996_v35, %v3003_v36  ;;  %v3485_v41 = vcombine.high %v2996_v35, %v3003_v36 }
 0x4b8   : > { %v3027_v42 = vrot.slane %v3479_v38, %v4464_v43  ;;  %v3043_v44 = vrot.slane %v3481_v39, %v4464_v43  ;;  %v3059_v45 = vrot.slane %v3483_v40, %v4464_v43  ;;  %v3075_v46 = vrot.slane %v3485_v41, %v4464_v43 }
 0x4ba   : > { %v3092_v47 = vcombine.low %v3027_v42, %v3043_v44  ;;  %v3124_v48 = vcombine.low %v3059_v45, %v3075_v46  ;;  %v3093_v50 = vcombine.high %v3027_v42, %v3043_v44  ;;  %v3125_v31 = vcombine.high %v3059_v45, %v3075_v46 }
 0x4bc   : > { %v3100_v51 = vrot.slane %v3092_v47, %v4466_v49  ;;  %v3132_v52 = vrot.slane %v3124_v48, %v4466_v49  ;;  %v3107_v53 = vrot.slane %v3093_v50, %v4466_v49  ;;  %v3139_v54 = vrot.slane %v3125_v31, %v4466_v49 }
 0x4be   : > { %v3145_v59 = vcombine.high %v3100_v51, %v3132_v52  ;;  %v3144_v60 = vcombine.low %v3100_v51, %v3132_v52  ;;  %v3147_v61 = vcombine.high %v3107_v53, %v3139_v54  ;;  %v3146_v62 = vcombine.low %v3107_v53, %v3139_v54 }
 0x4c0   : > { %3165 = vrot.lane.b32.xlu1 %v3145_v59, %s4104_s8  ;;  %3161 = vrot.lane.b32.xlu0 %v3144_v60, %s4105_s9  ;;  %s4843_s8 = sld [smem:[#allocation21_spill]] }
 0x4c4   : > { %3173 = vrot.lane.b32.xlu1 %v3147_v61, %s4106_s26  ;;  %3169 = vrot.lane.b32.xlu0 %v3146_v62, %s4107_s27  ;;  %s3274_s26 = scalar_lea.sflag [#allocation6], %s4397_s1  ;;  %s3990_s27 = scalar_lea.vmem %s4759_s16, 128 }
 0x4c5   : > { %p3991_p2 = scmp.ne.s32.totalorder %s4759_s16, %s3990_s27  ;;  %p3998_p7 = scmp.lt.s32.totalorder %s3996_s20, %s3990_s27 }
 0x4c6   : > { %s4757_s9 = scalar_lea.hbm %s4843_s8, %s3489_s24 }
 0x4c7   : > { %p3992_p10 = pnand %p3991_p2, %p4844_p9  ;;  %p3999_p5 = por %p3998_p7, %p3997_p0 }
 0x4c9   : > { %p3993_p1 = pneg %p3992_p10 }
 0x4cb   : > { %p4000_p8 = pnand %p3999_p5, %p3993_p1 }
 0x4fd   : > { %v3154_v43 = vpop.permute.xlu1 %3153  ;;  %v3150_v63 = vpop.permute.xlu0 %3149 }
 0x4fe   : > { %v3176_v2 = vsel %vm885_vm2, %v3140_v1, %v3150_v63 }
 0x4ff   : > { %v3177_v3 = vsel %vm2203_vm3, %v3176_v2, %v3154_v43 }
 0x501   : > { %v3158_v49 = vpop.permute.xlu1 %3157 }
 0x502   : > { %v3179_v5 = vsel %vm3178_vm4, %v3177_v3, %v3158_v49 }
 0x532   : > { %v3166_v9 = vpop.permute.xlu1 %3165  ;;  %v3162_v10 = vpop.permute.xlu0 %3161 }
 0x533   : > { %v3181_v11 = vsel %vm3180_vm5, %v3179_v5, %v3162_v10 }
 0x534   : > { %v3183_v13 = vsel %vm3182_vm6, %v3181_v11, %v3166_v9 }
 0x536   : > { %v3174_v12 = vpop.permute.xlu1 %3173  ;;  %v3170_v7 = vpop.permute.xlu0 %3169 }
 0x537   : > { %v3185_v8 = vsel %vm3184_vm7, %v3183_v13, %v3170_v7 }
 0x538   : > { %v3187_v1 = vsel %vm3186_vm8, %v3185_v8, %v3174_v12 }
 0x539   : > { %3666 = vmatmul.mubr.msk.f32.vlgmr.msra.gmra.mrb[16].mxu0 %vm436_vm1, %v3187_v1 }
 0x60c   : > { %v3268_v15 = vpop.f32.mrb[16].mxu0 }
 0x60d   : > { %v3269_v0 = vadd.f32 %v3486_v14, %v3268_v15  ;;  %v3667_v29 = vpop.f32.mrb[17].mxu0 }
 0x60f   : > { %3272 = vst.msk [vmem:[%s419_s22] sm:$0xff] %vm436_vm1, %v3269_v0 }
 0x610   : > { %4003 = shalt.err (!%p4000_p8)
}
 0x611   : > { %s4004_s1 = scalar_lea.hbm %s4757_s9, 128  ;;  %s4008_s24 = scalar_lea.hbm %s4843_s8, 256 }
 0x612   : > { %p4005_p3 = scmp.ne.s32.totalorder %s4757_s9, %s4004_s1  ;;  %p4009_p13 = scmp.lt.u32.totalorder %s4757_s9, %s4843_s8 }
 0x613   : > { %p4010_p12 = scmp.lt.u32.totalorder %s4008_s24, %s4004_s1  ;;  %p4012_p2 = scmp.lt.u32.totalorder %s4004_s1, %s4757_s9 }
 0x614   : > { %p4006_p11 = pnand %p4005_p3, %p4844_p9 }
 0x615   : > { %p4011_p4 = por %p4010_p12, %p4009_p13 }
 0x616   : > { %p4007_p6 = pneg %p4006_p11 }
 0x617   : > { %p4013_p10 = por %p4012_p2, %p4011_p4 }
 0x619   : > { %p4014_p1 = pnand %p4013_p10, %p4007_p6 }
 0x61b   : > { %4017 = shalt.err (!%p4014_p1)
}
 0x61c   : > { %3710 = dma.vmem_to_hbm [thread:$0]  (%p4844_p9), %s4759_s16, 128, %s4757_s9, %s3274_s26  }
 0x61d PF: > { %s3300_s12 = sand.u32 1, %s4060_s30   ;;  %p4845_p0 = scmp.ne.s32.totalorder %s4837_s21, 0 }
 0x61e   : > { %p4846_p7 = scmp.ge.s32.totalorder %s4080_s14, 2  ;;  %s3301_s27 = scalar_lea.sflag [#allocation6], %s3300_s12 }
 0x620   : > { %p3730_p5 = pnand %p4846_p7, %p4845_p0 }
 0x622   : > { %4055 = dma.done.wait (!%p3730_p5), %s3301_s27, 128  }
 0x623   : > { %4057 = vsyncadd (!%p3730_p5), %s3301_s27, 4294967168  ;;  %s27_s14 = sadd.s32 1, %s4080_s14   ;;  %s4847_s30 = smov %s4064_s10 }
 0x624   : > { %p24_p8 = scmp.ge.s32.totalorder %s27_s14, 4   ;;  %s4848_s10 = smov %s4068_s11 }
 0x625   : > { %s4849_s11 = smov %s4347_s29  ;;  %s4850_s12 = smov %s4076_s13 }
 0x626   : > { %s4851_s13 = smov %s4853_s18  ;;  %26 = sbr.rel (!%p24_p8) target bundleno = 12 (0xc), region = 122 }
 0x62d   :  { %3306 = vsyncpa [#allocation5], 1 }
 0x62e   :  { %3308 = vsyncpa [#allocation5 + $0x1], 1 }
 0x62f   :  { %3309 = vsyncpa [#allocation8], 1 }
 0x630   :  { %3310 = vsyncpa [#allocation11], 1 }
 0x631   :  { %3311 = vsyncpa [#allocation6], 1 }
 0x632   :  { %3313 = vsyncpa [#allocation6 + $0x1], 1 }

</bundles_post_ra>
